<compile_context>
chip_gen: v7x
topology: tpu7x:2x2x1
jax: 0.10.0
libtpu: 0.0.40
codegen_flags: <defaults>
</compile_context>

<pallas_src>
from itertools import permutations

import numpy as np
from numpy.random import randint

import jax
import jax.numpy as jnp
from jax import lax
from jax.experimental import pallas as pl
from jax.experimental.pallas import tpu as pltpu

# ---- small synthetic dims (real model: C=512, MEM=512, R=1000, classes=61) ----
T = 4             # sequence length
B = 2             # batch
HW = 7            # feature-map spatial size (ResNet34 conv5 output is 7x7)
S = HW * HW       # 49
C_FEAT = 32       # backbone feature channels      (real 512)
MEM = 32          # ConvLSTM mem_size              (real 512)
GATES = 4 * MEM   # fused i,f,c,o gate width
R_CLS = 16        # backbone "ImageNet" logits     (real 1000)
NUM_CLASSES = 10  # action classes                 (real 61)
PERM_LEN = 3
NUM_PERMS = 3     # (real 10)
IN_H = IN_W = 14  # synthetic input frames (real 224x224); 2x avg-pool -> 7x7
C_IN_PAD = 8      # rgb channels zero-padded 3 -> 8 for a clean MXU contraction


# ------------------------- permutation helpers (host glue, verbatim) ----------
def hamming_distance(perm1, perm2):
    dist_counter = 0
    equal_counter = 0
    for n in range(len(perm1)):
        if perm1[n] != perm2[n]:
            dist_counter += 1
        if perm1[n] not in perm1:
            equal_counter += 1
    return dist_counter + equal_counter


def GetBestIndexPermutation(perm, num_permutations):
    best = {}
    for i in range(len(perm)):
        for j in range(i):
            best[i, j] = hamming_distance(perm[i], perm[j])
    sorted_best = {k: v for k, v in sorted(best.items(), key=lambda item: -item[1])}
    res, count = [], 0
    for k in sorted_best.keys():
        if k[0] not in res:
            res.append(k[0])
            count += 1
        if count == num_permutations:
            break
    return np.array(res)


def gen_permutations(length, seq_len, num_permutations, getBest):
    all_perm = np.array(list(permutations(range(seq_len), length)))
    if getBest:
        some_perm = all_perm[randint(len(all_perm), size=num_permutations * 2)]
        indices = GetBestIndexPermutation(some_perm, num_permutations=num_permutations)
        return some_perm[indices]
    else:
        return all_perm[randint(len(all_perm), size=num_permutations)]


def to_relative_order(perms):
    for perm in perms:
        order = np.argsort(perm)
        for i in range(len(order)):
            perm[[order[i]]] = i
    return perms


# ------------------------------- Pallas kernels --------------------------------
def _const_spec(a):
    zeros = (0,) * a.ndim
    return pl.BlockSpec(a.shape, lambda b, t: zeros)   # weights: VMEM-resident across grid


def _convlstm_gates(x_rows, h_rows, shift_ref, wx_ref, wh_ref, bg_ref):
    """3x3 'same' conv as 9 in-kernel shift matmuls against fused (Cin, 4*MEM) slabs."""
    acc = jnp.zeros((S, GATES), jnp.float32)
    for k in range(9):                       # static unroll over the 3x3 taps
        sk = shift_ref[k]                    # (S, S) 0/1 spatial shift
        xs = jnp.dot(sk, x_rows, preferred_element_type=jnp.float32).astype(jnp.bfloat16)
        hs = jnp.dot(sk, h_rows, preferred_element_type=jnp.float32).astype(jnp.bfloat16)
        acc = acc + jnp.dot(xs, wx_ref[k], preferred_element_type=jnp.float32)
        acc = acc + jnp.dot(hs, wh_ref[k], preferred_element_type=jnp.float32)
    return acc + bg_ref[...]                 # (S, 4*MEM), f32


def _convlstm_update(gates, c_prev):
    i_g = jax.nn.sigmoid(gates[:, 0 * MEM:1 * MEM])
    f_g = jax.nn.sigmoid(gates[:, 1 * MEM:2 * MEM])
    g_g = jnp.tanh(gates[:, 2 * MEM:3 * MEM])
    o_g = jax.nn.sigmoid(gates[:, 3 * MEM:4 * MEM])
    c_new = f_g * c_prev + i_g * g_g
    h_new = o_g * jnp.tanh(c_new)
    return h_new, c_new


def _main_step_kernel(x2_ref, wb_ref, bb_ref, wfc_ref, bfc_ref, wsoft_ref,
                      shift_ref, wx_ref, wh_ref, bg_ref, cls_wt_ref, cls_b_ref,
                      featnbn_ref, pooled_ref, scores_ref, h_sc, c_sc):
    # grid = (B, T): b is "parallel" (megacore-shardable), t is "arbitrary" (state carry)
    @pl.when(pl.program_id(1) == 0)
    def _():
        h_sc[...] = jnp.zeros_like(h_sc)
        c_sc[...] = jnp.zeros_like(c_sc)

    # --- backbone head stand-in: 1x1 conv -> relu -> global avgpool -> fc ---
    x2 = x2_ref[0, 0]                                                    # (S, 8)
    featnbn = (jnp.dot(x2.astype(jnp.bfloat16), wb_ref[...],
                       preferred_element_type=jnp.float32) + bb_ref[...])  # (S, C)
    feat = jnp.maximum(featnbn, 0.0)                                     # feature_conv
    pooled_feat = jnp.mean(feat, axis=0, keepdims=True)                  # (1, C)
    logit = (jnp.dot(pooled_feat, wfc_ref[...],
                     preferred_element_type=jnp.float32) + bfc_ref[...])  # (1, R)
    featnbn_ref[0, 0] = featnbn                                          # reused by ordering branch

    # --- CAM attention (top-1 class of logit, weight_softmax row, spatial softmax) ---
    m = jnp.max(logit, axis=1, keepdims=True)
    iota = lax.broadcasted_iota(jnp.int32, logit.shape, 1)
    idx = jnp.min(jnp.where(logit == m, iota, R_CLS), axis=1, keepdims=True)
    onehot = (iota == idx).astype(jnp.float32)                           # (1, R)
    w_sel = jnp.dot(onehot, wsoft_ref[...],
                    preferred_element_type=jnp.float32)                  # (1, C) = weight_softmax[class]
    cam = jnp.sum(feat * w_sel, axis=1, keepdims=True)                   # (S, 1) == bmm
    e = jnp.exp(cam - jnp.max(cam, axis=0, keepdims=True))
    attn = e / jnp.sum(e, axis=0, keepdims=True)                         # softmax over 49 spatial
    attn_feat = featnbn * attn                                           # attentionFeat (S, C)

    # --- fused ConvLSTM step (4 gates in one lane-dense slab, conv on-chip) ---
    gates = _convlstm_gates(attn_feat, h_sc[...], shift_ref, wx_ref, wh_ref, bg_ref)
    h_new, c_new = _convlstm_update(gates, c_sc[...])
    h_sc[...] = h_new
    c_sc[...] = c_new

    # --- AvgPool2d(7) + classifier (dropout = identity in eval) ---
    pooled = jnp.mean(c_new, axis=0, keepdims=True)                      # (1, MEM)
    scores = jnp.dot(pooled, cls_wt_ref[...],
                     preferred_element_type=jnp.float32) + cls_b_ref[...]
    pooled_ref[0, 0] = pooled
    scores_ref[0, 0] = scores


def _order_step_kernel(xf_ref, shift_ref, wx_ref, wh_ref, bg_ref, ord_wt_ref, ord_b_ref,
                       scores_ref, h_sc, c_sc):
    # grid = (B, NUM_PERMS*PERM_LEN); state initialized once per batch element and
    # carried across ALL permutation steps (matches the PyTorch forward_order).
    @pl.when(pl.program_id(1) == 0)
    def _():
        h_sc[...] = jnp.zeros_like(h_sc)
        c_sc[...] = jnp.zeros_like(c_sc)

    gates = _convlstm_gates(xf_ref[0, 0], h_sc[...], shift_ref, wx_ref, wh_ref, bg_ref)
    h_new, c_new = _convlstm_update(gates, c_sc[...])
    h_sc[...] = h_new
    c_sc[...] = c_new

    pooled = jnp.mean(c_new, axis=0, keepdims=True)                      # (1, MEM)
    scores_ref[0, 0] = (jnp.dot(pooled, ord_wt_ref[...],
                                preferred_element_type=jnp.float32) + ord_b_ref[...])


# ------------------------------- pallas_call wrappers ---------------------------
_COMPILER_PARAMS = pltpu.CompilerParams(
    dimension_semantics=("parallel", "arbitrary"),
    vmem_limit_bytes=32 * 1024 * 1024)


def run_main_sequence(params, x2_seq):
    t_len = x2_seq.shape[0]
    cell = params['lstm']
    const_args = (params['wb'], params['bb'], params['wfc_t'], params['bfc'],
                  params['wsoft'], params['shift'],
                  cell['wx'], cell['wh'], cell['bg'],
                  params['cls_wt'], params['cls_b'])
    in_specs = ([pl.BlockSpec((1, 1, S, C_IN_PAD), lambda b, t: (t, b, 0, 0))]
                + [_const_spec(a) for a in const_args])
    out_specs = (pl.BlockSpec((1, 1, S, C_FEAT), lambda b, t: (t, b, 0, 0)),
                 pl.BlockSpec((1, 1, 1, MEM), lambda b, t: (t, b, 0, 0)),
                 pl.BlockSpec((1, 1, 1, NUM_CLASSES), lambda b, t: (t, b, 0, 0)))
    out_shape = (jax.ShapeDtypeStruct((t_len, B, S, C_FEAT), jnp.float32),
                 jax.ShapeDtypeStruct((t_len, B, 1, MEM), jnp.float32),
                 jax.ShapeDtypeStruct((t_len, B, 1, NUM_CLASSES), jnp.float32))
    featnbn_seq, pooled_seq, scores_seq = pl.pallas_call(
        _main_step_kernel,
        grid=(B, t_len),
        in_specs=in_specs,
        out_specs=out_specs,
        out_shape=out_shape,
        scratch_shapes=[pltpu.VMEM((S, MEM), jnp.float32),   # h
                        pltpu.VMEM((S, MEM), jnp.float32)],  # c
        compiler_params=_COMPILER_PARAMS,
    )(x2_seq, *const_args)
    return featnbn_seq, pooled_seq[:, :, 0, :], scores_seq[:, :, 0, :]


def run_order_sequence(params, feat_seq):
    n = feat_seq.shape[0]
    cell = params['order_lstm']
    const_args = (params['shift'], cell['wx'], cell['wh'], cell['bg'],
                  params['ord_wt'], params['ord_b'])
    in_specs = ([pl.BlockSpec((1, 1, S, C_FEAT), lambda b, t: (t, b, 0, 0))]
                + [_const_spec(a) for a in const_args])
    scores = pl.pallas_call(
        _order_step_kernel,
        grid=(B, n),
        in_specs=in_specs,
        out_specs=pl.BlockSpec((1, 1, 1, PERM_LEN), lambda b, t: (t, b, 0, 0)),
        out_shape=jax.ShapeDtypeStruct((n, B, 1, PERM_LEN), jnp.float32),
        scratch_shapes=[pltpu.VMEM((S, MEM), jnp.float32),
                        pltpu.VMEM((S, MEM), jnp.float32)],
        compiler_params=_COMPILER_PARAMS,
    )(feat_seq, *const_args)
    return scores[:, :, 0, :]                                            # (n, B, PERM_LEN)


# ------------------------------- plain-JAX / host glue --------------------------
def frames_to_rows(inputs):
    # (T, B, 3, 14, 14) NCHW -> 2x2 avg-pool to 7x7, channels-last rows (T, B, 49, 8)
    t_len = inputs.shape[0]
    pooled = inputs.reshape(t_len, B, 3, HW, 2, HW, 2).mean(axis=(4, 6))  # (T,B,3,7,7)
    rows = pooled.transpose(0, 1, 3, 4, 2).reshape(t_len, B, S, 3)
    return jnp.pad(rows, ((0, 0), (0, 0), (0, 0), (0, C_IN_PAD - 3)))


def build_shift_matrices():
    # 0/1 matrices implementing the 3x3 pad=1 neighbourhood gather on a 7x7 grid
    sh = np.zeros((9, S, S), np.float32)
    for kh in range(3):
        for kw in range(3):
            k = kh * 3 + kw
            for i in range(HW):
                for j in range(HW):
                    ii, jj = i + kh - 1, j + kw - 1
                    if 0 <= ii < HW and 0 <= jj < HW:
                        sh[k, i * HW + j, ii * HW + jj] = 1.0
    return jnp.asarray(sh)


def init_params(key):
    ks = jax.random.split(key, 10)
    std = 0.1
    p = {}
    # backbone stand-in: 1x1 conv 3->C_FEAT (PyTorch layout (Cout,Cin,1,1)) + fc (= weight_softmax)
    w_b = jax.random.normal(ks[0], (C_FEAT, 3, 1, 1), jnp.float32) * std
    b_b = jax.random.normal(ks[1], (C_FEAT,), jnp.float32) * std
    p['wb'] = jnp.pad(w_b[:, :, 0, 0].T, ((0, C_IN_PAD - 3), (0, 0))).astype(jnp.bfloat16)
    p['bb'] = b_b.reshape(1, C_FEAT)
    w_soft = jax.random.normal(ks[2], (R_CLS, C_FEAT), jnp.float32) * std   # resNet.fc.weight
    b_soft = jax.random.normal(ks[3], (R_CLS,), jnp.float32) * std
    p['wsoft'] = w_soft
    p['wfc_t'] = w_soft.T
    p['bfc'] = b_soft.reshape(1, R_CLS)

    def convlstm_params(kk):
        kx, kh, kb = jax.random.split(kk, 3)
        # per-gate PyTorch Conv2d weights (gate, MEM_out, Cin, 3, 3), gates i,f,c,o
        wx = jax.random.normal(kx, (4, MEM, C_FEAT, 3, 3), jnp.float32) * std
        wh = jax.random.normal(kh, (4, MEM, MEM, 3, 3), jnp.float32) * std
        bg = jax.random.normal(kb, (4, MEM), jnp.float32) * std
        # fuse 4 gates into lane-dense slabs: (9 taps, Cin, 4*MEM)
        wx_p = jnp.transpose(wx, (3, 4, 2, 0, 1)).reshape(9, C_FEAT, GATES)
        wh_p = jnp.transpose(wh, (3, 4, 2, 0, 1)).reshape(9, MEM, GATES)
        return {'wx': wx_p.astype(jnp.bfloat16),
                'wh': wh_p.astype(jnp.bfloat16),
                'bg': bg.reshape(1, GATES)}

    p['lstm'] = convlstm_params(ks[4])          # self.lstm_cell
    p['order_lstm'] = convlstm_params(ks[5])    # self.ordering_lstm_cell
    # classifier: Dropout(0.7) [identity in eval] + Linear(mem_size, num_classes)
    w_fc = jax.random.normal(ks[6], (NUM_CLASSES, MEM), jnp.float32) * std
    b_fc = jax.random.normal(ks[7], (NUM_CLASSES,), jnp.float32) * std
    p['cls_wt'], p['cls_b'] = w_fc.T, b_fc.reshape(1, NUM_CLASSES)
    # order_classifier: Dropout(0.7) + Linear(mem_size, perm_tuple_length)
    w_ord = jax.random.normal(ks[8], (PERM_LEN, MEM), jnp.float32) * std
    b_ord = jax.random.normal(ks[9], (PERM_LEN,), jnp.float32) * std
    p['ord_wt'], p['ord_b'] = w_ord.T, b_ord.reshape(1, PERM_LEN)
    p['shift'] = build_shift_matrices()
    return p


# ------------------------------- model forward ----------------------------------
def forward_order(params, featnbn_seq, seq_len):
    # order_type == 'rgb' -> lstm_out_freq = 1 -> a score after every LSTM step.
    perms = gen_permutations(PERM_LEN, seq_len, NUM_PERMS, getBest=False)
    sched = np.asarray(perms.reshape(-1), dtype=np.int32)       # static visit order
    # Reuse the backbone features already computed in the main pass (eval-mode resNet
    # is deterministic) instead of re-running it per permutation index.
    feat_ordered = featnbn_seq[jnp.asarray(sched)]              # (NUM_PERMS*PERM_LEN, B, S, C)
    scores = run_order_sequence(params, feat_ordered)           # (NUM_PERMS*PERM_LEN, B, PERM_LEN)
    perm_out = scores.reshape(NUM_PERMS, PERM_LEN, B, PERM_LEN).transpose(2, 3, 1, 0)
    perms = to_relative_order(perms)
    # TODO(synk): int64 labels kept as int32 (JAX x64 disabled by default)
    order_labels = jnp.asarray(np.tile(perms[None], (B, 1, 1)).transpose(0, 2, 1),
                               dtype=jnp.int32)
    return order_labels, perm_out


def attention_model_forward(params, inputs):
    # inputs: (T, B, 3, 14, 14) NCHW frames (real model: (T, B, 3, 224, 224))
    x2_seq = frames_to_rows(inputs)                              # (T, B, 49, 8)
    featnbn_seq, pooled_seq, scores_seq = run_main_sequence(params, x2_seq)
    feats1 = pooled_seq[-1]                                      # (B, MEM)
    feats = scores_seq[-1]                                       # (B, NUM_CLASSES)
    order_labels, order_feats = forward_order(params, featnbn_seq, inputs.shape[0])
    return feats, feats1, order_labels, order_feats


if __name__ == "__main__":
    np.random.seed(0)  # deterministic permutations for the ordering branch
    key = jax.random.PRNGKey(0)
    pkey, xkey = jax.random.split(key)
    params = init_params(pkey)
    inputs = jax.random.normal(xkey, (T, B, 3, IN_H, IN_W), dtype=jnp.float32)

    feats, feats1, order_labels, order_feats = attention_model_forward(params, inputs)
    jax.block_until_ready((feats, feats1, order_labels, order_feats))

    assert feats.shape == (B, NUM_CLASSES)
    assert feats1.shape == (B, MEM)
    assert order_labels.shape == (B, PERM_LEN, NUM_PERMS)
    assert order_feats.shape == (B, PERM_LEN, PERM_LEN, NUM_PERMS)
    assert bool(jnp.all(jnp.isfinite(feats))) and bool(jnp.all(jnp.isfinite(order_feats)))
    print("KERNEL_OK")
</pallas_src>

<mosaic_0001>
module attributes {stable_mosaic.version = 11 : i64} {
  func.func @_main_step_kernel(%arg0: i32, %arg1: i32, %arg2: memref<1x1x49x8xf32, #tpu.memory_space<vmem>>, %arg3: memref<8x32xbf16, #tpu.memory_space<vmem>>, %arg4: memref<1x32xf32, #tpu.memory_space<vmem>>, %arg5: memref<32x16xf32, #tpu.memory_space<vmem>>, %arg6: memref<1x16xf32, #tpu.memory_space<vmem>>, %arg7: memref<16x32xf32, #tpu.memory_space<vmem>>, %arg8: memref<9x49x49xf32, #tpu.memory_space<vmem>>, %arg9: memref<9x32x128xbf16, #tpu.memory_space<vmem>>, %arg10: memref<9x32x128xbf16, #tpu.memory_space<vmem>>, %arg11: memref<1x128xf32, #tpu.memory_space<vmem>>, %arg12: memref<32x10xf32, #tpu.memory_space<vmem>>, %arg13: memref<1x10xf32, #tpu.memory_space<vmem>>, %arg14: memref<1x1x49x32xf32, #tpu.memory_space<vmem>>, %arg15: memref<1x1x1x32xf32, #tpu.memory_space<vmem>>, %arg16: memref<1x1x1x10xf32, #tpu.memory_space<vmem>>, %arg17: memref<49x32xf32, #tpu.memory_space<vmem>>, %arg18: memref<49x32xf32, #tpu.memory_space<vmem>>) attributes {dimension_semantics = [#tpu.dimension_semantics<parallel>, #tpu.dimension_semantics<arbitrary>], iteration_bounds = array<i64: 2, 4>, scalar_prefetch = 0 : i64, scratch_operands = 2 : i64, tpu.core_type = #tpu.core_type<tc>, window_params = [{transform_indices = @transform_0, window_bounds = array<i64: 1, 1, 49, 8>}, {pipeline_mode = #tpu.pipeline_mode<synchronous>, transform_indices = @transform_1, window_bounds = array<i64: 8, 32>}, {pipeline_mode = #tpu.pipeline_mode<synchronous>, transform_indices = @transform_2, window_bounds = array<i64: 1, 32>}, {pipeline_mode = #tpu.pipeline_mode<synchronous>, transform_indices = @transform_3, window_bounds = array<i64: 32, 16>}, {pipeline_mode = #tpu.pipeline_mode<synchronous>, transform_indices = @transform_4, window_bounds = array<i64: 1, 16>}, {pipeline_mode = #tpu.pipeline_mode<synchronous>, transform_indices = @transform_5, window_bounds = array<i64: 16, 32>}, {pipeline_mode = #tpu.pipeline_mode<synchronous>, transform_indices = @transform_6, window_bounds = array<i64: 9, 49, 49>}, {pipeline_mode = #tpu.pipeline_mode<synchronous>, transform_indices = @transform_7, window_bounds = array<i64: 9, 32, 128>}, {pipeline_mode = #tpu.pipeline_mode<synchronous>, transform_indices = @transform_8, window_bounds = array<i64: 9, 32, 128>}, {pipeline_mode = #tpu.pipeline_mode<synchronous>, transform_indices = @transform_9, window_bounds = array<i64: 1, 128>}, {pipeline_mode = #tpu.pipeline_mode<synchronous>, transform_indices = @transform_10, window_bounds = array<i64: 32, 10>}, {pipeline_mode = #tpu.pipeline_mode<synchronous>, transform_indices = @transform_11, window_bounds = array<i64: 1, 10>}, {transform_indices = @transform_12, window_bounds = array<i64: 1, 1, 49, 32>}, {transform_indices = @transform_13, window_bounds = array<i64: 1, 1, 1, 32>}, {transform_indices = @transform_14, window_bounds = array<i64: 1, 1, 1, 10>}]} {
    %c0_i32 = arith.constant 0 : i32
    %0 = arith.cmpi eq, %arg1, %c0_i32 : i32
    %1 = arith.extui %0 : i1 to i32
    %c0_i32_0 = arith.constant 0 : i32
    %2 = arith.cmpi ne, %1, %c0_i32_0 : i32
    scf.if %2 {
      %cst_166 = arith.constant 0.000000e+00 : f32
      %227 = vector.broadcast %cst_166 : f32 to vector<49x32xf32>
      %c0_167 = arith.constant 0 : index
      %c0_168 = arith.constant 0 : index
      %228 = vector.load %arg17[%c0_167, %c0_168] : memref<49x32xf32, #tpu.memory_space<vmem>>, vector<49x32xf32>
      tpu.vector_store %arg17[%c0_167, %c0_168], %227 {strides = array<i32>} : memref<49x32xf32, #tpu.memory_space<vmem>>, vector<49x32xf32>,
      %cst_169 = arith.constant 0.000000e+00 : f32
      %229 = vector.broadcast %cst_169 : f32 to vector<49x32xf32>
      %c0_170 = arith.constant 0 : index
      %c0_171 = arith.constant 0 : index
      %230 = vector.load %arg18[%c0_170, %c0_171] : memref<49x32xf32, #tpu.memory_space<vmem>>, vector<49x32xf32>
      tpu.vector_store %arg18[%c0_170, %c0_171], %229 {strides = array<i32>} : memref<49x32xf32, #tpu.memory_space<vmem>>, vector<49x32xf32>,
    } else {
    }
    %c0 = arith.constant 0 : index
    %c0_1 = arith.constant 0 : index
    %c0_2 = arith.constant 0 : index
    %c0_3 = arith.constant 0 : index
    %3 = vector.load %arg2[%c0, %c0_1, %c0_2, %c0_3] : memref<1x1x49x8xf32, #tpu.memory_space<vmem>>, vector<1x1x49x8xf32>
    %4 = vector.shape_cast %3 : vector<1x1x49x8xf32> to vector<49x8xf32>
    %5 = arith.truncf %4 : vector<49x8xf32> to vector<49x8xbf16>
    %c0_4 = arith.constant 0 : index
    %c0_5 = arith.constant 0 : index
    %6 = vector.load %arg3[%c0_4, %c0_5] : memref<8x32xbf16, #tpu.memory_space<vmem>>, vector<8x32xbf16>
    %cst = arith.constant dense<0.000000e+00> : vector<49x32xf32>
    %7 = tpu.matmul %5, %6, %cst {dimension_numbers = #tpu.dot_dimension_numbers<[1], [0], [0], [1], [0, 0, 1, 1], [], []>} : vector<49x8xbf16>, vector<8x32xbf16>, vector<49x32xf32> -> vector<49x32xf32>
    %c0_6 = arith.constant 0 : index
    %c0_7 = arith.constant 0 : index
    %8 = vector.load %arg4[%c0_6, %c0_7] : memref<1x32xf32, #tpu.memory_space<vmem>>, vector<1x32xf32>
    %9 = vector.broadcast %8 : vector<1x32xf32> to vector<49x32xf32>
    %10 = arith.addf %7, %9 : vector<49x32xf32>
    %cst_8 = arith.constant 0.000000e+00 : f32
    %11 = vector.broadcast %cst_8 : f32 to vector<49x32xf32>
    %12 = arith.maximumf %10, %11 : vector<49x32xf32>
    %cst_9 = arith.constant dense<0.000000e+00> : vector<32xf32>
    %13 = vector.multi_reduction <add>, %12, %cst_9 [0] : vector<49x32xf32> to vector<32xf32>
    %14 = vector.shape_cast %13 : vector<32xf32> to vector<1x32xf32>
    %cst_10 = arith.constant 4.900000e+01 : f32
    %15 = vector.broadcast %cst_10 : f32 to vector<1x32xf32>
    %16 = arith.divf %14, %15 : vector<1x32xf32>
    %c0_11 = arith.constant 0 : index
    %c0_12 = arith.constant 0 : index
    %17 = vector.load %arg5[%c0_11, %c0_12] : memref<32x16xf32, #tpu.memory_space<vmem>>, vector<32x16xf32>
    %cst_13 = arith.constant dense<0.000000e+00> : vector<1x16xf32>
    %18 = tpu.matmul %16, %17, %cst_13 {dimension_numbers = #tpu.dot_dimension_numbers<[1], [0], [0], [1], [0, 0, 1, 1], [], []>} : vector<1x32xf32>, vector<32x16xf32>, vector<1x16xf32> -> vector<1x16xf32>
    %c0_14 = arith.constant 0 : index
    %c0_15 = arith.constant 0 : index
    %19 = vector.load %arg6[%c0_14, %c0_15] : memref<1x16xf32, #tpu.memory_space<vmem>>, vector<1x16xf32>
    %20 = arith.addf %18, %19 : vector<1x16xf32>
    %c0_16 = arith.constant 0 : index
    %c0_17 = arith.constant 0 : index
    %c0_18 = arith.constant 0 : index
    %c0_19 = arith.constant 0 : index
    %21 = vector.load %arg14[%c0_16, %c0_17, %c0_18, %c0_19] : memref<1x1x49x32xf32, #tpu.memory_space<vmem>>, vector<1x1x49x32xf32>
    %22 = vector.shape_cast %21 : vector<1x1x49x32xf32> to vector<49x32xf32>
    %23 = vector.shape_cast %10 : vector<49x32xf32> to vector<1x1x49x32xf32>
    tpu.vector_store %arg14[%c0_16, %c0_17, %c0_18, %c0_19], %23 {strides = array<i32>} : memref<1x1x49x32xf32, #tpu.memory_space<vmem>>, vector<1x1x49x32xf32>,
    %cst_20 = arith.constant dense<0xFF800000> : vector<1xf32>
    %24 = vector.multi_reduction <maximumf>, %20, %cst_20 [1] : vector<1x16xf32> to vector<1xf32>
    %25 = vector.shape_cast %24 : vector<1xf32> to vector<1x1xf32>
    %26 = tpu.iota {dimensions = array<i32: 1>} : vector<1x16xi32>
    %27 = vector.broadcast %25 : vector<1x1xf32> to vector<1x16xf32>
    %28 = arith.cmpf oeq, %20, %27 : vector<1x16xf32>
    %c16_i32 = arith.constant 16 : i32
    %29 = vector.broadcast %c16_i32 : i32 to vector<1x16xi32>
    %30 = arith.select %28, %26, %29 : vector<1x16xi1>, vector<1x16xi32>
    %cst_21 = arith.constant dense<2147483647> : vector<1xi32>
    %31 = vector.multi_reduction <minsi>, %30, %cst_21 [1] : vector<1x16xi32> to vector<1xi32>
    %32 = vector.shape_cast %31 : vector<1xi32> to vector<1x1xi32>
    %33 = vector.broadcast %32 : vector<1x1xi32> to vector<1x16xi32>
    %34 = arith.cmpi eq, %26, %33 : vector<1x16xi32>
    %35 = arith.extui %34 : vector<1x16xi1> to vector<1x16xi32>
    %36 = arith.sitofp %35 : vector<1x16xi32> to vector<1x16xf32>
    %c0_22 = arith.constant 0 : index
    %c0_23 = arith.constant 0 : index
    %37 = vector.load %arg7[%c0_22, %c0_23] : memref<16x32xf32, #tpu.memory_space<vmem>>, vector<16x32xf32>
    %cst_24 = arith.constant dense<0.000000e+00> : vector<1x32xf32>
    %38 = tpu.matmul %36, %37, %cst_24 {dimension_numbers = #tpu.dot_dimension_numbers<[1], [0], [0], [1], [0, 0, 1, 1], [], []>} : vector<1x16xf32>, vector<16x32xf32>, vector<1x32xf32> -> vector<1x32xf32>
    %39 = vector.broadcast %38 : vector<1x32xf32> to vector<49x32xf32>
    %40 = arith.mulf %12, %39 : vector<49x32xf32>
    %cst_25 = arith.constant dense<0.000000e+00> : vector<49xf32>
    %41 = vector.multi_reduction <add>, %40, %cst_25 [1] : vector<49x32xf32> to vector<49xf32>
    %42 = vector.shape_cast %41 : vector<49xf32> to vector<49x1xf32>
    %cst_26 = arith.constant dense<0xFF800000> : vector<1xf32>
    %43 = vector.multi_reduction <maximumf>, %42, %cst_26 [0] : vector<49x1xf32> to vector<1xf32>
    %44 = vector.shape_cast %43 : vector<1xf32> to vector<1x1xf32>
    %45 = vector.broadcast %44 : vector<1x1xf32> to vector<49x1xf32>
    %46 = arith.subf %42, %45 : vector<49x1xf32>
    %47 = math.exp %46 : vector<49x1xf32>
    %cst_27 = arith.constant dense<0.000000e+00> : vector<1xf32>
    %48 = vector.multi_reduction <add>, %47, %cst_27 [0] : vector<49x1xf32> to vector<1xf32>
    %49 = vector.shape_cast %48 : vector<1xf32> to vector<1x1xf32>
    %50 = vector.broadcast %49 : vector<1x1xf32> to vector<49x1xf32>
    %51 = arith.divf %47, %50 : vector<49x1xf32>
    %52 = vector.broadcast %51 : vector<49x1xf32> to vector<49x32xf32>
    %53 = arith.mulf %10, %52 : vector<49x32xf32>
    %c0_28 = arith.constant 0 : index
    %c0_29 = arith.constant 0 : index
    %54 = vector.load %arg17[%c0_28, %c0_29] : memref<49x32xf32, #tpu.memory_space<vmem>>, vector<49x32xf32>
    %cst_30 = arith.constant 0.000000e+00 : f32
    %55 = vector.broadcast %cst_30 : f32 to vector<49x128xf32>
    %c0_31 = arith.constant 0 : index
    %c0_32 = arith.constant 0 : index
    %c0_33 = arith.constant 0 : index
    %56 = vector.load %arg8[%c0_31, %c0_32, %c0_33] : memref<9x49x49xf32, #tpu.memory_space<vmem>>, vector<1x49x49xf32>
    %57 = vector.shape_cast %56 : vector<1x49x49xf32> to vector<49x49xf32>
    %cst_34 = arith.constant dense<0.000000e+00> : vector<49x32xf32>
    %58 = tpu.matmul %57, %53, %cst_34 {dimension_numbers = #tpu.dot_dimension_numbers<[1], [0], [0], [1], [0, 0, 1, 1], [], []>} : vector<49x49xf32>, vector<49x32xf32>, vector<49x32xf32> -> vector<49x32xf32>
    %59 = arith.truncf %58 : vector<49x32xf32> to vector<49x32xbf16>
    %cst_35 = arith.constant dense<0.000000e+00> : vector<49x32xf32>
    %60 = tpu.matmul %57, %54, %cst_35 {dimension_numbers = #tpu.dot_dimension_numbers<[1], [0], [0], [1], [0, 0, 1, 1], [], []>} : vector<49x49xf32>, vector<49x32xf32>, vector<49x32xf32> -> vector<49x32xf32>
    %61 = arith.truncf %60 : vector<49x32xf32> to vector<49x32xbf16>
    %c0_36 = arith.constant 0 : index
    %c0_37 = arith.constant 0 : index
    %c0_38 = arith.constant 0 : index
    %62 = vector.load %arg9[%c0_36, %c0_37, %c0_38] : memref<9x32x128xbf16, #tpu.memory_space<vmem>>, vector<1x32x128xbf16>
    %63 = vector.shape_cast %62 : vector<1x32x128xbf16> to vector<32x128xbf16>
    %cst_39 = arith.constant dense<0.000000e+00> : vector<49x128xf32>
    %64 = tpu.matmul %59, %63, %cst_39 {dimension_numbers = #tpu.dot_dimension_numbers<[1], [0], [0], [1], [0, 0, 1, 1], [], []>} : vector<49x32xbf16>, vector<32x128xbf16>, vector<49x128xf32> -> vector<49x128xf32>
    %65 = arith.addf %55, %64 : vector<49x128xf32>
    %c0_40 = arith.constant 0 : index
    %c0_41 = arith.constant 0 : index
    %c0_42 = arith.constant 0 : index
    %66 = vector.load %arg10[%c0_40, %c0_41, %c0_42] : memref<9x32x128xbf16, #tpu.memory_space<vmem>>, vector<1x32x128xbf16>
    %67 = vector.shape_cast %66 : vector<1x32x128xbf16> to vector<32x128xbf16>
    %cst_43 = arith.constant dense<0.000000e+00> : vector<49x128xf32>
    %68 = tpu.matmul %61, %67, %cst_43 {dimension_numbers = #tpu.dot_dimension_numbers<[1], [0], [0], [1], [0, 0, 1, 1], [], []>} : vector<49x32xbf16>, vector<32x128xbf16>, vector<49x128xf32> -> vector<49x128xf32>
    %69 = arith.addf %65, %68 : vector<49x128xf32>
    %c1 = arith.constant 1 : index
    %c0_44 = arith.constant 0 : index
    %c0_45 = arith.constant 0 : index
    %70 = vector.load %arg8[%c1, %c0_44, %c0_45] : memref<9x49x49xf32, #tpu.memory_space<vmem>>, vector<1x49x49xf32>
    %71 = vector.shape_cast %70 : vector<1x49x49xf32> to vector<49x49xf32>
    %cst_46 = arith.constant dense<0.000000e+00> : vector<49x32xf32>
    %72 = tpu.matmul %71, %53, %cst_46 {dimension_numbers = #tpu.dot_dimension_numbers<[1], [0], [0], [1], [0, 0, 1, 1], [], []>} : vector<49x49xf32>, vector<49x32xf32>, vector<49x32xf32> -> vector<49x32xf32>
    %73 = arith.truncf %72 : vector<49x32xf32> to vector<49x32xbf16>
    %cst_47 = arith.constant dense<0.000000e+00> : vector<49x32xf32>
    %74 = tpu.matmul %71, %54, %cst_47 {dimension_numbers = #tpu.dot_dimension_numbers<[1], [0], [0], [1], [0, 0, 1, 1], [], []>} : vector<49x49xf32>, vector<49x32xf32>, vector<49x32xf32> -> vector<49x32xf32>
    %75 = arith.truncf %74 : vector<49x32xf32> to vector<49x32xbf16>
    %c1_48 = arith.constant 1 : index
    %c0_49 = arith.constant 0 : index
    %c0_50 = arith.constant 0 : index
    %76 = vector.load %arg9[%c1_48, %c0_49, %c0_50] : memref<9x32x128xbf16, #tpu.memory_space<vmem>>, vector<1x32x128xbf16>
    %77 = vector.shape_cast %76 : vector<1x32x128xbf16> to vector<32x128xbf16>
    %cst_51 = arith.constant dense<0.000000e+00> : vector<49x128xf32>
    %78 = tpu.matmul %73, %77, %cst_51 {dimension_numbers = #tpu.dot_dimension_numbers<[1], [0], [0], [1], [0, 0, 1, 1], [], []>} : vector<49x32xbf16>, vector<32x128xbf16>, vector<49x128xf32> -> vector<49x128xf32>
    %79 = arith.addf %69, %78 : vector<49x128xf32>
    %c1_52 = arith.constant 1 : index
    %c0_53 = arith.constant 0 : index
    %c0_54 = arith.constant 0 : index
    %80 = vector.load %arg10[%c1_52, %c0_53, %c0_54] : memref<9x32x128xbf16, #tpu.memory_space<vmem>>, vector<1x32x128xbf16>
    %81 = vector.shape_cast %80 : vector<1x32x128xbf16> to vector<32x128xbf16>
    %cst_55 = arith.constant dense<0.000000e+00> : vector<49x128xf32>
    %82 = tpu.matmul %75, %81, %cst_55 {dimension_numbers = #tpu.dot_dimension_numbers<[1], [0], [0], [1], [0, 0, 1, 1], [], []>} : vector<49x32xbf16>, vector<32x128xbf16>, vector<49x128xf32> -> vector<49x128xf32>
    %83 = arith.addf %79, %82 : vector<49x128xf32>
    %c2 = arith.constant 2 : index
    %c0_56 = arith.constant 0 : index
    %c0_57 = arith.constant 0 : index
    %84 = vector.load %arg8[%c2, %c0_56, %c0_57] : memref<9x49x49xf32, #tpu.memory_space<vmem>>, vector<1x49x49xf32>
    %85 = vector.shape_cast %84 : vector<1x49x49xf32> to vector<49x49xf32>
    %cst_58 = arith.constant dense<0.000000e+00> : vector<49x32xf32>
    %86 = tpu.matmul %85, %53, %cst_58 {dimension_numbers = #tpu.dot_dimension_numbers<[1], [0], [0], [1], [0, 0, 1, 1], [], []>} : vector<49x49xf32>, vector<49x32xf32>, vector<49x32xf32> -> vector<49x32xf32>
    %87 = arith.truncf %86 : vector<49x32xf32> to vector<49x32xbf16>
    %cst_59 = arith.constant dense<0.000000e+00> : vector<49x32xf32>
    %88 = tpu.matmul %85, %54, %cst_59 {dimension_numbers = #tpu.dot_dimension_numbers<[1], [0], [0], [1], [0, 0, 1, 1], [], []>} : vector<49x49xf32>, vector<49x32xf32>, vector<49x32xf32> -> vector<49x32xf32>
    %89 = arith.truncf %88 : vector<49x32xf32> to vector<49x32xbf16>
    %c2_60 = arith.constant 2 : index
    %c0_61 = arith.constant 0 : index
    %c0_62 = arith.constant 0 : index
    %90 = vector.load %arg9[%c2_60, %c0_61, %c0_62] : memref<9x32x128xbf16, #tpu.memory_space<vmem>>, vector<1x32x128xbf16>
    %91 = vector.shape_cast %90 : vector<1x32x128xbf16> to vector<32x128xbf16>
    %cst_63 = arith.constant dense<0.000000e+00> : vector<49x128xf32>
    %92 = tpu.matmul %87, %91, %cst_63 {dimension_numbers = #tpu.dot_dimension_numbers<[1], [0], [0], [1], [0, 0, 1, 1], [], []>} : vector<49x32xbf16>, vector<32x128xbf16>, vector<49x128xf32> -> vector<49x128xf32>
    %93 = arith.addf %83, %92 : vector<49x128xf32>
    %c2_64 = arith.constant 2 : index
    %c0_65 = arith.constant 0 : index
    %c0_66 = arith.constant 0 : index
    %94 = vector.load %arg10[%c2_64, %c0_65, %c0_66] : memref<9x32x128xbf16, #tpu.memory_space<vmem>>, vector<1x32x128xbf16>
    %95 = vector.shape_cast %94 : vector<1x32x128xbf16> to vector<32x128xbf16>
    %cst_67 = arith.constant dense<0.000000e+00> : vector<49x128xf32>
    %96 = tpu.matmul %89, %95, %cst_67 {dimension_numbers = #tpu.dot_dimension_numbers<[1], [0], [0], [1], [0, 0, 1, 1], [], []>} : vector<49x32xbf16>, vector<32x128xbf16>, vector<49x128xf32> -> vector<49x128xf32>
    %97 = arith.addf %93, %96 : vector<49x128xf32>
    %c3 = arith.constant 3 : index
    %c0_68 = arith.constant 0 : index
    %c0_69 = arith.constant 0 : index
    %98 = vector.load %arg8[%c3, %c0_68, %c0_69] : memref<9x49x49xf32, #tpu.memory_space<vmem>>, vector<1x49x49xf32>
    %99 = vector.shape_cast %98 : vector<1x49x49xf32> to vector<49x49xf32>
    %cst_70 = arith.constant dense<0.000000e+00> : vector<49x32xf32>
    %100 = tpu.matmul %99, %53, %cst_70 {dimension_numbers = #tpu.dot_dimension_numbers<[1], [0], [0], [1], [0, 0, 1, 1], [], []>} : vector<49x49xf32>, vector<49x32xf32>, vector<49x32xf32> -> vector<49x32xf32>
    %101 = arith.truncf %100 : vector<49x32xf32> to vector<49x32xbf16>
    %cst_71 = arith.constant dense<0.000000e+00> : vector<49x32xf32>
    %102 = tpu.matmul %99, %54, %cst_71 {dimension_numbers = #tpu.dot_dimension_numbers<[1], [0], [0], [1], [0, 0, 1, 1], [], []>} : vector<49x49xf32>, vector<49x32xf32>, vector<49x32xf32> -> vector<49x32xf32>
    %103 = arith.truncf %102 : vector<49x32xf32> to vector<49x32xbf16>
    %c3_72 = arith.constant 3 : index
    %c0_73 = arith.constant 0 : index
    %c0_74 = arith.constant 0 : index
    %104 = vector.load %arg9[%c3_72, %c0_73, %c0_74] : memref<9x32x128xbf16, #tpu.memory_space<vmem>>, vector<1x32x128xbf16>
    %105 = vector.shape_cast %104 : vector<1x32x128xbf16> to vector<32x128xbf16>
    %cst_75 = arith.constant dense<0.000000e+00> : vector<49x128xf32>
    %106 = tpu.matmul %101, %105, %cst_75 {dimension_numbers = #tpu.dot_dimension_numbers<[1], [0], [0], [1], [0, 0, 1, 1], [], []>} : vector<49x32xbf16>, vector<32x128xbf16>, vector<49x128xf32> -> vector<49x128xf32>
    %107 = arith.addf %97, %106 : vector<49x128xf32>
    %c3_76 = arith.constant 3 : index
    %c0_77 = arith.constant 0 : index
    %c0_78 = arith.constant 0 : index
    %108 = vector.load %arg10[%c3_76, %c0_77, %c0_78] : memref<9x32x128xbf16, #tpu.memory_space<vmem>>, vector<1x32x128xbf16>
    %109 = vector.shape_cast %108 : vector<1x32x128xbf16> to vector<32x128xbf16>
    %cst_79 = arith.constant dense<0.000000e+00> : vector<49x128xf32>
    %110 = tpu.matmul %103, %109, %cst_79 {dimension_numbers = #tpu.dot_dimension_numbers<[1], [0], [0], [1], [0, 0, 1, 1], [], []>} : vector<49x32xbf16>, vector<32x128xbf16>, vector<49x128xf32> -> vector<49x128xf32>
    %111 = arith.addf %107, %110 : vector<49x128xf32>
    %c4 = arith.constant 4 : index
    %c0_80 = arith.constant 0 : index
    %c0_81 = arith.constant 0 : index
    %112 = vector.load %arg8[%c4, %c0_80, %c0_81] : memref<9x49x49xf32, #tpu.memory_space<vmem>>, vector<1x49x49xf32>
    %113 = vector.shape_cast %112 : vector<1x49x49xf32> to vector<49x49xf32>
    %cst_82 = arith.constant dense<0.000000e+00> : vector<49x32xf32>
    %114 = tpu.matmul %113, %53, %cst_82 {dimension_numbers = #tpu.dot_dimension_numbers<[1], [0], [0], [1], [0, 0, 1, 1], [], []>} : vector<49x49xf32>, vector<49x32xf32>, vector<49x32xf32> -> vector<49x32xf32>
    %115 = arith.truncf %114 : vector<49x32xf32> to vector<49x32xbf16>
    %cst_83 = arith.constant dense<0.000000e+00> : vector<49x32xf32>
    %116 = tpu.matmul %113, %54, %cst_83 {dimension_numbers = #tpu.dot_dimension_numbers<[1], [0], [0], [1], [0, 0, 1, 1], [], []>} : vector<49x49xf32>, vector<49x32xf32>, vector<49x32xf32> -> vector<49x32xf32>
    %117 = arith.truncf %116 : vector<49x32xf32> to vector<49x32xbf16>
    %c4_84 = arith.constant 4 : index
    %c0_85 = arith.constant 0 : index
    %c0_86 = arith.constant 0 : index
    %118 = vector.load %arg9[%c4_84, %c0_85, %c0_86] : memref<9x32x128xbf16, #tpu.memory_space<vmem>>, vector<1x32x128xbf16>
    %119 = vector.shape_cast %118 : vector<1x32x128xbf16> to vector<32x128xbf16>
    %cst_87 = arith.constant dense<0.000000e+00> : vector<49x128xf32>
    %120 = tpu.matmul %115, %119, %cst_87 {dimension_numbers = #tpu.dot_dimension_numbers<[1], [0], [0], [1], [0, 0, 1, 1], [], []>} : vector<49x32xbf16>, vector<32x128xbf16>, vector<49x128xf32> -> vector<49x128xf32>
    %121 = arith.addf %111, %120 : vector<49x128xf32>
    %c4_88 = arith.constant 4 : index
    %c0_89 = arith.constant 0 : index
    %c0_90 = arith.constant 0 : index
    %122 = vector.load %arg10[%c4_88, %c0_89, %c0_90] : memref<9x32x128xbf16, #tpu.memory_space<vmem>>, vector<1x32x128xbf16>
    %123 = vector.shape_cast %122 : vector<1x32x128xbf16> to vector<32x128xbf16>
    %cst_91 = arith.constant dense<0.000000e+00> : vector<49x128xf32>
    %124 = tpu.matmul %117, %123, %cst_91 {dimension_numbers = #tpu.dot_dimension_numbers<[1], [0], [0], [1], [0, 0, 1, 1], [], []>} : vector<49x32xbf16>, vector<32x128xbf16>, vector<49x128xf32> -> vector<49x128xf32>
    %125 = arith.addf %121, %124 : vector<49x128xf32>
    %c5 = arith.constant 5 : index
    %c0_92 = arith.constant 0 : index
    %c0_93 = arith.constant 0 : index
    %126 = vector.load %arg8[%c5, %c0_92, %c0_93] : memref<9x49x49xf32, #tpu.memory_space<vmem>>, vector<1x49x49xf32>
    %127 = vector.shape_cast %126 : vector<1x49x49xf32> to vector<49x49xf32>
    %cst_94 = arith.constant dense<0.000000e+00> : vector<49x32xf32>
    %128 = tpu.matmul %127, %53, %cst_94 {dimension_numbers = #tpu.dot_dimension_numbers<[1], [0], [0], [1], [0, 0, 1, 1], [], []>} : vector<49x49xf32>, vector<49x32xf32>, vector<49x32xf32> -> vector<49x32xf32>
    %129 = arith.truncf %128 : vector<49x32xf32> to vector<49x32xbf16>
    %cst_95 = arith.constant dense<0.000000e+00> : vector<49x32xf32>
    %130 = tpu.matmul %127, %54, %cst_95 {dimension_numbers = #tpu.dot_dimension_numbers<[1], [0], [0], [1], [0, 0, 1, 1], [], []>} : vector<49x49xf32>, vector<49x32xf32>, vector<49x32xf32> -> vector<49x32xf32>
    %131 = arith.truncf %130 : vector<49x32xf32> to vector<49x32xbf16>
    %c5_96 = arith.constant 5 : index
    %c0_97 = arith.constant 0 : index
    %c0_98 = arith.constant 0 : index
    %132 = vector.load %arg9[%c5_96, %c0_97, %c0_98] : memref<9x32x128xbf16, #tpu.memory_space<vmem>>, vector<1x32x128xbf16>
    %133 = vector.shape_cast %132 : vector<1x32x128xbf16> to vector<32x128xbf16>
    %cst_99 = arith.constant dense<0.000000e+00> : vector<49x128xf32>
    %134 = tpu.matmul %129, %133, %cst_99 {dimension_numbers = #tpu.dot_dimension_numbers<[1], [0], [0], [1], [0, 0, 1, 1], [], []>} : vector<49x32xbf16>, vector<32x128xbf16>, vector<49x128xf32> -> vector<49x128xf32>
    %135 = arith.addf %125, %134 : vector<49x128xf32>
    %c5_100 = arith.constant 5 : index
    %c0_101 = arith.constant 0 : index
    %c0_102 = arith.constant 0 : index
    %136 = vector.load %arg10[%c5_100, %c0_101, %c0_102] : memref<9x32x128xbf16, #tpu.memory_space<vmem>>, vector<1x32x128xbf16>
    %137 = vector.shape_cast %136 : vector<1x32x128xbf16> to vector<32x128xbf16>
    %cst_103 = arith.constant dense<0.000000e+00> : vector<49x128xf32>
    %138 = tpu.matmul %131, %137, %cst_103 {dimension_numbers = #tpu.dot_dimension_numbers<[1], [0], [0], [1], [0, 0, 1, 1], [], []>} : vector<49x32xbf16>, vector<32x128xbf16>, vector<49x128xf32> -> vector<49x128xf32>
    %139 = arith.addf %135, %138 : vector<49x128xf32>
    %c6 = arith.constant 6 : index
    %c0_104 = arith.constant 0 : index
    %c0_105 = arith.constant 0 : index
    %140 = vector.load %arg8[%c6, %c0_104, %c0_105] : memref<9x49x49xf32, #tpu.memory_space<vmem>>, vector<1x49x49xf32>
    %141 = vector.shape_cast %140 : vector<1x49x49xf32> to vector<49x49xf32>
    %cst_106 = arith.constant dense<0.000000e+00> : vector<49x32xf32>
    %142 = tpu.matmul %141, %53, %cst_106 {dimension_numbers = #tpu.dot_dimension_numbers<[1], [0], [0], [1], [0, 0, 1, 1], [], []>} : vector<49x49xf32>, vector<49x32xf32>, vector<49x32xf32> -> vector<49x32xf32>
    %143 = arith.truncf %142 : vector<49x32xf32> to vector<49x32xbf16>
    %cst_107 = arith.constant dense<0.000000e+00> : vector<49x32xf32>
    %144 = tpu.matmul %141, %54, %cst_107 {dimension_numbers = #tpu.dot_dimension_numbers<[1], [0], [0], [1], [0, 0, 1, 1], [], []>} : vector<49x49xf32>, vector<49x32xf32>, vector<49x32xf32> -> vector<49x32xf32>
    %145 = arith.truncf %144 : vector<49x32xf32> to vector<49x32xbf16>
    %c6_108 = arith.constant 6 : index
    %c0_109 = arith.constant 0 : index
    %c0_110 = arith.constant 0 : index
    %146 = vector.load %arg9[%c6_108, %c0_109, %c0_110] : memref<9x32x128xbf16, #tpu.memory_space<vmem>>, vector<1x32x128xbf16>
    %147 = vector.shape_cast %146 : vector<1x32x128xbf16> to vector<32x128xbf16>
    %cst_111 = arith.constant dense<0.000000e+00> : vector<49x128xf32>
    %148 = tpu.matmul %143, %147, %cst_111 {dimension_numbers = #tpu.dot_dimension_numbers<[1], [0], [0], [1], [0, 0, 1, 1], [], []>} : vector<49x32xbf16>, vector<32x128xbf16>, vector<49x128xf32> -> vector<49x128xf32>
    %149 = arith.addf %139, %148 : vector<49x128xf32>
    %c6_112 = arith.constant 6 : index
    %c0_113 = arith.constant 0 : index
    %c0_114 = arith.constant 0 : index
    %150 = vector.load %arg10[%c6_112, %c0_113, %c0_114] : memref<9x32x128xbf16, #tpu.memory_space<vmem>>, vector<1x32x128xbf16>
    %151 = vector.shape_cast %150 : vector<1x32x128xbf16> to vector<32x128xbf16>
    %cst_115 = arith.constant dense<0.000000e+00> : vector<49x128xf32>
    %152 = tpu.matmul %145, %151, %cst_115 {dimension_numbers = #tpu.dot_dimension_numbers<[1], [0], [0], [1], [0, 0, 1, 1], [], []>} : vector<49x32xbf16>, vector<32x128xbf16>, vector<49x128xf32> -> vector<49x128xf32>
    %153 = arith.addf %149, %152 : vector<49x128xf32>
    %c7 = arith.constant 7 : index
    %c0_116 = arith.constant 0 : index
    %c0_117 = arith.constant 0 : index
    %154 = vector.load %arg8[%c7, %c0_116, %c0_117] : memref<9x49x49xf32, #tpu.memory_space<vmem>>, vector<1x49x49xf32>
    %155 = vector.shape_cast %154 : vector<1x49x49xf32> to vector<49x49xf32>
    %cst_118 = arith.constant dense<0.000000e+00> : vector<49x32xf32>
    %156 = tpu.matmul %155, %53, %cst_118 {dimension_numbers = #tpu.dot_dimension_numbers<[1], [0], [0], [1], [0, 0, 1, 1], [], []>} : vector<49x49xf32>, vector<49x32xf32>, vector<49x32xf32> -> vector<49x32xf32>
    %157 = arith.truncf %156 : vector<49x32xf32> to vector<49x32xbf16>
    %cst_119 = arith.constant dense<0.000000e+00> : vector<49x32xf32>
    %158 = tpu.matmul %155, %54, %cst_119 {dimension_numbers = #tpu.dot_dimension_numbers<[1], [0], [0], [1], [0, 0, 1, 1], [], []>} : vector<49x49xf32>, vector<49x32xf32>, vector<49x32xf32> -> vector<49x32xf32>
    %159 = arith.truncf %158 : vector<49x32xf32> to vector<49x32xbf16>
    %c7_120 = arith.constant 7 : index
    %c0_121 = arith.constant 0 : index
    %c0_122 = arith.constant 0 : index
    %160 = vector.load %arg9[%c7_120, %c0_121, %c0_122] : memref<9x32x128xbf16, #tpu.memory_space<vmem>>, vector<1x32x128xbf16>
    %161 = vector.shape_cast %160 : vector<1x32x128xbf16> to vector<32x128xbf16>
    %cst_123 = arith.constant dense<0.000000e+00> : vector<49x128xf32>
    %162 = tpu.matmul %157, %161, %cst_123 {dimension_numbers = #tpu.dot_dimension_numbers<[1], [0], [0], [1], [0, 0, 1, 1], [], []>} : vector<49x32xbf16>, vector<32x128xbf16>, vector<49x128xf32> -> vector<49x128xf32>
    %163 = arith.addf %153, %162 : vector<49x128xf32>
    %c7_124 = arith.constant 7 : index
    %c0_125 = arith.constant 0 : index
    %c0_126 = arith.constant 0 : index
    %164 = vector.load %arg10[%c7_124, %c0_125, %c0_126] : memref<9x32x128xbf16, #tpu.memory_space<vmem>>, vector<1x32x128xbf16>
    %165 = vector.shape_cast %164 : vector<1x32x128xbf16> to vector<32x128xbf16>
    %cst_127 = arith.constant dense<0.000000e+00> : vector<49x128xf32>
    %166 = tpu.matmul %159, %165, %cst_127 {dimension_numbers = #tpu.dot_dimension_numbers<[1], [0], [0], [1], [0, 0, 1, 1], [], []>} : vector<49x32xbf16>, vector<32x128xbf16>, vector<49x128xf32> -> vector<49x128xf32>
    %167 = arith.addf %163, %166 : vector<49x128xf32>
    %c8 = arith.constant 8 : index
    %c0_128 = arith.constant 0 : index
    %c0_129 = arith.constant 0 : index
    %168 = vector.load %arg8[%c8, %c0_128, %c0_129] : memref<9x49x49xf32, #tpu.memory_space<vmem>>, vector<1x49x49xf32>
    %169 = vector.shape_cast %168 : vector<1x49x49xf32> to vector<49x49xf32>
    %cst_130 = arith.constant dense<0.000000e+00> : vector<49x32xf32>
    %170 = tpu.matmul %169, %53, %cst_130 {dimension_numbers = #tpu.dot_dimension_numbers<[1], [0], [0], [1], [0, 0, 1, 1], [], []>} : vector<49x49xf32>, vector<49x32xf32>, vector<49x32xf32> -> vector<49x32xf32>
    %171 = arith.truncf %170 : vector<49x32xf32> to vector<49x32xbf16>
    %cst_131 = arith.constant dense<0.000000e+00> : vector<49x32xf32>
    %172 = tpu.matmul %169, %54, %cst_131 {dimension_numbers = #tpu.dot_dimension_numbers<[1], [0], [0], [1], [0, 0, 1, 1], [], []>} : vector<49x49xf32>, vector<49x32xf32>, vector<49x32xf32> -> vector<49x32xf32>
    %173 = arith.truncf %172 : vector<49x32xf32> to vector<49x32xbf16>
    %c8_132 = arith.constant 8 : index
    %c0_133 = arith.constant 0 : index
    %c0_134 = arith.constant 0 : index
    %174 = vector.load %arg9[%c8_132, %c0_133, %c0_134] : memref<9x32x128xbf16, #tpu.memory_space<vmem>>, vector<1x32x128xbf16>
    %175 = vector.shape_cast %174 : vector<1x32x128xbf16> to vector<32x128xbf16>
    %cst_135 = arith.constant dense<0.000000e+00> : vector<49x128xf32>
    %176 = tpu.matmul %171, %175, %cst_135 {dimension_numbers = #tpu.dot_dimension_numbers<[1], [0], [0], [1], [0, 0, 1, 1], [], []>} : vector<49x32xbf16>, vector<32x128xbf16>, vector<49x128xf32> -> vector<49x128xf32>
    %177 = arith.addf %167, %176 : vector<49x128xf32>
    %c8_136 = arith.constant 8 : index
    %c0_137 = arith.constant 0 : index
    %c0_138 = arith.constant 0 : index
    %178 = vector.load %arg10[%c8_136, %c0_137, %c0_138] : memref<9x32x128xbf16, #tpu.memory_space<vmem>>, vector<1x32x128xbf16>
    %179 = vector.shape_cast %178 : vector<1x32x128xbf16> to vector<32x128xbf16>
    %cst_139 = arith.constant dense<0.000000e+00> : vector<49x128xf32>
    %180 = tpu.matmul %173, %179, %cst_139 {dimension_numbers = #tpu.dot_dimension_numbers<[1], [0], [0], [1], [0, 0, 1, 1], [], []>} : vector<49x32xbf16>, vector<32x128xbf16>, vector<49x128xf32> -> vector<49x128xf32>
    %181 = arith.addf %177, %180 : vector<49x128xf32>
    %c0_140 = arith.constant 0 : index
    %c0_141 = arith.constant 0 : index
    %182 = vector.load %arg11[%c0_140, %c0_141] : memref<1x128xf32, #tpu.memory_space<vmem>>, vector<1x128xf32>
    %183 = vector.broadcast %182 : vector<1x128xf32> to vector<49x128xf32>
    %184 = arith.addf %181, %183 : vector<49x128xf32>
    %c0_142 = arith.constant 0 : index
    %c0_143 = arith.constant 0 : index
    %185 = vector.load %arg18[%c0_142, %c0_143] : memref<49x32xf32, #tpu.memory_space<vmem>>, vector<49x32xf32>
    %186 = vector.extract_strided_slice %184 {offsets = [0, 0], sizes = [49, 32], strides = [1, 1]} : vector<49x128xf32> to vector<49x32xf32>
    %187 = arith.negf %186 : vector<49x32xf32>
    %188 = math.exp %187 : vector<49x32xf32>
    %cst_144 = arith.constant 1.000000e+00 : f32
    %189 = vector.broadcast %cst_144 : f32 to vector<49x32xf32>
    %190 = arith.addf %189, %188 : vector<49x32xf32>
    %191 = arith.divf %189, %190 : vector<49x32xf32>
    %192 = vector.extract_strided_slice %184 {offsets = [0, 32], sizes = [49, 32], strides = [1, 1]} : vector<49x128xf32> to vector<49x32xf32>
    %193 = arith.negf %192 : vector<49x32xf32>
    %194 = math.exp %193 : vector<49x32xf32>
    %cst_145 = arith.constant 1.000000e+00 : f32
    %195 = vector.broadcast %cst_145 : f32 to vector<49x32xf32>
    %196 = arith.addf %195, %194 : vector<49x32xf32>
    %197 = arith.divf %195, %196 : vector<49x32xf32>
    %198 = vector.extract_strided_slice %184 {offsets = [0, 64], sizes = [49, 32], strides = [1, 1]} : vector<49x128xf32> to vector<49x32xf32>
    %199 = math.tanh %198 : vector<49x32xf32>
    %200 = vector.extract_strided_slice %184 {offsets = [0, 96], sizes = [49, 32], strides = [1, 1]} : vector<49x128xf32> to vector<49x32xf32>
    %201 = arith.negf %200 : vector<49x32xf32>
    %202 = math.exp %201 : vector<49x32xf32>
    %cst_146 = arith.constant 1.000000e+00 : f32
    %203 = vector.broadcast %cst_146 : f32 to vector<49x32xf32>
    %204 = arith.addf %203, %202 : vector<49x32xf32>
    %205 = arith.divf %203, %204 : vector<49x32xf32>
    %206 = arith.mulf %197, %185 : vector<49x32xf32>
    %207 = arith.mulf %191, %199 : vector<49x32xf32>
    %208 = arith.addf %206, %207 : vector<49x32xf32>
    %209 = math.tanh %208 : vector<49x32xf32>
    %210 = arith.mulf %205, %209 : vector<49x32xf32>
    %c0_147 = arith.constant 0 : index
    %c0_148 = arith.constant 0 : index
    %211 = vector.load %arg17[%c0_147, %c0_148] : memref<49x32xf32, #tpu.memory_space<vmem>>, vector<49x32xf32>
    tpu.vector_store %arg17[%c0_147, %c0_148], %210 {strides = array<i32>} : memref<49x32xf32, #tpu.memory_space<vmem>>, vector<49x32xf32>,
    %c0_149 = arith.constant 0 : index
    %c0_150 = arith.constant 0 : index
    %212 = vector.load %arg18[%c0_149, %c0_150] : memref<49x32xf32, #tpu.memory_space<vmem>>, vector<49x32xf32>
    tpu.vector_store %arg18[%c0_149, %c0_150], %208 {strides = array<i32>} : memref<49x32xf32, #tpu.memory_space<vmem>>, vector<49x32xf32>,
    %cst_151 = arith.constant dense<0.000000e+00> : vector<32xf32>
    %213 = vector.multi_reduction <add>, %208, %cst_151 [0] : vector<49x32xf32> to vector<32xf32>
    %214 = vector.shape_cast %213 : vector<32xf32> to vector<1x32xf32>
    %cst_152 = arith.constant 4.900000e+01 : f32
    %215 = vector.broadcast %cst_152 : f32 to vector<1x32xf32>
    %216 = arith.divf %214, %215 : vector<1x32xf32>
    %c0_153 = arith.constant 0 : index
    %c0_154 = arith.constant 0 : index
    %217 = vector.load %arg12[%c0_153, %c0_154] : memref<32x10xf32, #tpu.memory_space<vmem>>, vector<32x10xf32>
    %cst_155 = arith.constant dense<0.000000e+00> : vector<1x10xf32>
    %218 = tpu.matmul %216, %217, %cst_155 {dimension_numbers = #tpu.dot_dimension_numbers<[1], [0], [0], [1], [0, 0, 1, 1], [], []>} : vector<1x32xf32>, vector<32x10xf32>, vector<1x10xf32> -> vector<1x10xf32>
    %c0_156 = arith.constant 0 : index
    %c0_157 = arith.constant 0 : index
    %219 = vector.load %arg13[%c0_156, %c0_157] : memref<1x10xf32, #tpu.memory_space<vmem>>, vector<1x10xf32>
    %220 = arith.addf %218, %219 : vector<1x10xf32>
    %c0_158 = arith.constant 0 : index
    %c0_159 = arith.constant 0 : index
    %c0_160 = arith.constant 0 : index
    %c0_161 = arith.constant 0 : index
    %221 = vector.load %arg15[%c0_158, %c0_159, %c0_160, %c0_161] : memref<1x1x1x32xf32, #tpu.memory_space<vmem>>, vector<1x1x1x32xf32>
    %222 = vector.shape_cast %221 : vector<1x1x1x32xf32> to vector<1x32xf32>
    %223 = vector.shape_cast %216 : vector<1x32xf32> to vector<1x1x1x32xf32>
    tpu.vector_store %arg15[%c0_158, %c0_159, %c0_160, %c0_161], %223 {strides = array<i32>} : memref<1x1x1x32xf32, #tpu.memory_space<vmem>>, vector<1x1x1x32xf32>,
    %c0_162 = arith.constant 0 : index
    %c0_163 = arith.constant 0 : index
    %c0_164 = arith.constant 0 : index
    %c0_165 = arith.constant 0 : index
    %224 = vector.load %arg16[%c0_162, %c0_163, %c0_164, %c0_165] : memref<1x1x1x10xf32, #tpu.memory_space<vmem>>, vector<1x1x1x10xf32>
    %225 = vector.shape_cast %224 : vector<1x1x1x10xf32> to vector<1x10xf32>
    %226 = vector.shape_cast %220 : vector<1x10xf32> to vector<1x1x1x10xf32>
    tpu.vector_store %arg16[%c0_162, %c0_163, %c0_164, %c0_165], %226 {strides = array<i32>} : memref<1x1x1x10xf32, #tpu.memory_space<vmem>>, vector<1x1x1x10xf32>,
    return
  }
  func.func @transform_0(%arg0: i32, %arg1: i32) -> (i32, i32, i32, i32) {
    %c0_i32 = arith.constant 0 : i32
    %c0_i32_0 = arith.constant 0 : i32
    %c0_i32_1 = arith.constant 0 : i32
    return %arg1, %arg0, %c0_i32, %c0_i32_0 : i32, i32, i32, i32
  }
  func.func @transform_1(%arg0: i32, %arg1: i32) -> (i32, i32) {
    %c0_i32 = arith.constant 0 : i32
    %c0_i32_0 = arith.constant 0 : i32
    %c0_i32_1 = arith.constant 0 : i32
    return %c0_i32, %c0_i32_0 : i32, i32
  }
  func.func @transform_2(%arg0: i32, %arg1: i32) -> (i32, i32) {
    %c0_i32 = arith.constant 0 : i32
    %c0_i32_0 = arith.constant 0 : i32
    %c0_i32_1 = arith.constant 0 : i32
    return %c0_i32, %c0_i32_0 : i32, i32
  }
  func.func @transform_3(%arg0: i32, %arg1: i32) -> (i32, i32) {
    %c0_i32 = arith.constant 0 : i32
    %c0_i32_0 = arith.constant 0 : i32
    %c0_i32_1 = arith.constant 0 : i32
    return %c0_i32, %c0_i32_0 : i32, i32
  }
  func.func @transform_4(%arg0: i32, %arg1: i32) -> (i32, i32) {
    %c0_i32 = arith.constant 0 : i32
    %c0_i32_0 = arith.constant 0 : i32
    %c0_i32_1 = arith.constant 0 : i32
    return %c0_i32, %c0_i32_0 : i32, i32
  }
  func.func @transform_5(%arg0: i32, %arg1: i32) -> (i32, i32) {
    %c0_i32 = arith.constant 0 : i32
    %c0_i32_0 = arith.constant 0 : i32
    %c0_i32_1 = arith.constant 0 : i32
    return %c0_i32, %c0_i32_0 : i32, i32
  }
  func.func @transform_6(%arg0: i32, %arg1: i32) -> (i32, i32, i32) {
    %c0_i32 = arith.constant 0 : i32
    %c0_i32_0 = arith.constant 0 : i32
    %c0_i32_1 = arith.constant 0 : i32
    %c0_i32_2 = arith.constant 0 : i32
    return %c0_i32, %c0_i32_0, %c0_i32_1 : i32, i32, i32
  }
  func.func @transform_7(%arg0: i32, %arg1: i32) -> (i32, i32, i32) {
    %c0_i32 = arith.constant 0 : i32
    %c0_i32_0 = arith.constant 0 : i32
    %c0_i32_1 = arith.constant 0 : i32
    %c0_i32_2 = arith.constant 0 : i32
    return %c0_i32, %c0_i32_0, %c0_i32_1 : i32, i32, i32
  }
  func.func @transform_8(%arg0: i32, %arg1: i32) -> (i32, i32, i32) {
    %c0_i32 = arith.constant 0 : i32
    %c0_i32_0 = arith.constant 0 : i32
    %c0_i32_1 = arith.constant 0 : i32
    %c0_i32_2 = arith.constant 0 : i32
    return %c0_i32, %c0_i32_0, %c0_i32_1 : i32, i32, i32
  }
  func.func @transform_9(%arg0: i32, %arg1: i32) -> (i32, i32) {
    %c0_i32 = arith.constant 0 : i32
    %c0_i32_0 = arith.constant 0 : i32
    %c0_i32_1 = arith.constant 0 : i32
    return %c0_i32, %c0_i32_0 : i32, i32
  }
  func.func @transform_10(%arg0: i32, %arg1: i32) -> (i32, i32) {
    %c0_i32 = arith.constant 0 : i32
    %c0_i32_0 = arith.constant 0 : i32
    %c0_i32_1 = arith.constant 0 : i32
    return %c0_i32, %c0_i32_0 : i32, i32
  }
  func.func @transform_11(%arg0: i32, %arg1: i32) -> (i32, i32) {
    %c0_i32 = arith.constant 0 : i32
    %c0_i32_0 = arith.constant 0 : i32
    %c0_i32_1 = arith.constant 0 : i32
    return %c0_i32, %c0_i32_0 : i32, i32
  }
  func.func @transform_12(%arg0: i32, %arg1: i32) -> (i32, i32, i32, i32) {
    %c0_i32 = arith.constant 0 : i32
    %c0_i32_0 = arith.constant 0 : i32
    %c0_i32_1 = arith.constant 0 : i32
    return %arg1, %arg0, %c0_i32, %c0_i32_0 : i32, i32, i32, i32
  }
  func.func @transform_13(%arg0: i32, %arg1: i32) -> (i32, i32, i32, i32) {
    %c0_i32 = arith.constant 0 : i32
    %c0_i32_0 = arith.constant 0 : i32
    %c0_i32_1 = arith.constant 0 : i32
    return %arg1, %arg0, %c0_i32, %c0_i32_0 : i32, i32, i32, i32
  }
  func.func @transform_14(%arg0: i32, %arg1: i32) -> (i32, i32, i32, i32) {
    %c0_i32 = arith.constant 0 : i32
    %c0_i32_0 = arith.constant 0 : i32
    %c0_i32_1 = arith.constant 0 : i32
    return %arg1, %arg0, %c0_i32, %c0_i32_0 : i32, i32, i32, i32
  }
}

</mosaic_0001>

<bundles_post_ra>
// kernel: tpu_custom_call.1
= control target key start
LH: loop header
LB: loop body
LE: loop exit
PB: predicated region body
PF: predicated region fallthrough
CT: control target
= control target key end

     0   :  { %s9761_s0 = inlined_call_operand.vmem [shape: f32[4,2,49,8], index: 0, kind: input, shape index: {}]   ;;  %s9762_s1 = inlined_call_operand.vmem [shape: bf16[8,32], index: 1, kind: input, shape index: {}]   ;;  %s9763_s2 = inlined_call_operand.vmem [shape: f32[1,32], index: 2, kind: input, shape index: {}]   ;;  %s9764_s3 = inlined_call_operand.vmem [shape: f32[32,16], index: 3, kind: input, shape index: {}]   ;;  %s9765_s4 = inlined_call_operand.vmem [shape: f32[1,16], index: 4, kind: input, shape index: {}]   ;;  %s9766_s5 = inlined_call_operand.vmem [shape: f32[16,32], index: 5, kind: input, shape index: {}]   ;;  %s9767_s6 = inlined_call_operand.vmem [shape: f32[9,49,49], index: 6, kind: input, shape index: {}]   ;;  %s9768_s7 = inlined_call_operand.hbm [shape: bf16[9,32,128], index: 7, kind: input, shape index: {}]   ;;  %s9769_s8 = inlined_call_operand.hbm [shape: bf16[9,32,128], index: 8, kind: input, shape index: {}]   ;;  %s9770_s9 = inlined_call_operand.vmem [shape: f32[1,128], index: 9, kind: input, shape index: {}]   ;;  %s9771_s10 = inlined_call_operand.vmem [shape: f32[32,10], index: 10, kind: input, shape index: {}]   ;;  %s9772_s11 = inlined_call_operand.vmem [shape: f32[1,10], index: 11, kind: input, shape index: {}]   ;;  %s9773_s12 = inlined_call_operand.vmem [shape: f32[4,2,49,32], index: 12, kind: output, shape index: {0}]   ;;  %s9774_s13 = inlined_call_operand.hbm [shape: f32[4,2,1,32], index: 13, kind: output, shape index: {1}]   ;;  %s9775_s14 = inlined_call_operand.hbm [shape: f32[4,2,1,10], index: 14, kind: output, shape index: {2}]  }
   0x1   :  { %9805 = sst [smem:[#allocation33_spill]] %s9771_s10 }
   0x2   :  { %9806 = sst [smem:[#allocation34_spill]] %s9772_s11 }
   0x3   :  { %9807 = sst [smem:[#allocation35_spill]] %s9774_s13 }
   0x4   :  { %9808 = sst [smem:[#allocation36_spill]] %s9775_s14 }
   0x5   :  { %20 = vsyncpa [#allocation5], 0 }
   0x6   :  { %21 = vsyncpa [#allocation8], 0 }
   0x7   :  { %22 = vsyncpa [#allocation6], 0 }
   0x8   :  { %24 = vsyncpa [#allocation6 + $0x1], 0 }
   0x9   :  { %25 = vsyncpa [#allocation11], 0 }
   0xa   :  { %27 = vsyncpa [#allocation11 + $0x1], 0  ;;  %s7878_s29 = smov 0   ;;  %s7880_s30 = smov 0  }
   0xb   :  { %s7882_s15 = smov 0   ;;  %s7884_s16 = smov 0  }
   0xc   :  { %s7886_s17 = smov 0   ;;  %s7888_s18 = smov 0  }
   0xd   :  { %s7890_s19 = smov 0   ;;  %s7892_s20 = smov 0  }
   0xe LB: > { %9809 = sst [smem:[#allocation16_spill]] %s7760_s29  ;;  %s5529_s21 = sadd.s32 4294967295, %s7788_s20   ;;  %s7788_s20 = sphi %s7892_s20, %s33_s20   ;;  %s7784_s19 = sphi %s7890_s19, %s9876_s19   ;;  %s7780_s18 = sphi %s7888_s18, %s9875_s18   ;;  %s7776_s17 = sphi %s7886_s17, %s9874_s17   ;;  %s7772_s16 = sphi %s7884_s16, %s9873_s16   ;;  %s7768_s15 = sphi %s7882_s15, %s9872_s15   ;;  %s7764_s30 = sphi %s7880_s30, %s9878_s30   ;;  %s7760_s29 = sphi %s7878_s29, %s9877_s29  }
   0xf   : > { %9810 = sst [smem:[#allocation17_spill]] %s7768_s15  ;;  %s5530_s22 = sadd.s32 4294967294, %s7788_s20  }
  0x10   : > { %9811 = sst [smem:[#allocation18_spill]] %s7780_s18  ;;  %s42_s23 = sadd.s32 1, %s7780_s18 }
  0x11   : > { %9812 = sst [smem:[#allocation19_spill]] %s7784_s19  ;;  %s45_s24 = sadd.s32 1, %s7784_s19 }
  0x12   : > { %9813 = sst [smem:[#allocation20_spill]] %s7788_s20  ;;  %p43_p0 = scmp.ge.s32.totalorder %s42_s23, 4 }
  0x13   : > { %s341_s25 = sadd.s32 1, %s7768_s15  ;;  %p351_p1 = scmp.ne.s32.totalorder %s7768_s15, %s7764_s30 }
  0x14   : > { %p352_p2 = scmp.eq.s32.totalorder %s5529_s21, 7  ;;  %s9880_s23 = smov (%p43_p0, %s42_s23), 0 }
  0x15   : > { %9814 = sst [smem:[#allocation21_spill]] %s9880_s23  ;;  %s9882_s24 = smov (!%p43_p0, %s45_s24), %s7784_s19 }
  0x16   : > { %s336_s26 = ssub.s32 %s7780_s18, %s9880_s23  ;;  %p7930_p3 = por %p352_p2, %p351_p1 }
  0x17   : > { %p47_p4 = scmp.ge.s32.totalorder %s9882_s24, 2  ;;  %p357_p5 = scmp.ne.s32.totalorder %s7764_s30, %s7760_s29 }
  0x18   : > { %s9815_s27 = scalar_select %p7930_p3, 1, 0 }
  0x19   : > { %p358_p6 = scmp.eq.s32.totalorder %s5530_s22, 7  ;;  %p5531_p7 = scmp.ge.s32.totalorder %s7788_s20, 1 }
  0x1a   : > { %9816 = sst [smem:[#allocation22_spill]] %s9815_s27  ;;  %s9884_s24 = smov (%p47_p4, %s9882_s24), 0 }
  0x1b   : > { %9817 = sst [smem:[#allocation23_spill]] %s9884_s24  ;;  %p7939_p8 = por %p358_p6, %p357_p5 }
  0x1c   : > { %p393_p9 = scmp.lt.s32.totalorder %s7788_s20, 9  ;;  %s337_s14 = ssub.s32 %s7784_s19, %s9884_s24 }
  0x1d   : > { %s9818_s28 = scalar_select %p7939_p8, 1, 0 }
  0x1e   : > { %s338_s11 = sor.u32 %s337_s14, %s336_s26  ;;  %p7946_p10 = pnand %p5531_p7, %p393_p9 }
  0x1f   : > { %9819 = sst [smem:[#allocation24_spill]] %s9818_s28  ;;  %p339_p11 = scmp.eq.s32.totalorder %s338_s11, 0 }
  0x20   : > { %s9820_s23 = scalar_select %p7946_p10, 1, 0 }
  0x21   : > { %p7950_p12 = scmp.eq.s32.totalorder %s5529_s21, 0  ;;  %p7395_p13 = pneg %p7946_p10 }
  0x22   : > { %s7957_s22 = scalar_select %p339_p11, %s7768_s15, %s341_s25  }
  0x23   : > { %s9821_s18 = scalar_select %p7950_p12, 1, 0 }
  0x24   : > { %9822 = sst [smem:[#allocation25_spill]] %s7957_s22  ;;  %s7790_s29 = smov [#allocation4]  }
  0x25   : > { %s423_s28 = sshll.u32 %s7790_s29, 4  ;;  %p7961_p0 = pnand %p7950_p12, %p7395_p13  ;;  %s424_s28 = int_to_ptr.vmem [resolvable:$true] %s423_s28 }
  0x26   : > { %s7598_s26 = scalar_lea.hbm %s9768_s7, 2304 }
  0x27   : > { %p7599_p1 = scmp.ne.s32.totalorder %s9768_s7, %s7598_s26  ;;  %p7600_p2 = pneg %p7961_p0 }
  0x28   : > { %p7605_p6 = scmp.lt.u32.totalorder %s7598_s26, %s9768_s7 }
  0x29   : > { %p7601_p4 = pnand %p7600_p2, %p7599_p1 }
  0x2b   : > { %p7602_p5 = pneg %p7601_p4 }
  0x2d   : > { %p7607_p7 = pnand %p7605_p6, %p7602_p5 }
  0x2f   : > { %7610 = shalt.err (!%p7607_p7)
}
  0x30   : > { %s7611_s22 = scalar_lea.vmem %s424_s28, 2304  ;;  %p7619_p8 = scmp.lt.s32.totalorder %s424_s28, %s424_s28 }
  0x31   : > { %p7612_p9 = scmp.ne.s32.totalorder %s424_s28, %s7611_s22  ;;  %p7620_p3 = scmp.lt.s32.totalorder %s7611_s22, %s7611_s22 }
  0x33   : > { %p7614_p11 = pnand %p7612_p9, %p7600_p2  ;;  %p7621_p12 = por %p7620_p3, %p7619_p8 }
  0x35   : > { %p7615_p13 = pneg %p7614_p11 }
  0x37   : > { %p7622_p10 = pnand %p7621_p12, %p7615_p13 }
  0x39   : > { %7625 = shalt.err (!%p7622_p10)
}
  0x3a   : > { %s7791_s19 = smov 64   ;;  %s7792_s24 = smov 4  }
  0x3b   : > { %7398 = dma.hbm_to_vmem [thread:$0]  (!%p7961_p0), %s9768_s7, 2304, %s424_s28, [#allocation5], %s7791_s19, %s7791_s19, %s7792_s24  }
  0x3c   : > { %s7793_s26 = smov [#allocation7]   ;;  %s7626_s20 = scalar_lea.hbm %s9769_s8, 2304 }
  0x3d   : > { %s436_s29 = sshll.u32 %s7793_s26, 4  ;;  %p7627_p3 = scmp.ne.s32.totalorder %s9769_s8, %s7626_s20  ;;  %s437_s29 = int_to_ptr.vmem [resolvable:$true] %s436_s29 }
  0x3e   : > { %p7633_p12 = scmp.lt.u32.totalorder %s7626_s20, %s9769_s8 }
  0x3f   : > { %p7629_p8 = pnand %p7627_p3, %p7600_p2 }
  0x41   : > { %p7630_p10 = pneg %p7629_p8 }
  0x43   : > { %p7635_p1 = pnand %p7633_p12, %p7630_p10 }
  0x45   : > { %7638 = shalt.err (!%p7635_p1)
}
  0x46   : > { %s7639_s28 = scalar_lea.vmem %s437_s29, 2304  ;;  %p7647_p7 = scmp.lt.s32.totalorder %s437_s29, %s437_s29 }
  0x47   : > { %p7640_p4 = scmp.ne.s32.totalorder %s437_s29, %s7639_s28  ;;  %p7648_p9 = scmp.lt.s32.totalorder %s7639_s28, %s7639_s28 }
  0x49   : > { %p7642_p5 = pnand %p7640_p4, %p7600_p2  ;;  %p7649_p11 = por %p7648_p9, %p7647_p7 }
  0x4b   : > { %p7643_p6 = pneg %p7642_p5 }
  0x4d   : > { %p7650_p13 = pnand %p7649_p11, %p7643_p6 }
  0x4f   : > { %7653 = shalt.err (!%p7650_p13)
}
  0x50   : > { %7401 = dma.hbm_to_vmem [thread:$0]  (!%p7961_p0), %s9769_s8, 2304, %s437_s29, [#allocation8], %s7791_s19, %s7791_s19, %s7792_s24  }
  0x51   : > { %p9824_p3 = scmp.ne.s32.totalorder %s9820_s23, 0 }
  0x53   : > { %473 = sbr.rel (%p9824_p3) target bundleno = 3696 (0xe70), region = 68 }
  0x5a   : > { %p9825_p8 = scmp.ne.s32.totalorder %s9821_s18, 0 }
  0x5c   : > { %7743 = dma.done.wait (%p9825_p8), [#allocation5], 2304  }
  0x5d   : > { %7745 = vsyncadd (%p9825_p8), [#allocation5], 4294964992 }
  0x5e   : > { %7747 = dma.done.wait (%p9825_p8), [#allocation8], 2304  }
  0x5f   : > { %7749 = vsyncadd (%p9825_p8), [#allocation8], 4294964992  ;;  %s8018_s10 = sand.u32 1, %s7764_s30   ;;  %p539_p0 = scmp.lt.s32.totalorder %s7772_s16, 3 }
  0x60   : > { %p541_p2 = scmp.lt.s32.totalorder %s7776_s17, 1  ;;  %s532_s22 = scalar_lea.vmem [#allocation9], %s8018_s10 }
  0x61   : > { %s540_s20 = scalar_select %p539_p0, %s7772_s16, 3 }
  0x62   : > { %s542_s27 = scalar_select %p541_p2, %s7776_s17, 1 }
  0x63   : > { %s7382_s23 = smul.u32 14, %s540_s20  ;;  %s538_s28 = scalar_lea.vmem [#allocation10], %s8018_s10 }
  0x64   : > { %s7381_s14 = smul.u32 7, %s542_s27  ;;  %p5540_p10 = scmp.ne.s32.totalorder %s7772_s16, 0 }
  0x65   : > { %vm562_vm0 = vcmask (!%p5540_p10), 261120   ;;  %vm569_vm1 = vcmask (!%p5540_p10), 253952   ;;  %v7794_v0 = vmov (!%p5540_p10), 0.0  }
  0x66   : > { %s545_s19 = sadd.s32 %s7382_s23, %s7381_s14  ;;  %561 = sbr.rel (%p5540_p10) target bundleno = 109 (0x6d), region = 80  ;;  %563 = vst.msk [vmem:[#allocation2] sm:$0xff] (!%p5540_p10), %vm562_vm0, %v7794_v0  ;;  %564 = vst.msk [vmem:[#allocation2 + $0x8] sm:$0xff] (!%p5540_p10), %vm562_vm0, %v7794_v0 }
  0x67   : > { %s5538_s24 = sshll.u32 %s545_s19, 3  ;;  %565 = vst.msk [vmem:[#allocation2 + $0x10] sm:$0xff] (!%p5540_p10), %vm562_vm0, %v7794_v0  ;;  %566 = vst.msk [vmem:[#allocation2 + $0x18] sm:$0xff] (!%p5540_p10), %vm562_vm0, %v7794_v0 }
  0x68   : > { %s8027_s21 = scalar_lea.vmem %s9761_s0, %s5538_s24  ;;  %s8032_s25 = scalar_lea.vmem %s9773_s12, %s5538_s24  ;;  %567 = vst.msk [vmem:[#allocation2 + $0x20] sm:$0xff] (!%p5540_p10), %vm562_vm0, %v7794_v0  ;;  %568 = vst.msk [vmem:[#allocation2 + $0x28] sm:$0xff] (!%p5540_p10), %vm562_vm0, %v7794_v0 }
  0x69   : > { %571 = vst.msk [vmem:[#allocation3] sm:$0xff] (!%p5540_p10), %vm562_vm0, %v7794_v0  ;;  %572 = vst.msk [vmem:[#allocation3 + $0x8] sm:$0xff] (!%p5540_p10), %vm562_vm0, %v7794_v0 }
  0x6a   : > { %573 = vst.msk [vmem:[#allocation3 + $0x10] sm:$0xff] (!%p5540_p10), %vm562_vm0, %v7794_v0  ;;  %574 = vst.msk [vmem:[#allocation3 + $0x18] sm:$0xff] (!%p5540_p10), %vm562_vm0, %v7794_v0 }
  0x6b   : > { %575 = vst.msk [vmem:[#allocation3 + $0x20] sm:$0xff] (!%p5540_p10), %vm562_vm0, %v7794_v0  ;;  %576 = vst.msk [vmem:[#allocation3 + $0x28] sm:$0xff] (!%p5540_p10), %vm562_vm0, %v7794_v0 }
  0x6c   : > { %570 = vst.msk [vmem:[#allocation2 + $0x30] sm:$0x1] (!%p5540_p10), %vm569_vm1, %v7794_v0  ;;  %577 = vst.msk [vmem:[#allocation3 + $0x30] sm:$0x1] (!%p5540_p10), %vm569_vm1, %v7794_v0 }
  0x6d PF: > { %v589_v1 = vld [vmem:[%s9762_s1] sm:$0xf]  ;;  %vm610_vm2 = vcmask 1043456   ;;  %v579_v3 = vld [vmem:[%s8027_s21 + $0x8] sm:$0xff]  ;;  %vm597_vm3 = vcmask 64512   ;;  %v580_v6 = vld [vmem:[%s8027_s21 + $0x10] sm:$0xff] }
  0x6e   : > { %v578_v2 = vld [vmem:[%s8027_s21] sm:$0xff]  ;;  %7380 = vmatprep.subr.msk.bf16.mxu0 %vm610_vm2, %v589_v1  ;;  %v612_v4 = vsel %vm610_vm2, %v589_v1, 0  ;;  %v581_v7 = vld [vmem:[%s8027_s21 + $0x18] sm:$0xff]  ;;  %v583_v10 = vld [vmem:[%s8027_s21 + $0x28] sm:$0xff]  ;;  %v9796_v17 = vmov 0.0|0.0   ;;  %vm7796_vm4 = vmmov 0  }
  0x6f   : > { %v585_v5 = vpack.c.bf16 %v579_v3, %v578_v2  ;;  %v582_v8 = vld [vmem:[%s8027_s21 + $0x20] sm:$0xff]  ;;  %6251 = vmatpush3.bf16.msra.mxu0 %v612_v4  ;;  %v586_v9 = vpack.c.bf16 %v581_v7, %v580_v6  ;;  %v584_v12 = vld [vmem:[%s8027_s21 + $0x30] sm:$0x1]  ;;  %v709_v15 = vld [vmem:[%s9764_s3 + $0x8] sm:$0xff]  ;;  %7135 = vmatprep.subr.bf16.mxu1 %v9796_v17  ;;  %v9794_v20 = vmov 0.0   ;;  %vm685_vm5 = vcmask 261120  }
  0x70   : > { %v587_v11 = vpack.c.bf16 %v583_v10, %v582_v8  ;;  %v588_v13 = vpack.c.bf16 %v584_v12, %v584_v12  ;;  %v708_v14 = vld [vmem:[%s9764_s3] sm:$0xff]  ;;  %v710_v16 = vld [vmem:[%s9764_s3 + $0x10] sm:$0xff]  ;;  %v711_v19 = vld [vmem:[%s9764_s3 + $0x18] sm:$0xff]  ;;  %6268 = vmatprep.mubr.msk.f32.mxu1 %vm7796_vm4, %v9794_v20  ;;  %vm697_vm6 = vcmask 253952   ;;  %vm793_vm7 = vcmask 122880   ;;  %s7798_s19 = smov 64  }
  0x71   : > { %6252 = vmatprep.mubr.msk.bf16.mxu0 %vm597_vm3, %v585_v5  ;;  %v7136_v18 = vpack.c.bf16 %v709_v15, %v708_v14  ;;  %v7139_v21 = vpack.c.bf16 %v711_v19, %v710_v16  ;;  %v5541_v22 = vld [vmem:[%s9763_s2] ss:$0 sm:$0xff]  ;;  %v797_v6 = vlaneseq  ;;  %v820_v19 = vld [vmem:[%s9766_s5 + $0x8] sm:$0xff]  ;;  %vm821_vm10 = vcmask 130048   ;;  %s7799_s24 = smov 32   ;;  %s9860_s21 = sld [smem:[#allocation33_spill]] }
  0x72   : > { %6253 = vmatmul.mubr.msk.bf16.vlgmr.msra.gmra.mrb[0].mxu0 %vm597_vm3, %v586_v9  ;;  %v712_v1 = vld [vmem:[%s9765_s4] sm:$0x1]  ;;  %vm929_vm12 = vcmask 1040384   ;;  %vm1004_vm13 = vcmask 400384   ;;  %vm5207_vm14 = vcmask 523520   ;;  %vm5219_vm15 = vcmask 516352  }
  0x73   : > { %6256 = vmatprep.mubr.msk.bf16.mxu0 %vm597_vm3, %v587_v11  ;;  %7137 = vmatpush3.bf16.msra.mxu1 %v7136_v18  ;;  %v798_v7 = vand.u32 127, %v797_v6  ;;  %v819_v18 = vld [vmem:[%s9766_s5] sm:$0xff]  ;;  %s7800_s23 = smov 96   ;;  %s9861_s27 = sld [smem:[#allocation22_spill]] }
  0x74   : > { %7138 = vmatprep.subr.bf16.mxu1 %v9796_v17  ;;  %s5866_s14 = sshll.u32 %s7772_s16, 1  ;;  %s9862_s29 = sld [smem:[#allocation35_spill]] }
  0x75   : > { %s5323_s16 = scalar_lea.sflag [#allocation6], %s8018_s10  ;;  %s7801_s15 = smov [#allocation9]  }
  0x76   : > { %s7658_s20 = sshll.u32 %s7801_s15, 4  ;;  %s7659_s20 = int_to_ptr.vmem [resolvable:$false] %s7658_s20 }
  0x77   : > { %7140 = vmatpush3.bf16.msra.mxu1 %v7139_v21  ;;  %v7142_v21 = vpack.c.bf16 %v820_v19, %v819_v18 }
  0x78   : > { %7141 = vmatprep.subr.bf16.mxu1 %v9796_v17 }
  0x79   : > { %p9864_p1 = scmp.ne.s32.totalorder %s9861_s27, 0 }
  0x7a   : > { %6257 = vmatmul.mubr.msk.bf16.gmra.mrb[4].mxu0 %vm597_vm3, %v588_v13 }
 0x145   : > { %v6254_v23 = vpop.f32.mrb[0].mxu0 }
 0x146   : > { %v8071_v24 = vadd.f32 %v6254_v23, %v5541_v22  ;;  %v648_v25 = vpop.f32.mrb[1].mxu0 }
 0x147   : > { %v8073_v26 = vadd.f32 %v5541_v22, %v648_v25  ;;  %v6255_v27 = vpop.f32.mrb[2].mxu0 }
 0x148   : > { %788 = vst.msk [vmem:[%s8032_s25 + $0x10] sm:$0xff] %vm685_vm5, %v8071_v24  ;;  %v8078_v28 = vadd.f32 %v6255_v27, %v5541_v22  ;;  %v651_v29 = vpop.f32.mrb[3].mxu0  ;;  %v680_v32 = vmax.f32 %v8071_v24, 0.0 }
 0x149   : > { %v678_v30 = vmax.f32 %v8073_v26, 0.0  ;;  %786 = vst.msk [vmem:[%s8032_s25] sm:$0xff] %vm685_vm5, %v8073_v26  ;;  %v8084_v31 = vadd.f32 %v5541_v22, %v651_v29 }
 0x14a   : > { %789 = vst.msk [vmem:[%s8032_s25 + $0x18] sm:$0xff] %vm685_vm5, %v8078_v28  ;;  %v681_v35 = vmax.f32 %v8078_v28, 0.0  ;;  %v689_v41 = vsel %vm685_vm5, %v680_v32, 0.0 }
 0x14b   : > { %v679_v33 = vmax.f32 %v8084_v31, 0.0  ;;  %787 = vst.msk [vmem:[%s8032_s25 + $0x8] sm:$0xff] %vm685_vm5, %v8084_v31  ;;  %v686_v34 = vsel %vm685_vm5, %v678_v30, 0.0 }
 0x14c   : > { %v691_v46 = vsel %vm685_vm5, %v681_v35, 0.0 }
 0x14d   : > { %v687_v36 = vsel %vm685_vm5, %v679_v33, 0.0  ;;  %v6258_v37 = vpop.f32.mrb[4].mxu0 }
 0x14e   : > { %v688_v38 = vadd.f32 %v687_v36, %v686_v34  ;;  %v8101_v39 = vadd.f32 %v6258_v37, %v5541_v22  ;;  %v664_v40 = vpop.f32.mrb[5].mxu0  ;;  %v896_v36 = vshrl.u32 %v797_v6, 7 }
 0x14f   : > { %v8106_v42 = vadd.f32 %v5541_v22, %v664_v40  ;;  %v6259_v43 = vpop.f32.mrb[6].mxu0 }
 0x150   : > { %v690_v44 = vadd.f32 %v689_v41, %v688_v38  ;;  %792 = vst.msk [vmem:[%s8032_s25 + $0x30] sm:$0x1] %vm697_vm6, %v8101_v39  ;;  %v667_v45 = vpop.f32.mrb[7].mxu0  ;;  %v684_v50 = vmax.f32 %v8101_v39, 0.0  ;;  %v897_v37 = vsub.s32 0, %v896_v36 }
 0x151   : > { %v682_v47 = vmax.f32 %v8106_v42, 0.0  ;;  %790 = vst.msk [vmem:[%s8032_s25 + $0x20] sm:$0xff] %vm685_vm5, %v8106_v42  ;;  %v8118_v48 = vadd.f32 %v5541_v22, %v667_v45 }
 0x152   : > { %v692_v49 = vadd.f32 %v691_v46, %v690_v44  ;;  %v698_v56 = vsel %vm697_vm6, %v684_v50, 0.0 }
 0x153   : > { %v693_v51 = vsel %vm685_vm5, %v682_v47, 0.0  ;;  %v683_v52 = vmax.f32 %v8118_v48, 0.0  ;;  %791 = vst.msk [vmem:[%s8032_s25 + $0x28] sm:$0xff] %vm685_vm5, %v8118_v48  ;;  %s9863_s25 = smov %s9862_s29 }
 0x154   : > { %v694_v53 = vadd.f32 %v693_v51, %v692_v49 }
 0x155   : > { %v695_v54 = vsel %vm685_vm5, %v683_v52, 0.0 }
 0x156   : > { %v696_v55 = vadd.f32 %v695_v54, %v694_v53 }
 0x158   : > { %v699_v57 = vadd.f32 %v698_v56, %v696_v55 }
 0x15a   : > { %v700_v58 = vrot.slane %v699_v57, 4 }
 0x15c   : > { %v701_v59 = vadd.f32 %v700_v58, %v699_v57 }
 0x15e   : > { %v702_v60 = vrot.slane %v701_v59, 2 }
 0x160   : > { %v703_v61 = vadd.f32 %v702_v60, %v701_v59 }
 0x162   : > { %v704_v62 = vrot.slane %v703_v61, 1 }
 0x164   : > { %v705_v63 = vadd.f32 %v704_v62, %v703_v61 }
 0x166   : > { %v707_v0 = vmul.f32 0.020408163, %v705_v63 }
 0x168   : > { %6269 = vmatmul.mubr.msk.f32.vlgmr.msra.gmra.mrb[0].mxu1 %vm685_vm5, %v707_v0 }
 0x169   : > { %6275 = vmatprep.mubr.msk.f32.mxu1 %vm7796_vm4, %v9794_v20  ;;  %7143 = vmatpush3.bf16.msra.mxu1 %v7142_v21 }
 0x16a   : > { %7144 = vmatprep.subr.bf16.mxu1 %v9796_v17 }
 0x23b   : > { %v782_v2 = vpop.f32.mrb[0].mxu1 }
 0x23c   : > { %v783_v3 = vadd.f32 %v782_v2, %v712_v1  ;;  %v6270_v4 = vpop.f32.mrb[1].mxu1 }
 0x23e   : > { %v794_v5 = vsel %vm793_vm7, %v783_v3, -inf }
 0x23f   : > { %795 = vmax.xlane.f32.xlu0 %v794_v5 }
 0x2cc   : > { %v796_v8 = vpop.xlane.xlu0 %795 }
 0x2cd   : > { %vm799_vm8 = vcmp.eq.f32.partialorder %v783_v3, %v796_v8 }
 0x2ce   : > { %v800_v9 = vsel %vm799_vm8, %v798_v7, 16 }
 0x2cf   : > { %v801_v10 = vsel %vm793_vm7, %v800_v9, 2147483647 }
 0x2d0   : > { %v803_v11 = vshra.s32 %v801_v10, 16  ;;  %v802_v13 = vand.u32 65535, %v801_v10 }
 0x2d2   : > { %v805_v12 = vcvt.s32.f32 %v803_v11  ;;  %v804_v15 = vcvt.s32.f32 %v802_v13 }
 0x2d4   : > { %806 = vmin.xlane.f32.xlu0 %v805_v12 }
 0x361   : > { %v807_v14 = vpop.xlane.xlu0 %806 }
 0x362   : > { %vm808_vm9 = vcmp.eq.f32.partialorder %v805_v12, %v807_v14  ;;  %v813_v22 = vcvt.f32.s32 %v807_v14 }
 0x363   : > { %v809_v16 = vsel %vm808_vm9, %v804_v15, inf }
 0x364   : > { %810 = vmin.xlane.f32.xlu1 %v809_v16  ;;  %v814_v25 = vshll.u32 %v813_v22, 16 }
 0x3f1   : > { %v811_v23 = vpop.xlane.xlu1 %810 }
 0x3f2   : > { %v812_v27 = vcvt.f32.s32 %v811_v23 }
 0x3f4   : > { %v815_v29 = vadd.s32 %v814_v25, %v812_v27 }
 0x3f6   : > { %vm816_vm11 = vcmp.eq.s32.totalorder %v798_v7, %v815_v29 }
 0x3f7   : > { %v5547_v34 = vsel %vm816_vm11, 1.0, %v9794_v20 }
 0x3f8   : > { %6276 = vmatmul.mubr.msk.f32.vlgmr.msra.gmra.mrb[2].mxu1 %vm821_vm10, %v5547_v34 }
 0x3f9   : > { %6292 = vmatprep.mubr.msk.f32.mxu1 %vm7796_vm4, %v9794_v20 }
 0x4cb   : > { %v891_v38 = vpop.f32.mrb[2].mxu1 }
 0x4cc   : > { %v898_v40 = vrot.slane %v891_v38, %v897_v37  ;;  %v6277_v41 = vpop.f32.mrb[3].mxu1 }
 0x4ce   : > { %v905_v43 = vmul.f32 %v898_v40, %v684_v50  ;;  %v899_v44 = vmul.f32 %v898_v40, %v678_v30  ;;  %v900_v49 = vmul.f32 %v898_v40, %v679_v33  ;;  %v901_v51 = vmul.f32 %v898_v40, %v680_v32 }
 0x4cf   : > { %v903_v50 = vmul.f32 %v898_v40, %v682_v47  ;;  %v904_v30 = vmul.f32 %v898_v40, %v683_v52  ;;  %v902_v32 = vmul.f32 %v898_v40, %v681_v35 }
 0x4d0   : > { %v924_v45 = vsel %vm697_vm6, %v905_v43, 0.0  ;;  %v906_v46 = vsel %vm685_vm5, %v899_v44, 0.0  ;;  %v909_v53 = vsel %vm685_vm5, %v900_v49, 0.0  ;;  %v912_v54 = vsel %vm685_vm5, %v901_v51, 0.0 }
 0x4d1   : > { %925 = vadd.xlane.f32.xlu1 %v924_v45  ;;  %907 = vadd.xlane.f32.xlu0 %v906_v46  ;;  %v918_v55 = vsel %vm685_vm5, %v903_v50, 0.0  ;;  %v921_v33 = vsel %vm685_vm5, %v904_v30, 0.0  ;;  %v915_v56 = vsel %vm685_vm5, %v902_v32, 0.0 }
 0x4d5   : > { %910 = vadd.xlane.f32.xlu1 %v909_v53  ;;  %913 = vadd.xlane.f32.xlu0 %v912_v54 }
 0x4d9   : > { %919 = vadd.xlane.f32.xlu1 %v918_v55  ;;  %922 = vadd.xlane.f32.xlu0 %v921_v33 }
 0x4dd   : > { %916 = vadd.xlane.f32.xlu1 %v915_v56 }
 0x55e   : > { %v926_v57 = vpop.xlane.xlu1 %925  ;;  %v908_v58 = vpop.xlane.xlu0 %907 }
 0x55f   : > { %v930_v63 = vsel %vm929_vm12, %v926_v57, -inf }
 0x562   : > { %v911_v47 = vpop.xlane.xlu1 %910  ;;  %v914_v59 = vpop.xlane.xlu0 %913 }
 0x563   : > { %v931_v0 = vmax.f32 %v914_v59, %v930_v63 }
 0x566   : > { %v920_v52 = vpop.xlane.xlu1 %919  ;;  %v923_v60 = vpop.xlane.xlu0 %922 }
 0x567   : > { %v927_v61 = vmax.f32 %v908_v58, %v920_v52  ;;  %v928_v62 = vmax.f32 %v911_v47, %v923_v60 }
 0x569   : > { %v932_v2 = vmax.f32 %v927_v61, %v928_v62 }
 0x56a   : > { %v917_v1 = vpop.xlane.xlu1 %916 }
 0x56b   : > { %v933_v35 = vmax.f32 %v931_v0, %v917_v1 }
 0x56d   : > { %v934_v3 = vmax.f32 %v932_v2, %v933_v35 }
 0x56f   : > { %v935_v4 = vrot.slane %v934_v3, 4 }
 0x571   : > { %v936_v5 = vmax.f32 %v934_v3, %v935_v4 }
 0x573   : > { %v937_v6 = vrot.slane %v936_v5, 2 }
 0x575   : > { %v938_v7 = vmax.f32 %v936_v5, %v937_v6  ;;  %v992_v5 = vld [vmem:[#allocation2 + $0x10] sm:$0xff]  ;;  %v993_v6 = vld [vmem:[#allocation2 + $0x18] sm:$0xff] }
 0x577   : > { %v939_v8 = vrot.slane %v938_v7, 1 }
 0x579   : > { %v940_v9 = vmax.f32 %v938_v7, %v939_v8  ;;  %v8205_v7 = vpack.c.bf16 %v993_v6, %v992_v5  ;;  %v994_v8 = vld [vmem:[#allocation2 + $0x20] sm:$0xff]  ;;  %v5719_v6 = vld [vmem:[%s9767_s6 + $0x128] sm:$0xff] }
 0x57b   : > { %v941_v10 = vsub.f32 %v908_v58, %v940_v9  ;;  %v942_v11 = vsub.f32 %v911_v47, %v940_v9  ;;  %v943_v12 = vsub.f32 %v914_v59, %v940_v9  ;;  %v944_v13 = vsub.f32 %v917_v1, %v940_v9 }
 0x57c   : > { %v945_v16 = vsub.f32 %v920_v52, %v940_v9  ;;  %v947_v19 = vsub.f32 %v926_v57, %v940_v9  ;;  %v946_v21 = vsub.f32 %v923_v60, %v940_v9  ;;  %v995_v9 = vld [vmem:[#allocation2 + $0x28] sm:$0xff] }
 0x57d   : > { %v948_v14 = vmul.f32 1.442695, %v941_v10  ;;  %v950_v15 = vmul.f32 1.442695, %v942_v11  ;;  %v952_v18 = vmul.f32 1.442695, %v943_v12  ;;  %v8215_v11 = vpack.c.bf16 %v995_v9, %v994_v8 }
 0x57e   : > { %v954_v22 = vmul.f32 1.442695, %v944_v13  ;;  %v956_v23 = vmul.f32 1.442695, %v945_v16  ;;  %v960_v25 = vmul.f32 1.442695, %v947_v19 }
 0x57f   : > { %7525 = vpow2.f32 %v948_v14  ;;  %v958_v27 = vmul.f32 1.442695, %v946_v21  ;;  %v999_v10 = vld [vmem:[%s9767_s6 + $0x10] sm:$0xff]  ;;  %v1000_v12 = vld [vmem:[%s9767_s6 + $0x18] sm:$0xff]  ;;  %v1001_v14 = vld [vmem:[%s9767_s6 + $0x20] sm:$0xff] }
 0x580   : > { %7527 = vpow2.f32 %v950_v15  ;;  %v8226_v13 = vld [vmem:[#allocation2 + $0x30] sm:$0x1]  ;;  %v1002_v15 = vld [vmem:[%s9767_s6 + $0x28] sm:$0xff]  ;;  %v8295_v19 = vld [vmem:[%s9767_s6 + $0x40] sm:$0xff] }
 0x581   : > { %7529 = vpow2.f32 %v952_v18  ;;  %v1003_v16 = vld [vmem:[%s9767_s6 + $0x30] sm:$0x1]  ;;  %v8285_v18 = vld [vmem:[%s9767_s6 + $0x38] sm:$0xff]  ;;  %v8306_v21 = vld [vmem:[%s9767_s6 + $0x48] sm:$0xff] }
 0x582   : > { %7531 = vpow2.f32 %v954_v22  ;;  %v8317_v22 = vld [vmem:[%s9767_s6 + $0x50] sm:$0xff] }
 0x583   : > { %7533 = vpow2.f32 %v956_v23  ;;  %v8329_v23 = vld [vmem:[%s9767_s6 + $0x58] sm:$0xff] }
 0x584   : > { %7535 = vpow2.f32 %v960_v25  ;;  %v8339_v25 = vld [vmem:[%s9767_s6 + $0x60] sm:$0xff] }
 0x585   : > { %7537 = vpow2.f32 %v958_v27  ;;  %v8348_v27 = vld [vmem:[%s9767_s6 + $0x68] sm:$0x1] }
 0x589   : > { %v7526_v29 = vpop.eup %7525 }
 0x58a   : > { %v7528_v34 = vpop.eup %7527 }
 0x58b   : > { %v962_v36 = vadd.f32 %v7528_v34, %v7526_v29  ;;  %v7530_v37 = vpop.eup %7529 }
 0x58c   : > { %v7532_v40 = vpop.eup %7531 }
 0x58d   : > { %v963_v38 = vadd.f32 %v7530_v37, %v962_v36  ;;  %v7534_v43 = vpop.eup %7533  ;;  %v5614_v36 = vld [vmem:[%s9767_s6 + $0x80] sm:$0xff] }
 0x58e   : > { %v7536_v44 = vpop.eup %7535 }
 0x58f   : > { %v964_v41 = vadd.f32 %v7532_v40, %v963_v38  ;;  %v7538_v46 = vpop.eup %7537  ;;  %v967_v51 = vsel %vm929_vm12, %v7536_v44, 0.0  ;;  %v5616_v38 = vld [vmem:[%s9767_s6 + $0x90] sm:$0xff] }
 0x591   : > { %v965_v45 = vadd.f32 %v7534_v43, %v964_v41  ;;  %v5618_v41 = vld [vmem:[%s9767_s6 + $0xa0] sm:$0x1] }
 0x593   : > { %v966_v49 = vadd.f32 %v7538_v46, %v965_v45  ;;  %v8429_v45 = vld [vmem:[#allocation4] sm:$0xff]  }
 0x595   : > { %v968_v53 = vadd.f32 %v967_v51, %v966_v49  ;;  %v5648_v49 = vld [vmem:[%s9767_s6 + $0xb0] sm:$0xff]  ;;  %v5649_v51 = vld [vmem:[%s9767_s6 + $0xb8] sm:$0xff] }
 0x597   : > { %v969_v54 = vrot.slane %v968_v53, 4 }
 0x599   : > { %v970_v50 = vadd.f32 %v969_v54, %v968_v53  ;;  %v5650_v53 = vld [vmem:[%s9767_s6 + $0xc0] sm:$0xff]  ;;  %v5651_v54 = vld [vmem:[%s9767_s6 + $0xc8] sm:$0xff] }
 0x59b   : > { %v971_v30 = vrot.slane %v970_v50, 2 }
 0x59d   : > { %v972_v55 = vadd.f32 %v971_v30, %v970_v50  ;;  %v5652_v50 = vld [vmem:[%s9767_s6 + $0xd0] sm:$0xff]  ;;  %v5653_v30 = vld [vmem:[%s9767_s6 + $0xd8] sm:$0x1] }
 0x59f   : > { %v973_v33 = vrot.slane %v972_v55, 1 }
 0x5a1   : > { %v974_v32 = vadd.f32 %v973_v33, %v972_v55  ;;  %v8522_v55 = vld [vmem:[%s9767_s6 + $0xe0] sm:$0xff]  ;;  %v8532_v33 = vld [vmem:[%s9767_s6 + $0xe8] sm:$0xff] }
 0x5a3   : > { %7539 = vrcp.f32 %v974_v32  ;;  %v8543_v32 = vld [vmem:[%s9767_s6 + $0xf0] sm:$0xff] }
 0x5ad   : > { %v7540_v56 = vpop.eup %7539 }
 0x5ae   : > { %v976_v57 = vmul.f32 %v7540_v56, %v7526_v29  ;;  %v977_v58 = vmul.f32 %v7540_v56, %v7528_v34  ;;  %v978_v47 = vmul.f32 %v7540_v56, %v7530_v37  ;;  %v979_v59 = vmul.f32 %v7540_v56, %v7532_v40  ;;  %v5612_v29 = vld [vmem:[%s9767_s6 + $0x70] sm:$0xff]  ;;  %v5613_v34 = vld [vmem:[%s9767_s6 + $0x78] sm:$0xff]  ;;  %v5615_v37 = vld [vmem:[%s9767_s6 + $0x88] sm:$0xff] }
 0x5af   : > { %v980_v61 = vmul.f32 %v7540_v56, %v7534_v43  ;;  %v981_v62 = vmul.f32 %v7540_v56, %v7538_v46  ;;  %v5617_v40 = vld [vmem:[%s9767_s6 + $0x98] sm:$0xff]  ;;  %v7489_v43 = vld [vmem:[#allocation7] sm:$0xff]   ;;  %v5647_v46 = vld [vmem:[%s9767_s6 + $0xa8] sm:$0xff] }
 0x5b0   : > { %v983_v52 = vmul.f32 %v976_v57, %v8073_v26  ;;  %v984_v60 = vmul.f32 %v977_v58, %v8084_v31  ;;  %v985_v63 = vmul.f32 %v978_v47, %v8071_v24  ;;  %v986_v0 = vmul.f32 %v979_v59, %v8078_v28  ;;  %v990_v28 = vld [vmem:[#allocation2] sm:$0xff]  ;;  %v991_v31 = vld [vmem:[#allocation2 + $0x8] sm:$0xff]  ;;  %6348 = vmatprep.subr.bf16.mxu0 %v7489_v43 }
 0x5b1   : > { %v987_v2 = vmul.f32 %v980_v61, %v8106_v42  ;;  %v988_v35 = vmul.f32 %v981_v62, %v8118_v48  ;;  %v982_v24 = vmul.f32 %v7540_v56, %v7536_v44  ;;  %v997_v42 = vld [vmem:[%s9767_s6] sm:$0xff]  ;;  %v8193_v48 = vpack.c.bf16 %v991_v31, %v990_v28  ;;  %6349 = vmatpush3.bf16.msra.mxu0 %v7489_v43  ;;  %v7490_v44 = vld [vmem:[#allocation7 + $0x8] sm:$0xff]   ;;  %v8554_v56 = vld [vmem:[%s9767_s6 + $0xf8] sm:$0xff] }
 0x5b2   : > { %v8173_v1 = vpack.c.bf16 %v984_v60, %v983_v52  ;;  %v8179_v3 = vpack.c.bf16 %v986_v0, %v985_v63  ;;  %6350 = vmatprep.subr.bf16.mxu0 %v7490_v44  ;;  %v8566_v57 = vld [vmem:[%s9767_s6 + $0x100] sm:$0xff]  ;;  %v8578_v59 = vld [vmem:[%s9767_s6 + $0x108] sm:$0xff]  ;;  %v8591_v62 = vld [vmem:[%s9767_s6 + $0x110] sm:$0x1] }
 0x5b3   : > { %v8183_v26 = vpack.c.bf16 %v988_v35, %v987_v2  ;;  %v8188_v4 = vmul.f32 %v982_v24, %v8101_v39  ;;  %v998_v39 = vld [vmem:[%s9767_s6 + $0x8] sm:$0xff]  ;;  %v5717_v2 = vld [vmem:[%s9767_s6 + $0x118] sm:$0xff]  ;;  %v5718_v31 = vld [vmem:[%s9767_s6 + $0x120] sm:$0xff] }
 0x5b4   : > { %7146 = vmatpush3.bf16.msra.mxu1 %v8173_v1 }
 0x5b5   : > { %7147 = vmatprep.subr.bf16.mxu1 %v9796_v17  ;;  %6351 = vmatpush3.bf16.msra.mxu0 %v7490_v44 }
 0x5b6   : > { %6360 = vmatprep.subr.bf16.mxu0 %v8429_v45 }
 0x5b8   : > { %7149 = vmatpush3.bf16.msra.mxu1 %v8179_v3 }
 0x5b9   : > { %7150 = vmatprep.subr.bf16.mxu1 %v9796_v17 }
 0x5bc   : > { %7152 = vmatpush3.bf16.msra.mxu1 %v8183_v26 }
 0x5bd   : > { %6290 = vmatprep.subr.mxu1 %v9794_v20 }
 0x5c0   : > { %6291 = vmatpush3.msk.msra.mxu1 %vm929_vm12, %v8188_v4 }
 0x5c1   : > { %6293 = vmatmul.mubr.msk.f32.vlgmr.msra.gmra.mrb[4].mxu1 %vm1004_vm13, %v997_v42  ;;  %7153 = vmatprep.subr.bf16.mxu1 %v9796_v17 }
 0x5c2   : > { %7155 = vmatpush3.bf16.msra.mxu1 %v8193_v48  ;;  %6295 = vmatprep.mubr.msk.f32.mxu1 %vm7796_vm4, %v9794_v20 }
 0x5c3   : > { %7156 = vmatprep.subr.bf16.mxu1 %v9796_v17 }
 0x5c5   : > { %6296 = vmatmul.mubr.msk.f32.gmra.mrb[6].mxu1 %vm1004_vm13, %v998_v39 }
 0x5c6   : > { %6298 = vmatprep.mubr.msk.f32.mxu1 %vm7796_vm4, %v9794_v20  ;;  %7158 = vmatpush3.bf16.msra.mxu1 %v8205_v7 }
 0x5c7   : > { %7159 = vmatprep.subr.bf16.mxu1 %v9796_v17 }
 0x5c9   : > { %6299 = vmatmul.mubr.msk.f32.gmra.mrb[8].mxu1 %vm1004_vm13, %v999_v10 }
 0x5ca   : > { %6301 = vmatprep.mubr.msk.f32.mxu1 %vm7796_vm4, %v9794_v20  ;;  %7161 = vmatpush3.bf16.msra.mxu1 %v8215_v11 }
 0x5cb   : > { %6325 = vmatprep.subr.mxu1 %v9794_v20 }
 0x5cd   : > { %6302 = vmatmul.mubr.msk.f32.gmra.mrb[10].mxu1 %vm1004_vm13, %v1000_v12 }
 0x5ce   : > { %6304 = vmatprep.mubr.msk.f32.mxu1 %vm7796_vm4, %v9794_v20  ;;  %6326 = vmatpush3.msk.msra.mxu1 %vm929_vm12, %v8226_v13 }
 0x5cf   : > { %7162 = vmatprep.subr.bf16.mxu1 %v9796_v17 }
 0x5d1   : > { %6305 = vmatmul.mubr.msk.f32.gmra.mrb[12].mxu1 %vm1004_vm13, %v1001_v14 }
 0x5d2   : > { %6307 = vmatprep.mubr.msk.f32.mxu1 %vm7796_vm4, %v9794_v20 }
 0x5d5   : > { %6308 = vmatmul.mubr.msk.f32.gmra.mrb[14].mxu1 %vm1004_vm13, %v1002_v15 }
 0x5d6   : > { %6310 = vmatprep.mubr.msk.f32.mxu1 %vm7796_vm4, %v9794_v20 }
 0x5d9   : > { %6311 = vmatmul.mubr.msk.f32.gmra.mrb[16].mxu1 %vm1004_vm13, %v1003_v16 }
 0x5da   : > { %6327 = vmatprep.mubr.msk.f32.mxu1 %vm7796_vm4, %v9794_v20 }
 0x5dd   : > { %6328 = vmatmul.mubr.msk.f32.vlgmr.msra.gmra.mrb[18].mxu1 %vm1004_vm13, %v997_v42 }
 0x5de   : > { %7164 = vmatpush3.bf16.msra.mxu1 %v8173_v1  ;;  %6330 = vmatprep.mubr.msk.f32.mxu1 %vm7796_vm4, %v9794_v20 }
 0x5df   : > { %7165 = vmatprep.subr.bf16.mxu1 %v9796_v17 }
 0x5e1   : > { %6331 = vmatmul.mubr.msk.f32.gmra.mrb[20].mxu1 %vm1004_vm13, %v998_v39 }
 0x5e2   : > { %7167 = vmatpush3.bf16.msra.mxu1 %v8179_v3  ;;  %6333 = vmatprep.mubr.msk.f32.mxu1 %vm7796_vm4, %v9794_v20 }
 0x5e3   : > { %7168 = vmatprep.subr.bf16.mxu1 %v9796_v17 }
 0x5e5   : > { %6334 = vmatmul.mubr.msk.f32.gmra.mrb[22].mxu1 %vm1004_vm13, %v999_v10  ;;  %v5720_v10 = vld [vmem:[%s9767_s6 + $0x130] sm:$0xff] }
 0x5e6   : > { %7170 = vmatpush3.bf16.msra.mxu1 %v8183_v26  ;;  %6336 = vmatprep.mubr.msk.f32.mxu1 %vm7796_vm4, %v9794_v20 }
 0x5e7   : > { %6384 = vmatprep.subr.mxu1 %v9794_v20 }
 0x5e9   : > { %6337 = vmatmul.mubr.msk.f32.gmra.mrb[24].mxu1 %vm1004_vm13, %v1000_v12 }
 0x5ea   : > { %6385 = vmatpush3.msk.msra.mxu1 %vm929_vm12, %v8188_v4  ;;  %6339 = vmatprep.mubr.msk.f32.mxu1 %vm7796_vm4, %v9794_v20 }
 0x5eb   : > { %7180 = vmatprep.subr.bf16.mxu1 %v9796_v17 }
 0x5ed   : > { %6340 = vmatmul.mubr.msk.f32.gmra.mrb[26].mxu1 %vm1004_vm13, %v1001_v14 }
 0x5ee   : > { %6342 = vmatprep.mubr.msk.f32.mxu1 %vm7796_vm4, %v9794_v20 }
 0x5f1   : > { %6343 = vmatmul.mubr.msk.f32.gmra.mrb[28].mxu1 %vm1004_vm13, %v1002_v15  ;;  %v5721_v15 = vld [vmem:[%s9767_s6 + $0x138] sm:$0xff] }
 0x5f2   : > { %6345 = vmatprep.mubr.msk.f32.mxu1 %vm7796_vm4, %v9794_v20 }
 0x5f5   : > { %6346 = vmatmul.mubr.msk.f32.gmra.mrb[30].mxu1 %vm1004_vm13, %v1003_v16 }
 0x5f6   : > { %6386 = vmatprep.mubr.msk.f32.mxu1 %vm7796_vm4, %v9794_v20 }
 0x5f9   : > { %6387 = vmatmul.mubr.msk.f32.vlgmr.msra.gmra.mrb[32].mxu1 %vm1004_vm13, %v8285_v18 }
 0x5fa   : > { %7182 = vmatpush3.bf16.msra.mxu1 %v8173_v1  ;;  %6389 = vmatprep.mubr.msk.f32.mxu1 %vm7796_vm4, %v9794_v20 }
 0x5fb   : > { %7183 = vmatprep.subr.bf16.mxu1 %v9796_v17 }
 0x5fd   : > { %6390 = vmatmul.mubr.msk.f32.gmra.mrb[34].mxu1 %vm1004_vm13, %v8295_v19 }
 0x5fe   : > { %7185 = vmatpush3.bf16.msra.mxu1 %v8179_v3  ;;  %6392 = vmatprep.mubr.msk.f32.mxu1 %vm7796_vm4, %v9794_v20 }
 0x5ff   : > { %7186 = vmatprep.subr.bf16.mxu1 %v9796_v17 }
 0x601   : > { %6393 = vmatmul.mubr.msk.f32.gmra.mrb[36].mxu1 %vm1004_vm13, %v8306_v21 }
 0x602   : > { %7188 = vmatpush3.bf16.msra.mxu1 %v8183_v26  ;;  %6395 = vmatprep.mubr.msk.f32.mxu1 %vm7796_vm4, %v9794_v20 }
 0x603   : > { %6478 = vmatprep.subr.mxu1 %v9794_v20 }
 0x605   : > { %6396 = vmatmul.mubr.msk.f32.gmra.mrb[38].mxu1 %vm1004_vm13, %v8317_v22 }
 0x606   : > { %6479 = vmatpush3.msk.msra.mxu1 %vm929_vm12, %v8188_v4  ;;  %6398 = vmatprep.mubr.msk.f32.mxu1 %vm7796_vm4, %v9794_v20 }
 0x607   : > { %7189 = vmatprep.subr.bf16.mxu1 %v9796_v17 }
 0x609   : > { %6399 = vmatmul.mubr.msk.f32.gmra.mrb[40].mxu1 %vm1004_vm13, %v8329_v23 }
 0x60a   : > { %6401 = vmatprep.mubr.msk.f32.mxu1 %vm7796_vm4, %v9794_v20 }
 0x60d   : > { %6402 = vmatmul.mubr.msk.f32.gmra.mrb[42].mxu1 %vm1004_vm13, %v8339_v25 }
 0x60e   : > { %6404 = vmatprep.mubr.msk.f32.mxu1 %vm7796_vm4, %v9794_v20 }
 0x611   : > { %6405 = vmatmul.mubr.msk.f32.gmra.mrb[44].mxu1 %vm1004_vm13, %v8348_v27 }
 0x612   : > { %6480 = vmatprep.mubr.msk.f32.mxu1 %vm7796_vm4, %v9794_v20 }
 0x615   : > { %6481 = vmatmul.mubr.msk.f32.vlgmr.msra.gmra.mrb[46].mxu1 %vm1004_vm13, %v5612_v29 }
 0x616   : > { %6483 = vmatprep.mubr.msk.f32.mxu1 %vm7796_vm4, %v9794_v20  ;;  %7191 = vmatpush3.bf16.msra.mxu1 %v8193_v48 }
 0x617   : > { %7192 = vmatprep.subr.bf16.mxu1 %v9796_v17 }
 0x619   : > { %6484 = vmatmul.mubr.msk.f32.gmra.mrb[48].mxu1 %vm1004_vm13, %v5613_v34 }
 0x61a   : > { %6486 = vmatprep.mubr.msk.f32.mxu1 %vm7796_vm4, %v9794_v20  ;;  %7194 = vmatpush3.bf16.msra.mxu1 %v8205_v7 }
 0x61b   : > { %7195 = vmatprep.subr.bf16.mxu1 %v9796_v17 }
 0x61d   : > { %6487 = vmatmul.mubr.msk.f32.gmra.mrb[50].mxu1 %vm1004_vm13, %v5614_v36 }
 0x61e   : > { %6489 = vmatprep.mubr.msk.f32.mxu1 %vm7796_vm4, %v9794_v20  ;;  %7197 = vmatpush3.bf16.msra.mxu1 %v8215_v11 }
 0x61f   : > { %6513 = vmatprep.subr.mxu1 %v9794_v20 }
 0x621   : > { %6490 = vmatmul.mubr.msk.f32.gmra.mrb[52].mxu1 %vm1004_vm13, %v5615_v37 }
 0x622   : > { %6492 = vmatprep.mubr.msk.f32.mxu1 %vm7796_vm4, %v9794_v20  ;;  %6514 = vmatpush3.msk.msra.mxu1 %vm929_vm12, %v8226_v13 }
 0x623   : > { %7198 = vmatprep.subr.bf16.mxu1 %v9796_v17 }
 0x625   : > { %6493 = vmatmul.mubr.msk.f32.gmra.mrb[54].mxu1 %vm1004_vm13, %v5616_v38 }
 0x626   : > { %6495 = vmatprep.mubr.msk.f32.mxu1 %vm7796_vm4, %v9794_v20 }
 0x629   : > { %6496 = vmatmul.mubr.msk.f32.gmra.mrb[56].mxu1 %vm1004_vm13, %v5617_v40 }
 0x62a   : > { %6498 = vmatprep.mubr.msk.f32.mxu1 %vm7796_vm4, %v9794_v20 }
 0x62d   : > { %6499 = vmatmul.mubr.msk.f32.gmra.mrb[58].mxu1 %vm1004_vm13, %v5618_v41 }
 0x62e   : > { %6515 = vmatprep.mubr.msk.f32.mxu1 %vm7796_vm4, %v9794_v20 }
 0x631   : > { %6516 = vmatmul.mubr.msk.f32.vlgmr.msra.gmra.mrb[60].mxu1 %vm1004_vm13, %v5612_v29 }
 0x632   : > { %7200 = vmatpush3.bf16.msra.mxu1 %v8173_v1  ;;  %6518 = vmatprep.mubr.msk.f32.mxu1 %vm7796_vm4, %v9794_v20 }
 0x633   : > { %7201 = vmatprep.subr.bf16.mxu1 %v9796_v17 }
 0x635   : > { %6519 = vmatmul.mubr.msk.f32.gmra.mrb[62].mxu1 %vm1004_vm13, %v5613_v34  ;;  %v5722_v34 = vld [vmem:[%s9767_s6 + $0x140] sm:$0xff] }
 0x636   : > { %7203 = vmatpush3.bf16.msra.mxu1 %v8179_v3  ;;  %6521 = vmatprep.mubr.msk.f32.mxu1 %vm7796_vm4, %v9794_v20 }
 0x637   : > { %7204 = vmatprep.subr.bf16.mxu1 %v9796_v17 }
 0x639   : > { %6522 = vmatmul.mubr.msk.f32.gmra.mrb[64].mxu1 %vm1004_vm13, %v5614_v36 }
 0x63a   : > { %7206 = vmatpush3.bf16.msra.mxu1 %v8183_v26  ;;  %6524 = vmatprep.mubr.msk.f32.mxu1 %vm7796_vm4, %v9794_v20 }
 0x63b   : > { %6572 = vmatprep.subr.mxu1 %v9794_v20 }
 0x63d   : > { %6525 = vmatmul.mubr.msk.f32.gmra.mrb[66].mxu1 %vm1004_vm13, %v5615_v37 }
 0x63e   : > { %6573 = vmatpush3.msk.msra.mxu1 %vm929_vm12, %v8188_v4  ;;  %6527 = vmatprep.mubr.msk.f32.mxu1 %vm7796_vm4, %v9794_v20 }
 0x63f   : > { %7207 = vmatprep.subr.bf16.mxu1 %v9796_v17 }
 0x641   : > { %6528 = vmatmul.mubr.msk.f32.gmra.mrb[68].mxu1 %vm1004_vm13, %v5616_v38 }
 0x642   : > { %6530 = vmatprep.mubr.msk.f32.mxu1 %vm7796_vm4, %v9794_v20 }
 0x645   : > { %6531 = vmatmul.mubr.msk.f32.gmra.mrb[70].mxu1 %vm1004_vm13, %v5617_v40  ;;  %v5723_v40 = vld [vmem:[%s9767_s6 + $0x148] sm:$0x1] }
 0x646   : > { %6533 = vmatprep.mubr.msk.f32.mxu1 %vm7796_vm4, %v9794_v20 }
 0x649   : > { %6534 = vmatmul.mubr.msk.f32.gmra.mrb[72].mxu1 %vm1004_vm13, %v5618_v41 }
 0x64a   : > { %6574 = vmatprep.mubr.msk.f32.mxu1 %vm7796_vm4, %v9794_v20 }
 0x64d   : > { %6575 = vmatmul.mubr.msk.f32.vlgmr.msra.gmra.mrb[74].mxu1 %vm1004_vm13, %v5647_v46 }
 0x64e   : > { %6577 = vmatprep.mubr.msk.f32.mxu1 %vm7796_vm4, %v9794_v20  ;;  %7209 = vmatpush3.bf16.msra.mxu1 %v8193_v48 }
 0x64f   : > { %7210 = vmatprep.subr.bf16.mxu1 %v9796_v17 }
 0x651   : > { %6578 = vmatmul.mubr.msk.f32.gmra.mrb[76].mxu1 %vm1004_vm13, %v5648_v49 }
 0x652   : > { %6580 = vmatprep.mubr.msk.f32.mxu1 %vm7796_vm4, %v9794_v20  ;;  %7212 = vmatpush3.bf16.msra.mxu1 %v8205_v7 }
 0x653   : > { %7213 = vmatprep.subr.bf16.mxu1 %v9796_v17 }
 0x655   : > { %6581 = vmatmul.mubr.msk.f32.gmra.mrb[78].mxu1 %vm1004_vm13, %v5649_v51 }
 0x656   : > { %6583 = vmatprep.mubr.msk.f32.mxu1 %vm7796_vm4, %v9794_v20  ;;  %7215 = vmatpush3.bf16.msra.mxu1 %v8215_v11 }
 0x657   : > { %6607 = vmatprep.subr.mxu1 %v9794_v20 }
 0x659   : > { %6584 = vmatmul.mubr.msk.f32.gmra.mrb[80].mxu1 %vm1004_vm13, %v5650_v53 }
 0x65a   : > { %6586 = vmatprep.mubr.msk.f32.mxu1 %vm7796_vm4, %v9794_v20  ;;  %6608 = vmatpush3.msk.msra.mxu1 %vm929_vm12, %v8226_v13 }
 0x65b   : > { %7216 = vmatprep.subr.bf16.mxu1 %v9796_v17 }
 0x65d   : > { %6587 = vmatmul.mubr.msk.f32.gmra.mrb[82].mxu1 %vm1004_vm13, %v5651_v54 }
 0x65e   : > { %6589 = vmatprep.mubr.msk.f32.mxu1 %vm7796_vm4, %v9794_v20 }
 0x661   : > { %6590 = vmatmul.mubr.msk.f32.gmra.mrb[84].mxu1 %vm1004_vm13, %v5652_v50 }
 0x662   : > { %6592 = vmatprep.mubr.msk.f32.mxu1 %vm7796_vm4, %v9794_v20 }
 0x665   : > { %6593 = vmatmul.mubr.msk.f32.gmra.mrb[86].mxu1 %vm1004_vm13, %v5653_v30 }
 0x666   : > { %6609 = vmatprep.mubr.msk.f32.mxu1 %vm7796_vm4, %v9794_v20 }
 0x669   : > { %6610 = vmatmul.mubr.msk.f32.vlgmr.msra.gmra.mrb[88].mxu1 %vm1004_vm13, %v5647_v46 }
 0x66a   : > { %7218 = vmatpush3.bf16.msra.mxu1 %v8173_v1  ;;  %6612 = vmatprep.mubr.msk.f32.mxu1 %vm7796_vm4, %v9794_v20 }
 0x66b   : > { %7219 = vmatprep.subr.bf16.mxu1 %v9796_v17 }
 0x66d   : > { %6613 = vmatmul.mubr.msk.f32.gmra.mrb[90].mxu1 %vm1004_vm13, %v5648_v49 }
 0x66e   : > { %7221 = vmatpush3.bf16.msra.mxu1 %v8179_v3  ;;  %6615 = vmatprep.mubr.msk.f32.mxu1 %vm7796_vm4, %v9794_v20 }
 0x66f   : > { %7222 = vmatprep.subr.bf16.mxu1 %v9796_v17 }
 0x671   : > { %6616 = vmatmul.mubr.msk.f32.gmra.mrb[92].mxu1 %vm1004_vm13, %v5649_v51  ;;  %v7492_v51 = vld [vmem:[#allocation4 + $0x8] sm:$0xff]  }
 0x672   : > { %7224 = vmatpush3.bf16.msra.mxu1 %v8183_v26  ;;  %6618 = vmatprep.mubr.msk.f32.mxu1 %vm7796_vm4, %v9794_v20 }
 0x673   : > { %6666 = vmatprep.subr.mxu1 %v9794_v20 }
 0x675   : > { %6619 = vmatmul.mubr.msk.f32.gmra.mrb[94].mxu1 %vm1004_vm13, %v5650_v53 }
 0x676   : > { %6667 = vmatpush3.msk.msra.mxu1 %vm929_vm12, %v8188_v4  ;;  %6621 = vmatprep.mubr.msk.f32.mxu1 %vm7796_vm4, %v9794_v20 }
 0x677   : > { %7234 = vmatprep.subr.bf16.mxu1 %v9796_v17 }
 0x679   : > { %6622 = vmatmul.mubr.msk.f32.gmra.mrb[96].mxu1 %vm1004_vm13, %v5651_v54 }
 0x67a   : > { %6624 = vmatprep.mubr.msk.f32.mxu1 %vm7796_vm4, %v9794_v20 }
 0x67d   : > { %6625 = vmatmul.mubr.msk.f32.gmra.mrb[98].mxu1 %vm1004_vm13, %v5652_v50 }
 0x67e   : > { %6627 = vmatprep.mubr.msk.f32.mxu1 %vm7796_vm4, %v9794_v20 }
 0x681   : > { %6628 = vmatmul.mubr.msk.f32.gmra.mrb[100].mxu1 %vm1004_vm13, %v5653_v30 }
 0x682   : > { %6668 = vmatprep.mubr.msk.f32.mxu1 %vm7796_vm4, %v9794_v20 }
 0x685   : > { %6669 = vmatmul.mubr.msk.f32.vlgmr.msra.gmra.mrb[102].mxu1 %vm1004_vm13, %v8522_v55 }
 0x686   : > { %7236 = vmatpush3.bf16.msra.mxu1 %v8173_v1  ;;  %6671 = vmatprep.mubr.msk.f32.mxu1 %vm7796_vm4, %v9794_v20 }
 0x687   : > { %7237 = vmatprep.subr.bf16.mxu1 %v9796_v17 }
 0x689   : > { %6672 = vmatmul.mubr.msk.f32.gmra.mrb[104].mxu1 %vm1004_vm13, %v8532_v33 }
 0x68a   : > { %7239 = vmatpush3.bf16.msra.mxu1 %v8179_v3  ;;  %6674 = vmatprep.mubr.msk.f32.mxu1 %vm7796_vm4, %v9794_v20 }
 0x68b   : > { %7240 = vmatprep.subr.bf16.mxu1 %v9796_v17 }
 0x68d   : > { %6675 = vmatmul.mubr.msk.f32.gmra.mrb[106].mxu1 %vm1004_vm13, %v8543_v32 }
 0x68e   : > { %7242 = vmatpush3.bf16.msra.mxu1 %v8183_v26  ;;  %6677 = vmatprep.mubr.msk.f32.mxu1 %vm7796_vm4, %v9794_v20 }
 0x68f   : > { %6760 = vmatprep.subr.mxu1 %v9794_v20 }
 0x691   : > { %6678 = vmatmul.mubr.msk.f32.gmra.mrb[108].mxu1 %vm1004_vm13, %v8554_v56 }
 0x692   : > { %6761 = vmatpush3.msk.msra.mxu1 %vm929_vm12, %v8188_v4  ;;  %6680 = vmatprep.mubr.msk.f32.mxu1 %vm7796_vm4, %v9794_v20 }
 0x693   : > { %7243 = vmatprep.subr.bf16.mxu1 %v9796_v17 }
 0x694   : > { %v8569_v58 = vpop.f32.mrb[4].mxu1 }
 0x695   : > { %v6294_v47 = vpop.f32.mrb[5].mxu1  ;;  %6681 = vmatmul.mubr.msk.f32.gmra.mrb[110].mxu1 %vm1004_vm13, %v8566_v57 }
 0x696   : > { %6683 = vmatprep.mubr.msk.f32.mxu1 %vm7796_vm4, %v9794_v20 }
 0x698   : > { %v8580_v52 = vpop.f32.mrb[6].mxu1 }
 0x699   : > { %v1129_v60 = vpack.c.bf16 %v8580_v52, %v8569_v58  ;;  %v6297_v61 = vpop.f32.mrb[7].mxu1  ;;  %6684 = vmatmul.mubr.msk.f32.gmra.mrb[112].mxu1 %vm1004_vm13, %v8578_v59 }
 0x69a   : > { %6686 = vmatprep.mubr.msk.f32.mxu1 %vm7796_vm4, %v9794_v20 }
 0x69c   : > { %v8593_v63 = vpop.f32.mrb[8].mxu1 }
 0x69d   : > { %v6300_v0 = vpop.f32.mrb[9].mxu1  ;;  %6687 = vmatmul.mubr.msk.f32.gmra.mrb[114].mxu1 %vm1004_vm13, %v8591_v62 }
 0x69e   : > { %6762 = vmatprep.mubr.msk.f32.mxu1 %vm7796_vm4, %v9794_v20 }
 0x6a0   : > { %v8602_v35 = vpop.f32.mrb[10].mxu1 }
 0x6a1   : > { %v1130_v24 = vpack.c.bf16 %v8602_v35, %v8593_v63  ;;  %v6303_v28 = vpop.f32.mrb[11].mxu1  ;;  %6763 = vmatmul.mubr.msk.f32.vlgmr.msra.gmra.mrb[116].mxu1 %vm1004_vm13, %v5717_v2 }
 0x6a2   : > { %6765 = vmatprep.mubr.msk.f32.mxu1 %vm7796_vm4, %v9794_v20  ;;  %7245 = vmatpush3.bf16.msra.mxu1 %v8193_v48 }
 0x6a3   : > { %7246 = vmatprep.subr.bf16.mxu1 %v9796_v17 }
 0x6a4   : > { %v8614_v42 = vpop.f32.mrb[12].mxu1 }
 0x6a5   : > { %v6306_v5 = vpop.f32.mrb[13].mxu1  ;;  %6766 = vmatmul.mubr.msk.f32.gmra.mrb[118].mxu1 %vm1004_vm13, %v5718_v31 }
 0x6a6   : > { %6768 = vmatprep.mubr.msk.f32.mxu1 %vm7796_vm4, %v9794_v20  ;;  %7248 = vmatpush3.bf16.msra.mxu1 %v8205_v7 }
 0x6a7   : > { %7249 = vmatprep.subr.bf16.mxu1 %v9796_v17 }
 0x6a8   : > { %v8624_v39 = vpop.f32.mrb[14].mxu1 }
 0x6a9   : > { %v1131_v8 = vpack.c.bf16 %v8624_v39, %v8614_v42  ;;  %v6309_v9 = vpop.f32.mrb[15].mxu1  ;;  %6769 = vmatmul.mubr.msk.f32.gmra.mrb[120].mxu1 %vm1004_vm13, %v5719_v6  ;;  %v8741_v39 = vld [vmem:[%s9767_s6 + $0x158] sm:$0xff] }
 0x6aa   : > { %6771 = vmatprep.mubr.msk.f32.mxu1 %vm7796_vm4, %v9794_v20  ;;  %7251 = vmatpush3.bf16.msra.mxu1 %v8215_v11  ;;  %9827 = vst [vmem:[#allocation27_spill] sm:$0xff] %v8741_v39  ;;  %v7493_v9 = vld [vmem:[#allocation4 + $0x10] sm:$0xff]  }
 0x6ab   : > { %6795 = vmatprep.subr.mxu1 %v9794_v20 }
 0x6ac   : > { %v8636_v12 = vpop.f32.mrb[16].mxu1 }
 0x6ad   : > { %v6312_v14 = vpop.f32.mrb[17].mxu1  ;;  %6772 = vmatmul.mubr.msk.f32.gmra.mrb[122].mxu1 %vm1004_vm13, %v5720_v10  ;;  %v1132_v35 = vpack.c.bf16 %v8636_v12, %v8636_v12  ;;  %v8759_v12 = vld [vmem:[%s9767_s6 + $0x160] sm:$0xff] }
 0x6ae   : > { %6774 = vmatprep.mubr.msk.f32.mxu1 %vm7796_vm4, %v9794_v20  ;;  %6796 = vmatpush3.msk.msra.mxu1 %vm929_vm12, %v8226_v13  ;;  %9828 = vst [vmem:[#allocation28_spill] sm:$0xff] %v8759_v12 }
 0x6af   : > { %7252 = vmatprep.subr.bf16.mxu1 %v9796_v17 }
 0x6b0   : > { %v1202_v16 = vpop.f32.mrb[18].mxu1 }
 0x6b1   : > { %v6329_v29 = vpop.f32.mrb[19].mxu1  ;;  %6775 = vmatmul.mubr.msk.f32.gmra.mrb[124].mxu1 %vm1004_vm13, %v5721_v15 }
 0x6b2   : > { %6777 = vmatprep.mubr.msk.f32.mxu1 %vm7796_vm4, %v9794_v20 }
 0x6b4   : > { %v1207_v36 = vpop.f32.mrb[20].mxu1 }
 0x6b5   : > { %v1236_v37 = vpack.c.bf16 %v1207_v36, %v1202_v16  ;;  %v6332_v38 = vpop.f32.mrb[21].mxu1  ;;  %6778 = vmatmul.mubr.msk.f32.gmra.mrb[126].mxu1 %vm1004_vm13, %v5722_v34 }
 0x6b6   : > { %6780 = vmatprep.mubr.msk.f32.mxu1 %vm7796_vm4, %v9794_v20  ;;  %v8803_v38 = vld [vmem:[%s9767_s6 + $0x178] sm:$0xff] }
 0x6b7   : > { %6352 = vmatprep.mubr.msk.bf16.mxu0 %vm685_vm5, %v1236_v37  ;;  %9831 = vst [vmem:[#allocation31_spill] sm:$0xff] %v8803_v38 }
 0x6b8   : > { %v1212_v41 = vpop.f32.mrb[22].mxu1 }
 0x6b9   : > { %v6335_v43 = vpop.f32.mrb[23].mxu1  ;;  %6781 = vmatmul.mubr.msk.f32.gmra.mrb[128].mxu1 %vm1004_vm13, %v5723_v40 }
 0x6ba   : > { %6797 = vmatprep.mubr.msk.f32.mxu1 %vm7796_vm4, %v9794_v20 }
 0x6bc   : > { %v1217_v44 = vpop.f32.mrb[24].mxu1 }
 0x6bd   : > { %v1237_v46 = vpack.c.bf16 %v1217_v44, %v1212_v41  ;;  %v6338_v49 = vpop.f32.mrb[25].mxu1  ;;  %6798 = vmatmul.mubr.msk.f32.vlgmr.msra.gmra.mrb[130].mxu1 %vm1004_vm13, %v5717_v2  ;;  %v5792_v41 = vld [vmem:[%s9767_s6 + $0x1b0] sm:$0xff] }
 0x6be   : > { %7254 = vmatpush3.bf16.msra.mxu1 %v8173_v1  ;;  %6800 = vmatprep.mubr.msk.f32.mxu1 %vm7796_vm4, %v9794_v20 }
 0x6bf   : > { %6353 = vmatmul.mubr.msk.bf16.vlgmr.msra.gmra.mrb[8].mxu0 %vm685_vm5, %v1237_v46  ;;  %7255 = vmatprep.subr.bf16.mxu1 %v9796_v17 }
 0x6c0   : > { %v1222_v53 = vpop.f32.mrb[26].mxu1  ;;  %6361 = vmatpush3.bf16.msra.mxu0 %v8429_v45 }
 0x6c1   : > { %v6341_v54 = vpop.f32.mrb[27].mxu1  ;;  %6801 = vmatmul.mubr.msk.f32.gmra.mrb[132].mxu1 %vm1004_vm13, %v5718_v31  ;;  %6362 = vmatprep.subr.bf16.mxu0 %v7492_v51 }
 0x6c2   : > { %7257 = vmatpush3.bf16.msra.mxu1 %v8179_v3  ;;  %6803 = vmatprep.mubr.msk.f32.mxu1 %vm7796_vm4, %v9794_v20 }
 0x6c3   : > { %7258 = vmatprep.subr.bf16.mxu1 %v9796_v17 }
 0x6c4   : > { %v1227_v50 = vpop.f32.mrb[28].mxu1  ;;  %6363 = vmatpush3.bf16.msra.mxu0 %v7492_v51 }
 0x6c5   : > { %v1238_v30 = vpack.c.bf16 %v1227_v50, %v1222_v53  ;;  %v6344_v47 = vpop.f32.mrb[29].mxu1  ;;  %6804 = vmatmul.mubr.msk.f32.gmra.mrb[134].mxu1 %vm1004_vm13, %v5719_v6  ;;  %7171 = vmatprep.subr.bf16.mxu0 %v9796_v17 }
 0x6c6   : > { %7260 = vmatpush3.bf16.msra.mxu1 %v8183_v26  ;;  %6806 = vmatprep.mubr.msk.f32.mxu1 %vm7796_vm4, %v9794_v20 }
 0x6c7   : > { %6356 = vmatprep.mubr.msk.bf16.mxu0 %vm685_vm5, %v1238_v30  ;;  %6854 = vmatprep.subr.mxu1 %v9794_v20 }
 0x6c8   : > { %v1232_v45 = vpop.f32.mrb[30].mxu1 }
 0x6c9   : > { %v1239_v61 = vpack.c.bf16 %v1232_v45, %v1232_v45  ;;  %v6347_v0 = vpop.f32.mrb[31].mxu1  ;;  %6807 = vmatmul.mubr.msk.f32.gmra.mrb[136].mxu1 %vm1004_vm13, %v5720_v10 }
 0x6ca   : > { %6855 = vmatpush3.msk.msra.mxu1 %vm929_vm12, %v8188_v4  ;;  %6809 = vmatprep.mubr.msk.f32.mxu1 %vm7796_vm4, %v9794_v20 }
 0x6cb   : > { %6357 = vmatmul.mubr.msk.bf16.gmra.mrb[12].mxu0 %vm685_vm5, %v1239_v61  ;;  %7270 = vmatprep.subr.bf16.mxu1 %v9796_v17  ;;  %v7495_v61 = vld [vmem:[#allocation7 + $0x10] sm:$0xff]  }
 0x6cc   : > { %6364 = vmatprep.mubr.msk.bf16.mxu0 %vm685_vm5, %v1129_v60  ;;  %v8693_v2 = vpop.f32.mrb[32].mxu1  ;;  %v8723_v60 = vld [vmem:[%s9767_s6 + $0x150] sm:$0xff] }
 0x6cd   : > { %6810 = vmatmul.mubr.msk.f32.gmra.mrb[138].mxu1 %vm1004_vm13, %v5721_v15  ;;  %v6388_v28 = vpop.f32.mrb[33].mxu1  ;;  %9826 = vst [vmem:[#allocation26_spill] sm:$0xff] %v8723_v60  ;;  %v7494_v15 = vld [vmem:[#allocation4 + $0x18] sm:$0xff]  }
 0x6ce   : > { %6812 = vmatprep.mubr.msk.f32.mxu1 %vm7796_vm4, %v9794_v20 }
 0x6d0   : > { %v8698_v31 = vpop.f32.mrb[34].mxu1 }
 0x6d1   : > { %6813 = vmatmul.mubr.msk.f32.gmra.mrb[140].mxu1 %vm1004_vm13, %v5722_v34  ;;  %v1553_v5 = vpack.c.bf16 %v8698_v31, %v8693_v2  ;;  %v6391_v6 = vpop.f32.mrb[35].mxu1  ;;  %v8773_v34 = vld [vmem:[%s9767_s6 + $0x168] sm:$0xff] }
 0x6d2   : > { %6815 = vmatprep.mubr.msk.f32.mxu1 %vm7796_vm4, %v9794_v20  ;;  %9829 = vst [vmem:[#allocation29_spill] sm:$0xff] %v8773_v34  ;;  %v7496_v6 = vld [vmem:[#allocation7 + $0x18] sm:$0xff]  }
 0x6d3   : > { %6365 = vmatmul.mubr.msk.bf16.vlgmr.msra.gmra.mrb[8].mxu0 %vm685_vm5, %v1130_v24 }
 0x6d4   : > { %6368 = vmatprep.mubr.msk.bf16.mxu0 %vm685_vm5, %v1131_v8  ;;  %7173 = vmatpush3.bf16.msra.mxu0 %v8193_v48  ;;  %v8714_v58 = vpop.f32.mrb[36].mxu1 }
 0x6d5   : > { %6816 = vmatmul.mubr.msk.f32.gmra.mrb[142].mxu1 %vm1004_vm13, %v5723_v40  ;;  %7174 = vmatprep.subr.bf16.mxu0 %v9796_v17  ;;  %v6394_v52 = vpop.f32.mrb[37].mxu1 }
 0x6d6   : > { %6856 = vmatprep.mubr.msk.f32.mxu1 %vm7796_vm4, %v9794_v20 }
 0x6d8   : > { %7176 = vmatpush3.bf16.msra.mxu0 %v8205_v7  ;;  %v8726_v63 = vpop.f32.mrb[38].mxu1 }
 0x6d9   : > { %6857 = vmatmul.mubr.msk.f32.vlgmr.msra.gmra.mrb[144].mxu1 %vm1004_vm13, %v8723_v60  ;;  %7177 = vmatprep.subr.bf16.mxu0 %v9796_v17  ;;  %v1554_v24 = vpack.c.bf16 %v8726_v63, %v8714_v58  ;;  %v6397_v42 = vpop.f32.mrb[39].mxu1 }
 0x6da   : > { %7272 = vmatpush3.bf16.msra.mxu1 %v8173_v1  ;;  %6859 = vmatprep.mubr.msk.f32.mxu1 %vm7796_vm4, %v9794_v20  ;;  %v8957_v42 = vld [vmem:[#allocation4 + $0x20] sm:$0xff]  }
 0x6db   : > { %6369 = vmatmul.mubr.msk.bf16.gmra.mrb[16].mxu0 %vm685_vm5, %v1132_v35  ;;  %7273 = vmatprep.subr.bf16.mxu1 %v9796_v17 }
 0x6dc   : > { %7179 = vmatpush3.bf16.msra.mxu0 %v8215_v11  ;;  %6421 = vmatprep.mubr.msk.f32.mxu0 %vm7796_vm4, %v9794_v20  ;;  %v8748_v8 = vpop.f32.mrb[40].mxu1 }
 0x6dd   : > { %6860 = vmatmul.mubr.msk.f32.gmra.mrb[146].mxu1 %vm1004_vm13, %v8741_v39  ;;  %6419 = vmatprep.subr.mxu0 %v9794_v20  ;;  %v6400_v10 = vpop.f32.mrb[41].mxu1 }
 0x6de   : > { %7275 = vmatpush3.bf16.msra.mxu1 %v8179_v3  ;;  %6862 = vmatprep.mubr.msk.f32.mxu1 %vm7796_vm4, %v9794_v20 }
 0x6df   : > { %7276 = vmatprep.subr.bf16.mxu1 %v9796_v17 }
 0x6e0   : > { %6420 = vmatpush3.msk.msra.mxu0 %vm929_vm12, %v8226_v13  ;;  %v1544_v14 = vpop.f32.mrb[42].mxu1 }
 0x6e1   : > { %6863 = vmatmul.mubr.msk.f32.gmra.mrb[148].mxu1 %vm1004_vm13, %v8759_v12  ;;  %6442 = vmatprep.subr.bf16.mxu0 %v7493_v9  ;;  %v1555_v16 = vpack.c.bf16 %v1544_v14, %v8748_v8  ;;  %v6403_v29 = vpop.f32.mrb[43].mxu1 }
 0x6e2   : > { %7278 = vmatpush3.bf16.msra.mxu1 %v8183_v26  ;;  %6865 = vmatprep.mubr.msk.f32.mxu1 %vm7796_vm4, %v9794_v20 }
 0x6e3   : > { %6422 = vmatmul.mubr.msk.f32.vlgmr.msra.gmra.mrb[20].mxu0 %vm1004_vm13, %v8285_v18  ;;  %6948 = vmatprep.subr.mxu1 %v9794_v20  ;;  %v8789_v18 = vld [vmem:[%s9767_s6 + $0x170] sm:$0xff] }
 0x6e4   : > { %6424 = vmatprep.mubr.msk.f32.mxu0 %vm7796_vm4, %v9794_v20  ;;  %6443 = vmatpush3.bf16.msra.mxu0 %v7493_v9  ;;  %v1549_v36 = vpop.f32.mrb[44].mxu1  ;;  %9830 = vst [vmem:[#allocation30_spill] sm:$0xff] %v8789_v18 }
 0x6e5   : > { %6866 = vmatmul.mubr.msk.f32.gmra.mrb[150].mxu1 %vm1004_vm13, %v8773_v34  ;;  %6444 = vmatprep.subr.bf16.mxu0 %v7494_v15  ;;  %v6406_v37 = vpop.f32.mrb[45].mxu1  ;;  %v1556_v40 = vpack.c.bf16 %v1549_v36, %v1549_v36 }
 0x6e6   : > { %6949 = vmatpush3.msk.msra.mxu1 %vm929_vm12, %v8188_v4  ;;  %6868 = vmatprep.mubr.msk.f32.mxu1 %vm7796_vm4, %v9794_v20 }
 0x6e7   : > { %6425 = vmatmul.mubr.msk.f32.gmra.mrb[22].mxu0 %vm1004_vm13, %v8295_v19  ;;  %7279 = vmatprep.subr.bf16.mxu1 %v9796_v17  ;;  %v8816_v19 = vld [vmem:[%s9767_s6 + $0x180] sm:$0x1] }
 0x6e8   : > { %6427 = vmatprep.mubr.msk.f32.mxu0 %vm7796_vm4, %v9794_v20  ;;  %6445 = vmatpush3.bf16.msra.mxu0 %v7494_v15  ;;  %9832 = vst [vmem:[#allocation32_spill] sm:$0xff] %v8816_v19 }
 0x6e9   : > { %6869 = vmatmul.mubr.msk.f32.gmra.mrb[152].mxu1 %vm1004_vm13, %v8789_v18  ;;  %6454 = vmatprep.subr.bf16.mxu0 %v7495_v61 }
 0x6ea   : > { %6871 = vmatprep.mubr.msk.f32.mxu1 %vm7796_vm4, %v9794_v20 }
 0x6eb   : > { %6428 = vmatmul.mubr.msk.f32.gmra.mrb[24].mxu0 %vm1004_vm13, %v8306_v21  ;;  %v5787_v21 = vld [vmem:[%s9767_s6 + $0x188] sm:$0xff] }
 0x6ec   : > { %6430 = vmatprep.mubr.msk.f32.mxu0 %vm7796_vm4, %v9794_v20 }
 0x6ed   : > { %6872 = vmatmul.mubr.msk.f32.gmra.mrb[154].mxu1 %vm1004_vm13, %v8803_v38 }
 0x6ee   : > { %6874 = vmatprep.mubr.msk.f32.mxu1 %vm7796_vm4, %v9794_v20 }
 0x6ef   : > { %6431 = vmatmul.mubr.msk.f32.gmra.mrb[26].mxu0 %vm1004_vm13, %v8317_v22  ;;  %v5788_v22 = vld [vmem:[%s9767_s6 + $0x190] sm:$0xff] }
 0x6f0   : > { %6433 = vmatprep.mubr.msk.f32.mxu0 %vm7796_vm4, %v9794_v20 }
 0x6f1   : > { %6875 = vmatmul.mubr.msk.f32.gmra.mrb[156].mxu1 %vm1004_vm13, %v8816_v19 }
 0x6f2   : > { %6950 = vmatprep.mubr.msk.f32.mxu1 %vm7796_vm4, %v9794_v20 }
 0x6f3   : > { %6434 = vmatmul.mubr.msk.f32.gmra.mrb[28].mxu0 %vm1004_vm13, %v8329_v23  ;;  %v5789_v23 = vld [vmem:[%s9767_s6 + $0x198] sm:$0xff] }
 0x6f4   : > { %6436 = vmatprep.mubr.msk.f32.mxu0 %vm7796_vm4, %v9794_v20 }
 0x6f5   : > { %6951 = vmatmul.mubr.msk.f32.vlgmr.msra.gmra.mrb[158].mxu1 %vm1004_vm13, %v5787_v21 }
 0x6f6   : > { %6953 = vmatprep.mubr.msk.f32.mxu1 %vm7796_vm4, %v9794_v20  ;;  %7281 = vmatpush3.bf16.msra.mxu1 %v8193_v48 }
 0x6f7   : > { %6437 = vmatmul.mubr.msk.f32.gmra.mrb[30].mxu0 %vm1004_vm13, %v8339_v25  ;;  %7282 = vmatprep.subr.bf16.mxu1 %v9796_v17  ;;  %v5790_v25 = vld [vmem:[%s9767_s6 + $0x1a0] sm:$0xff] }
 0x6f8   : > { %6439 = vmatprep.mubr.msk.f32.mxu0 %vm7796_vm4, %v9794_v20 }
 0x6f9   : > { %6954 = vmatmul.mubr.msk.f32.gmra.mrb[160].mxu1 %vm1004_vm13, %v5788_v22 }
 0x6fa   : > { %6956 = vmatprep.mubr.msk.f32.mxu1 %vm7796_vm4, %v9794_v20  ;;  %7284 = vmatpush3.bf16.msra.mxu1 %v8205_v7 }
 0x6fb   : > { %6440 = vmatmul.mubr.msk.f32.gmra.mrb[32].mxu0 %vm1004_vm13, %v8348_v27  ;;  %7285 = vmatprep.subr.bf16.mxu1 %v9796_v17  ;;  %v5791_v27 = vld [vmem:[%s9767_s6 + $0x1a8] sm:$0xff] }
 0x6fc   : > { %6446 = vmatprep.mubr.msk.bf16.mxu0 %vm685_vm5, %v1553_v5 }
 0x6fd   : > { %6957 = vmatmul.mubr.msk.f32.gmra.mrb[162].mxu1 %vm1004_vm13, %v5789_v23 }
 0x6fe   : > { %6959 = vmatprep.mubr.msk.f32.mxu1 %vm7796_vm4, %v9794_v20  ;;  %7287 = vmatpush3.bf16.msra.mxu1 %v8215_v11 }
 0x6ff   : > { %6447 = vmatmul.mubr.msk.bf16.vlgmr.msra.gmra.mrb[8].mxu0 %vm685_vm5, %v1554_v24  ;;  %6983 = vmatprep.subr.mxu1 %v9794_v20 }
 0x700   : > { %6450 = vmatprep.mubr.msk.bf16.mxu0 %vm685_vm5, %v1555_v16  ;;  %6455 = vmatpush3.bf16.msra.mxu0 %v7495_v61 }
 0x701   : > { %6960 = vmatmul.mubr.msk.f32.gmra.mrb[164].mxu1 %vm1004_vm13, %v5790_v25  ;;  %6456 = vmatprep.subr.bf16.mxu0 %v7496_v6 }
 0x702   : > { %6962 = vmatprep.mubr.msk.f32.mxu1 %vm7796_vm4, %v9794_v20  ;;  %6984 = vmatpush3.msk.msra.mxu1 %vm929_vm12, %v8226_v13  ;;  %v5793_v13 = vld [vmem:[%s9767_s6 + $0x1b8] sm:$0x1] }
 0x703   : > { %7288 = vmatprep.subr.bf16.mxu1 %v9796_v17 }
 0x704   : > { %6457 = vmatpush3.bf16.msra.mxu0 %v7496_v6 }
 0x705   : > { %6963 = vmatmul.mubr.msk.f32.gmra.mrb[166].mxu1 %vm1004_vm13, %v5791_v27  ;;  %6536 = vmatprep.subr.bf16.mxu0 %v8957_v42 }
 0x706   : > { %6965 = vmatprep.mubr.msk.f32.mxu1 %vm7796_vm4, %v9794_v20 }
 0x707   : > { %6451 = vmatmul.mubr.msk.bf16.gmra.mrb[36].mxu0 %vm685_vm5, %v1556_v40 }
 0x709   : > { %6966 = vmatmul.mubr.msk.f32.gmra.mrb[168].mxu1 %vm1004_vm13, %v5792_v41 }
 0x70a   : > { %6968 = vmatprep.mubr.msk.f32.mxu1 %vm7796_vm4, %v9794_v20 }
 0x70d   : > { %6969 = vmatmul.mubr.msk.f32.gmra.mrb[170].mxu1 %vm1004_vm13, %v5793_v13 }
 0x70e   : > { %6985 = vmatprep.mubr.msk.f32.mxu1 %vm7796_vm4, %v9794_v20 }
 0x711   : > { %6986 = vmatmul.mubr.msk.f32.vlgmr.msra.gmra.mrb[172].mxu1 %vm1004_vm13, %v5787_v21 }
 0x712   : > { %7290 = vmatpush3.bf16.msra.mxu1 %v8173_v1  ;;  %6988 = vmatprep.mubr.msk.f32.mxu1 %vm7796_vm4, %v9794_v20  ;;  %v8918_v1 = vpop.f32.mrb[46].mxu1 }
 0x713   : > { %7291 = vmatprep.subr.bf16.mxu1 %v9796_v17 }
 0x715   : > { %6989 = vmatmul.mubr.msk.f32.gmra.mrb[174].mxu1 %vm1004_vm13, %v5788_v22 }
 0x716   : > { %7293 = vmatpush3.bf16.msra.mxu1 %v8179_v3  ;;  %6991 = vmatprep.mubr.msk.f32.mxu1 %vm7796_vm4, %v9794_v20  ;;  %v6482_v3 = vpop.f32.mrb[47].mxu1 }
 0x717   : > { %7294 = vmatprep.subr.bf16.mxu1 %v9796_v17 }
 0x719   : > { %6992 = vmatmul.mubr.msk.f32.gmra.mrb[176].mxu1 %vm1004_vm13, %v5789_v23 }
 0x71a   : > { %7296 = vmatpush3.bf16.msra.mxu1 %v8183_v26  ;;  %6994 = vmatprep.mubr.msk.f32.mxu1 %vm7796_vm4, %v9794_v20  ;;  %v8923_v26 = vpop.f32.mrb[48].mxu1 }
 0x71b   : > { %7042 = vmatprep.subr.mxu1 %v9794_v20  ;;  %v6485_v44 = vpop.f32.mrb[49].mxu1 }
 0x71d   : > { %6995 = vmatmul.mubr.msk.f32.gmra.mrb[178].mxu1 %vm1004_vm13, %v5790_v25 }
 0x71e   : > { %7043 = vmatpush3.msk.msra.mxu1 %vm929_vm12, %v8188_v4  ;;  %6997 = vmatprep.mubr.msk.f32.mxu1 %vm7796_vm4, %v9794_v20  ;;  %v8927_v4 = vpop.f32.mrb[50].mxu1 }
 0x71f   : > { %7306 = vmatprep.subr.bf16.mxu1 %v9796_v17  ;;  %v6488_v46 = vpop.f32.mrb[51].mxu1 }
 0x720   : > { %v8932_v49 = vpop.f32.mrb[52].mxu1 }
 0x721   : > { %6998 = vmatmul.mubr.msk.f32.gmra.mrb[180].mxu1 %vm1004_vm13, %v5791_v27  ;;  %v6491_v53 = vpop.f32.mrb[53].mxu1 }
 0x722   : > { %7000 = vmatprep.mubr.msk.f32.mxu1 %vm7796_vm4, %v9794_v20  ;;  %v8939_v54 = vpop.f32.mrb[54].mxu1 }
 0x723   : > { %v6494_v50 = vpop.f32.mrb[55].mxu1 }
 0x724   : > { %v8941_v30 = vpop.f32.mrb[56].mxu1 }
 0x725   : > { %7001 = vmatmul.mubr.msk.f32.gmra.mrb[182].mxu1 %vm1004_vm13, %v5792_v41  ;;  %v6497_v45 = vpop.f32.mrb[57].mxu1 }
 0x726   : > { %7003 = vmatprep.mubr.msk.f32.mxu1 %vm7796_vm4, %v9794_v20  ;;  %v8945_v0 = vpop.f32.mrb[58].mxu1 }
 0x727   : > { %v6500_v2 = vpop.f32.mrb[59].mxu1 }
 0x728   : > { %v8947_v28 = vpop.f32.mrb[60].mxu1 }
 0x729   : > { %7004 = vmatmul.mubr.msk.f32.gmra.mrb[184].mxu1 %vm1004_vm13, %v5793_v13  ;;  %v6517_v31 = vpop.f32.mrb[61].mxu1 }
 0x72a   : > { %7044 = vmatprep.mubr.msk.f32.mxu1 %vm7796_vm4, %v9794_v20  ;;  %v8949_v5 = vpop.f32.mrb[62].mxu1 }
 0x72b   : > { %v6520_v52 = vpop.f32.mrb[63].mxu1 }
 0x72c   : > { %v8953_v63 = vpop.f32.mrb[64].mxu1 }
 0x72d   : > { %v6523_v35 = vpop.f32.mrb[65].mxu1 }
 0x72e   : > { %v8955_v24 = vpop.f32.mrb[66].mxu1 }
 0x72f   : > { %v6526_v9 = vpop.f32.mrb[67].mxu1 }
 0x730   : > { %v8962_v10 = vpop.f32.mrb[68].mxu1 }
 0x731   : > { %v6529_v14 = vpop.f32.mrb[69].mxu1 }
 0x732   : > { %v8964_v15 = vpop.f32.mrb[70].mxu1 }
 0x733   : > { %v6532_v29 = vpop.f32.mrb[71].mxu1 }
 0x734   : > { %v8968_v36 = vpop.f32.mrb[72].mxu1 }
 0x735   : > { %v6535_v37 = vpop.f32.mrb[73].mxu1 }
 0x736   : > { %v8970_v21 = vpop.f32.mrb[74].mxu1 }
 0x737   : > { %v6576_v22 = vpop.f32.mrb[75].mxu1 }
 0x738   : > { %v8972_v23 = vpop.f32.mrb[76].mxu1 }
 0x739   : > { %v6579_v27 = vpop.f32.mrb[77].mxu1 }
 0x73a   : > { %v8976_v40 = vpop.f32.mrb[78].mxu1 }
 0x73b   : > { %v6582_v41 = vpop.f32.mrb[79].mxu1 }
 0x73c   : > { %v8978_v13 = vpop.f32.mrb[80].mxu1 }
 0x73d   : > { %v6585_v44 = vpop.f32.mrb[81].mxu1 }
 0x73e   : > { %v8982_v46 = vpop.f32.mrb[82].mxu1 }
 0x73f   : > { %v6588_v53 = vpop.f32.mrb[83].mxu1 }
 0x740   : > { %v8984_v50 = vpop.f32.mrb[84].mxu1 }
 0x741   : > { %v6591_v61 = vpop.f32.mrb[85].mxu1 }
 0x742   : > { %v8988_v2 = vpop.f32.mrb[86].mxu1 }
 0x743   : > { %v6594_v31 = vpop.f32.mrb[87].mxu1 }
 0x744   : > { %v8990_v6 = vpop.f32.mrb[88].mxu1 }
 0x745   : > { %v6611_v52 = vpop.f32.mrb[89].mxu1 }
 0x746   : > { %v8992_v35 = vpop.f32.mrb[90].mxu1 }
 0x747   : > { %v6614_v14 = vpop.f32.mrb[91].mxu1 }
 0x748   : > { %v8996_v29 = vpop.f32.mrb[92].mxu1 }
 0x749   : > { %v6617_v37 = vpop.f32.mrb[93].mxu1 }
 0x74a   : > { %v8998_v22 = vpop.f32.mrb[94].mxu1 }
 0x74b   : > { %v6620_v41 = vpop.f32.mrb[95].mxu1 }
 0x74c   : > { %v9002_v44 = vpop.f32.mrb[96].mxu1 }
 0x74d   : > { %v6623_v53 = vpop.f32.mrb[97].mxu1 }
 0x750   : > { %v9004_v61 = vpop.f32.mrb[98].mxu1 }
 0x751   : > { %v6626_v52 = vpop.f32.mrb[99].mxu1 }
 0x754   : > { %v9008_v20 = vpop.f32.mrb[100].mxu1 }
 0x755   : > { %v6629_v14 = vpop.f32.mrb[101].mxu1 }
 0x758   : > { %v9010_v3 = vpop.f32.mrb[102].mxu1 }
 0x759   : > { %v6670_v27 = vpop.f32.mrb[103].mxu1 }
 0x75c   : > { %v9012_v41 = vpop.f32.mrb[104].mxu1 }
 0x75d   : > { %v6673_v16 = vpop.f32.mrb[105].mxu1 }
 0x760   : > { %v9016_v52 = vpop.f32.mrb[106].mxu1 }
 0x761   : > { %v6676_v47 = vpop.f32.mrb[107].mxu1 }
 0x79e   : > { %v6358_v9 = vpop.f32.mrb[12].mxu0 }
 0x79f   : > { %v1322_v37 = vpop.f32.mrb[13].mxu0 }
 0x7a0   : > { %v6359_v17 = vpop.f32.mrb[14].mxu0 }
 0x7a1   : > { %v1325_v45 = vpop.f32.mrb[15].mxu0  ;;  %v9018_v17 = vpop.f32.mrb[108].mxu1 }
 0x7a2   : > { %v6679_v19 = vpop.f32.mrb[109].mxu1 }
 0x7a3   : > { %v9022_v38 = vpop.f32.mrb[110].mxu1 }
 0x7a4   : > { %v6682_v53 = vpop.f32.mrb[111].mxu1 }
 0x7ae   : > { %v6370_v25 = vpop.f32.mrb[16].mxu0 }
 0x7af   : > { %v1419_v8 = vadd.f32 %v6370_v25, %v6358_v9  ;;  %v1410_v31 = vpop.f32.mrb[17].mxu0  ;;  %v9024_v25 = vpop.f32.mrb[112].mxu1  ;;  %v7499_v9 = vld [vmem:[#allocation7 + $0x20] sm:$0xff]  }
 0x7b0   : > { %v1411_v58 = vadd.f32 %v1410_v31, %v1322_v37  ;;  %v6371_v14 = vpop.f32.mrb[18].mxu0  ;;  %v6685_v31 = vpop.f32.mrb[113].mxu1 }
 0x7b1   : > { %v1413_v51 = vpop.f32.mrb[19].mxu0  ;;  %v9028_v47 = vpop.f32.mrb[114].mxu1 }
 0x7b2   : > { %v1414_v43 = vadd.f32 %v1413_v51, %v1325_v45  ;;  %v6688_v14 = vpop.f32.mrb[115].mxu1 }
 0x7b6   : > { %v1623_v18 = vpop.f32.mrb[20].mxu0 }
 0x7b7   : > { %v6423_v16 = vpop.f32.mrb[21].mxu0 }
 0x7b8   : > { %v7498_v16 = vld [vmem:[#allocation4 + $0x28] sm:$0xff]  }
 0x7ba   : > { %v1628_v37 = vpop.f32.mrb[22].mxu0 }
 0x7bb   : > { %v1657_v51 = vpack.c.bf16 %v1628_v37, %v1623_v18  ;;  %v6426_v45 = vpop.f32.mrb[23].mxu0 }
 0x7bd   : > { %6458 = vmatprep.mubr.msk.bf16.mxu0 %vm685_vm5, %v1657_v51  ;;  %v9834_v51 = vpack.c.bf16 %v8932_v49, %v8927_v4  ;;  %v1993_v4 = vpack.c.bf16 %v8945_v0, %v8945_v0  ;;  %v9836_v49 = vpack.c.bf16 %v8949_v5, %v8947_v28  ;;  %v7503_v0 = vld [vmem:[#allocation7 + $0x30] sm:$0xff]   ;;  %v2097_v28 = vpack.c.bf16 %v8968_v36, %v8968_v36 }
 0x7be   : > { %v1633_v19 = vpop.f32.mrb[24].mxu0  ;;  %v9839_v5 = vpack.c.bf16 %v8972_v23, %v8970_v21  ;;  %v9844_v36 = vpack.c.bf16 %v8998_v22, %v8996_v29  ;;  %v9845_v21 = vpack.c.bf16 %v9004_v61, %v9002_v44  ;;  %v2534_v23 = vpack.c.bf16 %v9008_v20, %v9008_v20  ;;  %v7506_v20 = vld [vmem:[#allocation4 + $0x48] sm:$0xff]  }
 0x7bf   : > { %v6429_v27 = vpop.f32.mrb[25].mxu0 }
 0x7c2   : > { %v1638_v34 = vpop.f32.mrb[26].mxu0 }
 0x7c3   : > { %v1658_v12 = vpack.c.bf16 %v1638_v34, %v1633_v19  ;;  %v6432_v53 = vpop.f32.mrb[27].mxu0 }
 0x7c5   : > { %6459 = vmatmul.mubr.msk.bf16.vlgmr.msra.gmra.mrb[8].mxu0 %vm685_vm5, %v1658_v12  ;;  %v9833_v12 = vpack.c.bf16 %v8923_v26, %v8918_v1  ;;  %v7501_v1 = vld [vmem:[#allocation4 + $0x30] sm:$0xff]  }
 0x7c6   : > { %v1643_v39 = vpop.f32.mrb[28].mxu0  ;;  %6537 = vmatpush3.bf16.msra.mxu0 %v8957_v42  ;;  %v7500_v42 = vld [vmem:[#allocation7 + $0x28] sm:$0xff]  }
 0x7c7   : > { %v6435_v31 = vpop.f32.mrb[29].mxu0  ;;  %6538 = vmatprep.subr.bf16.mxu0 %v7498_v16 }
 0x7ca   : > { %v1648_v60 = vpop.f32.mrb[30].mxu0  ;;  %6539 = vmatpush3.bf16.msra.mxu0 %v7498_v16 }
 0x7cb   : > { %v1659_v18 = vpack.c.bf16 %v1648_v60, %v1643_v39  ;;  %v6438_v37 = vpop.f32.mrb[31].mxu0  ;;  %6548 = vmatprep.subr.bf16.mxu0 %v7499_v9  ;;  %v9835_v39 = vpack.c.bf16 %v8941_v30, %v8939_v54  ;;  %v7502_v54 = vld [vmem:[#allocation4 + $0x38] sm:$0xff]   ;;  %v9837_v30 = vpack.c.bf16 %v8955_v24, %v8953_v63  ;;  %v9840_v63 = vpack.c.bf16 %v8978_v13, %v8976_v40  ;;  %v7505_v13 = vld [vmem:[#allocation4 + $0x40] sm:$0xff]  }
 0x7cc   : > { %v9841_v24 = vpack.c.bf16 %v8984_v50, %v8982_v46  ;;  %v9846_v40 = vmov 0.0   ;;  %v9110_v46 = vld [vmem:[#allocation2 + $0x30] sm:$0x1] }
 0x7cd   : > { %6462 = vmatprep.mubr.msk.bf16.mxu0 %vm685_vm5, %v1659_v18 }
 0x7ce   : > { %v1653_v27 = vpop.f32.mrb[32].mxu0 }
 0x7cf   : > { %v1660_v14 = vpack.c.bf16 %v1653_v27, %v1653_v27  ;;  %v6441_v34 = vpop.f32.mrb[33].mxu0 }
 0x7d1   : > { %6463 = vmatmul.mubr.msk.bf16.gmra.mrb[40].mxu0 %vm685_vm5, %v1660_v14 }
 0x7d2   : > { %6540 = vmatprep.mubr.msk.bf16.mxu0 %vm685_vm5, %v9833_v12 }
 0x7d9   : > { %6541 = vmatmul.mubr.msk.bf16.vlgmr.msra.gmra.mrb[8].mxu0 %vm685_vm5, %v9834_v51 }
 0x7da   : > { %v6452_v60 = vpop.f32.mrb[36].mxu0  ;;  %6544 = vmatprep.mubr.msk.bf16.mxu0 %vm685_vm5, %v9835_v39  ;;  %6549 = vmatpush3.bf16.msra.mxu0 %v7499_v9 }
 0x7db   : > { %v9047_v45 = vadd.f32 %v6452_v60, %v1419_v8  ;;  %v1740_v19 = vpop.f32.mrb[37].mxu0  ;;  %6550 = vmatprep.subr.bf16.mxu0 %v7500_v42  ;;  %v2430_v8 = vpack.c.bf16 %v8988_v2, %v8988_v2 }
 0x7dc   : > { %v9049_v26 = vadd.f32 %v1740_v19, %v1411_v58  ;;  %v6453_v53 = vpop.f32.mrb[38].mxu0  ;;  %v7504_v58 = vld [vmem:[#allocation7 + $0x38] sm:$0xff]  }
 0x7dd   : > { %v1743_v16 = vpop.f32.mrb[39].mxu0 }
 0x7de   : > { %v9051_v31 = vadd.f32 %v1743_v16, %v1414_v43  ;;  %6551 = vmatpush3.bf16.msra.mxu0 %v7500_v42  ;;  %v9838_v43 = vpack.c.bf16 %v8964_v15, %v8962_v10  ;;  %v9842_v10 = vmov 0.0|0.0   ;;  %v9843_v15 = vpack.c.bf16 %v8992_v35, %v8990_v6 }
 0x7df   : > { %6630 = vmatprep.subr.bf16.mxu0 %v7501_v1 }
 0x7e1   : > { %6545 = vmatmul.mubr.msk.bf16.gmra.mrb[44].mxu0 %vm685_vm5, %v1993_v4 }
 0x7e2   : > { %6552 = vmatprep.mubr.msk.bf16.mxu0 %vm685_vm5, %v9836_v49 }
 0x7e9   : > { %6553 = vmatmul.mubr.msk.bf16.vlgmr.msra.gmra.mrb[8].mxu0 %vm685_vm5, %v9837_v30 }
 0x7ea   : > { %6556 = vmatprep.mubr.msk.bf16.mxu0 %vm685_vm5, %v9838_v43  ;;  %6631 = vmatpush3.bf16.msra.mxu0 %v7501_v1 }
 0x7eb   : > { %6632 = vmatprep.subr.bf16.mxu0 %v7502_v54 }
 0x7ee   : > { %6633 = vmatpush3.bf16.msra.mxu0 %v7502_v54 }
 0x7ef   : > { %6642 = vmatprep.subr.bf16.mxu0 %v7503_v0 }
 0x7f1   : > { %6557 = vmatmul.mubr.msk.bf16.gmra.mrb[48].mxu0 %vm685_vm5, %v2097_v28 }
 0x7f2   : > { %6634 = vmatprep.mubr.msk.bf16.mxu0 %vm685_vm5, %v9839_v5 }
 0x7f9   : > { %6635 = vmatmul.mubr.msk.bf16.vlgmr.msra.gmra.mrb[8].mxu0 %vm685_vm5, %v9840_v63 }
 0x7fa   : > { %6638 = vmatprep.mubr.msk.bf16.mxu0 %vm685_vm5, %v9841_v24  ;;  %6643 = vmatpush3.bf16.msra.mxu0 %v7503_v0 }
 0x7fb   : > { %6644 = vmatprep.subr.bf16.mxu0 %v7504_v58 }
 0x7fe   : > { %6645 = vmatpush3.bf16.msra.mxu0 %v7504_v58 }
 0x7ff   : > { %7225 = vmatprep.subr.bf16.mxu0 %v9842_v10 }
 0x801   : > { %6639 = vmatmul.mubr.msk.bf16.gmra.mrb[52].mxu0 %vm685_vm5, %v2430_v8 }
 0x802   : > { %6646 = vmatprep.mubr.msk.bf16.mxu0 %vm685_vm5, %v9843_v15 }
 0x809   : > { %6647 = vmatmul.mubr.msk.bf16.vlgmr.msra.gmra.mrb[8].mxu0 %vm685_vm5, %v9844_v36 }
 0x80a   : > { %6650 = vmatprep.mubr.msk.bf16.mxu0 %vm685_vm5, %v9845_v21  ;;  %7227 = vmatpush3.bf16.msra.mxu0 %v8193_v48 }
 0x80b   : > { %7228 = vmatprep.subr.bf16.mxu0 %v9842_v10 }
 0x80e   : > { %7230 = vmatpush3.bf16.msra.mxu0 %v8205_v7 }
 0x80f   : > { %7231 = vmatprep.subr.bf16.mxu0 %v9842_v10 }
 0x811   : > { %6651 = vmatmul.mubr.msk.bf16.gmra.mrb[56].mxu0 %vm685_vm5, %v2534_v23 }
 0x812   : > { %7233 = vmatpush3.bf16.msra.mxu0 %v8215_v11  ;;  %6703 = vmatprep.mubr.msk.f32.mxu0 %vm7796_vm4, %v9846_v40 }
 0x813   : > { %6701 = vmatprep.subr.mxu0 %v9846_v40 }
 0x816   : > { %6702 = vmatpush3.msk.msra.mxu0 %vm929_vm12, %v9110_v46 }
 0x817   : > { %6724 = vmatprep.subr.bf16.mxu0 %v7505_v13 }
 0x819   : > { %6704 = vmatmul.mubr.msk.f32.vlgmr.msra.gmra.mrb[34].mxu0 %vm1004_vm13, %v8522_v55  ;;  %v9847_v55 = vpack.c.bf16 %v9012_v41, %v9010_v3  ;;  %v9169_v41 = vld [vmem:[#allocation4 + $0x50] sm:$0xff]  }
 0x81a   : > { %6706 = vmatprep.mubr.msk.f32.mxu0 %vm7796_vm4, %v9846_v40  ;;  %6725 = vmatpush3.bf16.msra.mxu0 %v7505_v13 }
 0x81b   : > { %6726 = vmatprep.subr.bf16.mxu0 %v7506_v20 }
 0x81d   : > { %6707 = vmatmul.mubr.msk.f32.gmra.mrb[60].mxu0 %vm1004_vm13, %v8532_v33  ;;  %v9848_v33 = vpack.c.bf16 %v9018_v17, %v9016_v52 }
 0x81e   : > { %6709 = vmatprep.mubr.msk.f32.mxu0 %vm7796_vm4, %v9846_v40  ;;  %6727 = vmatpush3.bf16.msra.mxu0 %v7506_v20 }
 0x821   : > { %6710 = vmatmul.mubr.msk.f32.gmra.mrb[62].mxu0 %vm1004_vm13, %v8543_v32  ;;  %v9849_v32 = vpack.c.bf16 %v9024_v25, %v9022_v38  ;;  %v7508_v38 = vld [vmem:[#allocation7 + $0x48] sm:$0xff]  }
 0x822   : > { %6712 = vmatprep.mubr.msk.f32.mxu0 %vm7796_vm4, %v9846_v40 }
 0x825   : > { %6713 = vmatmul.mubr.msk.f32.gmra.mrb[64].mxu0 %vm1004_vm13, %v8554_v56  ;;  %v2867_v56 = vpack.c.bf16 %v9028_v47, %v9028_v47 }
 0x826   : > { %6715 = vmatprep.mubr.msk.f32.mxu0 %vm7796_vm4, %v9846_v40 }
 0x829   : > { %6716 = vmatmul.mubr.msk.f32.gmra.mrb[66].mxu0 %vm1004_vm13, %v8566_v57  ;;  %v7507_v57 = vld [vmem:[#allocation7 + $0x40] sm:$0xff]  }
 0x82a   : > { %6718 = vmatprep.mubr.msk.f32.mxu0 %vm7796_vm4, %v9846_v40  ;;  %6736 = vmatprep.subr.bf16.mxu0 %v7507_v57 }
 0x82d   : > { %6719 = vmatmul.mubr.msk.f32.gmra.mrb[68].mxu0 %vm1004_vm13, %v8578_v59  ;;  %v9155_v59 = vpop.f32.mrb[116].mxu1 }
 0x82e   : > { %6721 = vmatprep.mubr.msk.f32.mxu0 %vm7796_vm4, %v9846_v40 }
 0x831   : > { %6722 = vmatmul.mubr.msk.f32.gmra.mrb[70].mxu0 %vm1004_vm13, %v8591_v62  ;;  %v6764_v62 = vpop.f32.mrb[117].mxu1 }
 0x832   : > { %6728 = vmatprep.mubr.msk.bf16.mxu0 %vm685_vm5, %v9847_v55  ;;  %v9157_v3 = vpop.f32.mrb[118].mxu1 }
 0x833   : > { %v3301_v50 = vpack.c.bf16 %v9157_v3, %v9155_v59  ;;  %v6767_v2 = vpop.f32.mrb[119].mxu1 }
 0x834   : > { %v9161_v6 = vpop.f32.mrb[120].mxu1 }
 0x835   : > { %6729 = vmatmul.mubr.msk.bf16.vlgmr.msra.gmra.mrb[8].mxu0 %vm685_vm5, %v9848_v33  ;;  %v6770_v35 = vpop.f32.mrb[121].mxu1 }
 0x836   : > { %6732 = vmatprep.mubr.msk.bf16.mxu0 %vm685_vm5, %v9849_v32  ;;  %6737 = vmatpush3.bf16.msra.mxu0 %v7507_v57  ;;  %v9163_v29 = vpop.f32.mrb[122].mxu1 }
 0x837   : > { %6738 = vmatprep.subr.bf16.mxu0 %v7508_v38  ;;  %v3302_v22 = vpack.c.bf16 %v9163_v29, %v9161_v6  ;;  %v6773_v44 = vpop.f32.mrb[123].mxu1 }
 0x838   : > { %v9167_v61 = vpop.f32.mrb[124].mxu1 }
 0x839   : > { %v6776_v52 = vpop.f32.mrb[125].mxu1 }
 0x83a   : > { %6739 = vmatpush3.bf16.msra.mxu0 %v7508_v38  ;;  %v9172_v17 = vpop.f32.mrb[126].mxu1 }
 0x83b   : > { %6818 = vmatprep.subr.bf16.mxu0 %v9169_v41  ;;  %v3303_v25 = vpack.c.bf16 %v9172_v17, %v9167_v61  ;;  %v6779_v9 = vpop.f32.mrb[127].mxu1  ;;  %v7514_v61 = vld [vmem:[#allocation4 + $0x68] sm:$0xff]  }
 0x83c   : > { %v9176_v47 = vpop.f32.mrb[128].mxu1  ;;  %v9850_v17 = vld [vmem:[#allocation26_spill] sm:$0xff] }
 0x83d   : > { %6733 = vmatmul.mubr.msk.bf16.gmra.mrb[72].mxu0 %vm685_vm5, %v2867_v56  ;;  %v6782_v18 = vpop.f32.mrb[129].mxu1  ;;  %v3304_v6 = vpack.c.bf16 %v9176_v47, %v9176_v47  ;;  %v9852_v47 = vld [vmem:[#allocation28_spill] sm:$0xff] }
 0x83e   : > { %v9178_v37 = vpop.f32.mrb[130].mxu1 }
 0x83f   : > { %v6799_v27 = vpop.f32.mrb[131].mxu1 }
 0x840   : > { %v9180_v14 = vpop.f32.mrb[132].mxu1 }
 0x841   : > { %v3405_v34 = vpack.c.bf16 %v9180_v14, %v9178_v37  ;;  %v6802_v12 = vpop.f32.mrb[133].mxu1  ;;  %v9853_v37 = vld [vmem:[#allocation29_spill] sm:$0xff]  ;;  %v9854_v14 = vld [vmem:[#allocation30_spill] sm:$0xff] }
 0x842   : > { %v9184_v42 = vpop.f32.mrb[134].mxu1 }
 0x843   : > { %v6805_v51 = vpop.f32.mrb[135].mxu1 }
 0x844   : > { %v9186_v60 = vpop.f32.mrb[136].mxu1 }
 0x845   : > { %v3406_v39 = vpack.c.bf16 %v9186_v60, %v9184_v42  ;;  %v6808_v19 = vpop.f32.mrb[137].mxu1  ;;  %v9856_v42 = vld [vmem:[#allocation32_spill] sm:$0xff] }
 0x846   : > { %v9190_v1 = vpop.f32.mrb[138].mxu1 }
 0x847   : > { %v6811_v53 = vpop.f32.mrb[139].mxu1 }
 0x848   : > { %v9192_v16 = vpop.f32.mrb[140].mxu1 }
 0x849   : > { %v3407_v4 = vpack.c.bf16 %v9192_v16, %v9190_v1  ;;  %v6814_v49 = vpop.f32.mrb[141].mxu1 }
 0x84a   : > { %v9196_v54 = vpop.f32.mrb[142].mxu1 }
 0x84b   : > { %v6817_v30 = vpop.f32.mrb[143].mxu1  ;;  %v3408_v29 = vpack.c.bf16 %v9196_v54, %v9196_v54 }
 0x84c   : > { %v9201_v55 = vpop.f32.mrb[144].mxu1 }
 0x84d   : > { %v6858_v33 = vpop.f32.mrb[145].mxu1 }
 0x84e   : > { %v9203_v32 = vpop.f32.mrb[146].mxu1 }
 0x84f   : > { %v6861_v56 = vpop.f32.mrb[147].mxu1 }
 0x850   : > { %v9269_v56 = vld [vmem:[%s9767_s6 + $0x1e8] sm:$0xff] }
 0x8a4   : > { %v6464_v43 = vpop.f32.mrb[40].mxu0 }
 0x8a5   : > { %v1860_v0 = vadd.f32 %v6464_v43, %v9047_v45  ;;  %v1840_v28 = vpop.f32.mrb[41].mxu0 }
 0x8a6   : > { %v1858_v5 = vadd.f32 %v1840_v28, %v9049_v26  ;;  %v6465_v58 = vpop.f32.mrb[42].mxu0  ;;  %v3738_v26 = vpack.c.bf16 %v9203_v32, %v9201_v55  ;;  %v7516_v32 = vld [vmem:[#allocation7 + $0x68] sm:$0xff]  }
 0x8a7   : > { %v1843_v63 = vpop.f32.mrb[43].mxu0 }
 0x8a8   : > { %v1859_v24 = vadd.f32 %v1843_v63, %v9051_v31  ;;  %v9207_v31 = vpop.f32.mrb[148].mxu1  ;;  %v9233_v63 = vld [vmem:[%s9767_s6 + $0x1c8] sm:$0xff] }
 0x8a9   : > { %v6864_v35 = vpop.f32.mrb[149].mxu1 }
 0x8aa   : > { %v9209_v52 = vpop.f32.mrb[150].mxu1  ;;  %v9278_v35 = vld [vmem:[%s9767_s6 + $0x1f0] sm:$0x1] }
 0x8ab   : > { %v3739_v18 = vpack.c.bf16 %v9209_v52, %v9207_v31  ;;  %v6867_v27 = vpop.f32.mrb[151].mxu1 }
 0x8ac   : > { %v9213_v12 = vpop.f32.mrb[152].mxu1 }
 0x8ad   : > { %v6870_v51 = vpop.f32.mrb[153].mxu1 }
 0x8ae   : > { %v9215_v19 = vpop.f32.mrb[154].mxu1 }
 0x8af   : > { %v3740_v53 = vpack.c.bf16 %v9215_v19, %v9213_v12  ;;  %v6873_v49 = vpop.f32.mrb[155].mxu1 }
 0x8b0   : > { %v9219_v30 = vpop.f32.mrb[156].mxu1 }
 0x8b1   : > { %v6876_v43 = vpop.f32.mrb[157].mxu1  ;;  %v3741_v60 = vpack.c.bf16 %v9219_v30, %v9219_v30 }
 0x8b2   : > { %v9377_v1 = vpop.f32.mrb[158].mxu1 }
 0x8b3   : > { %v6952_v16 = vpop.f32.mrb[159].mxu1 }
 0x8b4   : > { %v6546_v8 = vpop.f32.mrb[44].mxu0 }
 0x8b5   : > { %v2197_v15 = vadd.f32 %v6546_v8, %v1860_v0  ;;  %v2177_v36 = vpop.f32.mrb[45].mxu0  ;;  %v9224_v0 = vld [vmem:[%s9767_s6 + $0x1c0] sm:$0xff] }
 0x8b6   : > { %v2195_v21 = vadd.f32 %v2177_v36, %v1858_v5  ;;  %v6547_v23 = vpop.f32.mrb[46].mxu0  ;;  %7045 = vmatmul.mubr.msk.f32.vlgmr.msra.gmra.mrb[186].mxu1 %vm1004_vm13, %v9224_v0 }
 0x8b7   : > { %v2180_v13 = vpop.f32.mrb[47].mxu0  ;;  %7047 = vmatprep.mubr.msk.f32.mxu1 %vm7796_vm4, %v9846_v40  ;;  %v9251_v23 = vld [vmem:[%s9767_s6 + $0x1d8] sm:$0xff] }
 0x8b8   : > { %v2196_v20 = vadd.f32 %v2180_v13, %v1859_v24  ;;  %v9260_v13 = vld [vmem:[%s9767_s6 + $0x1e0] sm:$0xff] }
 0x8ba   : > { %7048 = vmatmul.mubr.msk.f32.gmra.mrb[188].mxu1 %vm1004_vm13, %v9233_v63 }
 0x8bb   : > { %7050 = vmatprep.mubr.msk.f32.mxu1 %vm7796_vm4, %v9846_v40 }
 0x8c4   : > { %v6558_v45 = vpop.f32.mrb[48].mxu0 }
 0x8c5   : > { %v2297_v57 = vadd.f32 %v6558_v45, %v2197_v15  ;;  %v2277_v62 = vpop.f32.mrb[49].mxu0 }
 0x8c6   : > { %v2295_v2 = vadd.f32 %v2277_v62, %v2195_v21  ;;  %v6559_v38 = vpop.f32.mrb[50].mxu0  ;;  %v9242_v21 = vld [vmem:[%s9767_s6 + $0x1d0] sm:$0xff] }
 0x8c7   : > { %v2280_v44 = vpop.f32.mrb[51].mxu0  ;;  %7051 = vmatmul.mubr.msk.f32.gmra.mrb[190].mxu1 %vm1004_vm13, %v9242_v21 }
 0x8c8   : > { %v2296_v9 = vadd.f32 %v2280_v44, %v2196_v20  ;;  %7053 = vmatprep.mubr.msk.f32.mxu1 %vm7796_vm4, %v9846_v40 }
 0x8cb   : > { %7054 = vmatmul.mubr.msk.f32.gmra.mrb[192].mxu1 %vm1004_vm13, %v9251_v23 }
 0x8cc   : > { %7056 = vmatprep.mubr.msk.f32.mxu1 %vm7796_vm4, %v9846_v40 }
 0x8cf   : > { %7057 = vmatmul.mubr.msk.f32.gmra.mrb[194].mxu1 %vm1004_vm13, %v9260_v13 }
 0x8d0   : > { %7059 = vmatprep.mubr.msk.f32.mxu1 %vm7796_vm4, %v9846_v40 }
 0x8d3   : > { %7060 = vmatmul.mubr.msk.f32.gmra.mrb[196].mxu1 %vm1004_vm13, %v9269_v56 }
 0x8d4   : > { %v6640_v28 = vpop.f32.mrb[52].mxu0  ;;  %7062 = vmatprep.mubr.msk.f32.mxu1 %vm7796_vm4, %v9846_v40 }
 0x8d5   : > { %v2634_v5 = vadd.f32 %v6640_v28, %v2297_v57  ;;  %v2614_v58 = vpop.f32.mrb[53].mxu0 }
 0x8d6   : > { %v2632_v24 = vadd.f32 %v2614_v58, %v2295_v2  ;;  %v6641_v8 = vpop.f32.mrb[54].mxu0 }
 0x8d7   : > { %v2617_v15 = vpop.f32.mrb[55].mxu0  ;;  %7063 = vmatmul.mubr.msk.f32.gmra.mrb[198].mxu1 %vm1004_vm13, %v9278_v35  ;;  %v7510_v8 = vld [vmem:[#allocation4 + $0x58] sm:$0xff]  }
 0x8d8   : > { %v2633_v36 = vadd.f32 %v2617_v15, %v2296_v9  ;;  %7132 = vmatprep.mubr.msk.f32.mxu1 %vm7796_vm4, %v9846_v40 }
 0x8e4   : > { %v6652_v20 = vpop.f32.mrb[56].mxu0 }
 0x8e5   : > { %v2734_v33 = vadd.f32 %v6652_v20, %v2634_v5  ;;  %v2714_v45 = vpop.f32.mrb[57].mxu0  ;;  %v7511_v20 = vld [vmem:[#allocation7 + $0x50] sm:$0xff]  }
 0x8e6   : > { %v2732_v57 = vadd.f32 %v2714_v45, %v2632_v24  ;;  %v6653_v62 = vpop.f32.mrb[58].mxu0 }
 0x8e7   : > { %v2717_v2 = vpop.f32.mrb[59].mxu0 }
 0x8e8   : > { %v2733_v38 = vadd.f32 %v2717_v2, %v2633_v36 }
 0x8ec   : > { %v2934_v44 = vpop.f32.mrb[34].mxu0 }
 0x8ed   : > { %v6705_v9 = vpop.f32.mrb[35].mxu0 }
 0x8f0   : > { %v2939_v27 = vpop.f32.mrb[60].mxu0 }
 0x8f1   : > { %v2968_v51 = vpack.c.bf16 %v2939_v27, %v2934_v44  ;;  %v6708_v49 = vpop.f32.mrb[61].mxu0 }
 0x8f3   : > { %6740 = vmatprep.mubr.msk.bf16.mxu0 %vm685_vm5, %v2968_v51 }
 0x8f4   : > { %v2944_v43 = vpop.f32.mrb[62].mxu0 }
 0x8f5   : > { %v6711_v28 = vpop.f32.mrb[63].mxu0 }
 0x8f8   : > { %v2949_v5 = vpop.f32.mrb[64].mxu0 }
 0x8f9   : > { %v2969_v58 = vpack.c.bf16 %v2949_v5, %v2944_v43  ;;  %v6714_v24 = vpop.f32.mrb[65].mxu0 }
 0x8fb   : > { %6741 = vmatmul.mubr.msk.bf16.vlgmr.msra.gmra.mrb[8].mxu0 %vm685_vm5, %v2969_v58 }
 0x8fc   : > { %v2954_v15 = vpop.f32.mrb[66].mxu0  ;;  %6819 = vmatpush3.bf16.msra.mxu0 %v9169_v41  ;;  %v7512_v41 = vld [vmem:[#allocation7 + $0x58] sm:$0xff]  }
 0x8fd   : > { %v6717_v36 = vpop.f32.mrb[67].mxu0  ;;  %6820 = vmatprep.subr.bf16.mxu0 %v7510_v8 }
 0x900   : > { %v2959_v45 = vpop.f32.mrb[68].mxu0  ;;  %6821 = vmatpush3.bf16.msra.mxu0 %v7510_v8 }
 0x901   : > { %v2970_v62 = vpack.c.bf16 %v2959_v45, %v2954_v15  ;;  %v6720_v2 = vpop.f32.mrb[69].mxu0  ;;  %6830 = vmatprep.subr.bf16.mxu0 %v7511_v20 }
 0x903   : > { %6744 = vmatprep.mubr.msk.bf16.mxu0 %vm685_vm5, %v2970_v62 }
 0x904   : > { %v2964_v44 = vpop.f32.mrb[70].mxu0 }
 0x905   : > { %v2971_v9 = vpack.c.bf16 %v2964_v44, %v2964_v44  ;;  %v6723_v27 = vpop.f32.mrb[71].mxu0 }
 0x907   : > { %6745 = vmatmul.mubr.msk.bf16.gmra.mrb[76].mxu0 %vm685_vm5, %v2971_v9 }
 0x908   : > { %6822 = vmatprep.mubr.msk.bf16.mxu0 %vm685_vm5, %v3301_v50 }
 0x90f   : > { %6823 = vmatmul.mubr.msk.bf16.vlgmr.msra.gmra.mrb[8].mxu0 %vm685_vm5, %v3302_v22  ;;  %v7513_v22 = vld [vmem:[#allocation4 + $0x60] sm:$0xff]  }
 0x910   : > { %v6734_v51 = vpop.f32.mrb[72].mxu0  ;;  %6826 = vmatprep.mubr.msk.bf16.mxu0 %vm685_vm5, %v3303_v25  ;;  %6831 = vmatpush3.bf16.msra.mxu0 %v7511_v20  ;;  %v9851_v25 = vld [vmem:[#allocation27_spill] sm:$0xff] }
 0x911   : > { %v9301_v49 = vadd.f32 %v6734_v51, %v2734_v33  ;;  %v3051_v43 = vpop.f32.mrb[73].mxu0  ;;  %6832 = vmatprep.subr.bf16.mxu0 %v7512_v41 }
 0x912   : > { %v9303_v59 = vadd.f32 %v3051_v43, %v2732_v57  ;;  %v6735_v3 = vpop.f32.mrb[74].mxu0 }
 0x913   : > { %v3054_v50 = vpop.f32.mrb[75].mxu0 }
 0x914   : > { %v9305_v28 = vadd.f32 %v3054_v50, %v2733_v38  ;;  %6833 = vmatpush3.bf16.msra.mxu0 %v7512_v41 }
 0x915   : > { %7261 = vmatprep.subr.bf16.mxu0 %v9842_v10 }
 0x917   : > { %6827 = vmatmul.mubr.msk.bf16.gmra.mrb[80].mxu0 %vm685_vm5, %v3304_v6 }
 0x918   : > { %6834 = vmatprep.mubr.msk.bf16.mxu0 %vm685_vm5, %v3405_v34  ;;  %v9855_v34 = vld [vmem:[#allocation31_spill] sm:$0xff] }
 0x91f   : > { %6835 = vmatmul.mubr.msk.bf16.vlgmr.msra.gmra.mrb[8].mxu0 %vm685_vm5, %v3406_v39  ;;  %v7515_v39 = vld [vmem:[#allocation7 + $0x60] sm:$0xff]  }
 0x920   : > { %6838 = vmatprep.mubr.msk.bf16.mxu0 %vm685_vm5, %v3407_v4  ;;  %7263 = vmatpush3.bf16.msra.mxu0 %v8193_v48  ;;  %v9379_v4 = vpop.f32.mrb[160].mxu1 }
 0x921   : > { %7264 = vmatprep.subr.bf16.mxu0 %v9842_v10  ;;  %v4175_v54 = vpack.c.bf16 %v9379_v4, %v9377_v1  ;;  %v6955_v55 = vpop.f32.mrb[161].mxu1 }
 0x924   : > { %7266 = vmatpush3.bf16.msra.mxu0 %v8205_v7 }
 0x925   : > { %7267 = vmatprep.subr.bf16.mxu0 %v9842_v10 }
 0x927   : > { %6839 = vmatmul.mubr.msk.bf16.gmra.mrb[84].mxu0 %vm685_vm5, %v3408_v29 }
 0x928   : > { %7269 = vmatpush3.bf16.msra.mxu0 %v8215_v11  ;;  %6891 = vmatprep.mubr.msk.f32.mxu0 %vm7796_vm4, %v9846_v40 }
 0x929   : > { %6889 = vmatprep.subr.mxu0 %v9846_v40 }
 0x92c   : > { %6890 = vmatpush3.msk.msra.mxu0 %vm929_vm12, %v9110_v46 }
 0x92d   : > { %6912 = vmatprep.subr.bf16.mxu0 %v7513_v22 }
 0x92f   : > { %6892 = vmatmul.mubr.msk.f32.vlgmr.msra.gmra.mrb[88].mxu0 %vm1004_vm13, %v9850_v17 }
 0x930   : > { %6894 = vmatprep.mubr.msk.f32.mxu0 %vm7796_vm4, %v9846_v40  ;;  %6913 = vmatpush3.bf16.msra.mxu0 %v7513_v22 }
 0x931   : > { %6914 = vmatprep.subr.bf16.mxu0 %v7514_v61 }
 0x933   : > { %6895 = vmatmul.mubr.msk.f32.gmra.mrb[90].mxu0 %vm1004_vm13, %v9851_v25 }
 0x934   : > { %6897 = vmatprep.mubr.msk.f32.mxu0 %vm7796_vm4, %v9846_v40  ;;  %6915 = vmatpush3.bf16.msra.mxu0 %v7514_v61 }
 0x935   : > { %6924 = vmatprep.subr.bf16.mxu0 %v7515_v39 }
 0x937   : > { %6898 = vmatmul.mubr.msk.f32.gmra.mrb[92].mxu0 %vm1004_vm13, %v9852_v47 }
 0x938   : > { %6900 = vmatprep.mubr.msk.f32.mxu0 %vm7796_vm4, %v9846_v40 }
 0x93b   : > { %6901 = vmatmul.mubr.msk.f32.gmra.mrb[94].mxu0 %vm1004_vm13, %v9853_v37 }
 0x93c   : > { %6903 = vmatprep.mubr.msk.f32.mxu0 %vm7796_vm4, %v9846_v40 }
 0x93f   : > { %6904 = vmatmul.mubr.msk.f32.gmra.mrb[96].mxu0 %vm1004_vm13, %v9854_v14 }
 0x940   : > { %6906 = vmatprep.mubr.msk.f32.mxu0 %vm7796_vm4, %v9846_v40 }
 0x943   : > { %6907 = vmatmul.mubr.msk.f32.gmra.mrb[98].mxu0 %vm1004_vm13, %v9855_v34 }
 0x944   : > { %6909 = vmatprep.mubr.msk.f32.mxu0 %vm7796_vm4, %v9846_v40 }
 0x947   : > { %6910 = vmatmul.mubr.msk.f32.gmra.mrb[100].mxu0 %vm1004_vm13, %v9856_v42 }
 0x948   : > { %6916 = vmatprep.mubr.msk.bf16.mxu0 %vm685_vm5, %v3738_v26  ;;  %v9383_v26 = vpop.f32.mrb[162].mxu1 }
 0x949   : > { %v6958_v31 = vpop.f32.mrb[163].mxu1 }
 0x94a   : > { %v9385_v52 = vpop.f32.mrb[164].mxu1 }
 0x94b   : > { %6917 = vmatmul.mubr.msk.bf16.vlgmr.msra.gmra.mrb[8].mxu0 %vm685_vm5, %v3739_v18  ;;  %v4176_v18 = vpack.c.bf16 %v9385_v52, %v9383_v26  ;;  %v6961_v12 = vpop.f32.mrb[165].mxu1 }
 0x94c   : > { %6920 = vmatprep.mubr.msk.bf16.mxu0 %vm685_vm5, %v3740_v53  ;;  %6925 = vmatpush3.bf16.msra.mxu0 %v7515_v39  ;;  %v9389_v19 = vpop.f32.mrb[166].mxu1  ;;  %v9391_v53 = vld [vmem:[#allocation4 + $0x70] sm:$0xff]  }
 0x94d   : > { %6926 = vmatprep.subr.bf16.mxu0 %v7516_v32  ;;  %v6964_v30 = vpop.f32.mrb[167].mxu1 }
 0x94e   : > { %v9394_v33 = vpop.f32.mrb[168].mxu1 }
 0x94f   : > { %v4177_v57 = vpack.c.bf16 %v9394_v33, %v9389_v19  ;;  %v6967_v38 = vpop.f32.mrb[169].mxu1 }
 0x950   : > { %6927 = vmatpush3.bf16.msra.mxu0 %v7516_v32  ;;  %v9398_v5 = vpop.f32.mrb[170].mxu1 }
 0x951   : > { %7006 = vmatprep.subr.bf16.mxu0 %v9391_v53  ;;  %v6970_v58 = vpop.f32.mrb[171].mxu1  ;;  %v4178_v26 = vpack.c.bf16 %v9398_v5, %v9398_v5 }
 0x952   : > { %v9400_v24 = vpop.f32.mrb[172].mxu1 }
 0x953   : > { %6921 = vmatmul.mubr.msk.bf16.gmra.mrb[104].mxu0 %vm685_vm5, %v3741_v60  ;;  %v6987_v8 = vpop.f32.mrb[173].mxu1 }
 0x954   : > { %v9402_v15 = vpop.f32.mrb[174].mxu1 }
 0x955   : > { %v4279_v36 = vpack.c.bf16 %v9402_v15, %v9400_v24  ;;  %v6990_v20 = vpop.f32.mrb[175].mxu1 }
 0x956   : > { %v9406_v45 = vpop.f32.mrb[176].mxu1 }
 0x957   : > { %v6993_v62 = vpop.f32.mrb[177].mxu1 }
 0x958   : > { %v9408_v2 = vpop.f32.mrb[178].mxu1 }
 0x959   : > { %v4280_v44 = vpack.c.bf16 %v9408_v2, %v9406_v45  ;;  %v6996_v9 = vpop.f32.mrb[179].mxu1 }
 0x95a   : > { %v9412_v27 = vpop.f32.mrb[180].mxu1 }
 0x95b   : > { %v6999_v41 = vpop.f32.mrb[181].mxu1 }
 0x95c   : > { %v9414_v51 = vpop.f32.mrb[182].mxu1 }
 0x95d   : > { %v4281_v43 = vpack.c.bf16 %v9414_v51, %v9412_v27  ;;  %v7002_v3 = vpop.f32.mrb[183].mxu1 }
 0x95e   : > { %v9418_v50 = vpop.f32.mrb[184].mxu1 }
 0x95f   : > { %v7005_v6 = vpop.f32.mrb[185].mxu1  ;;  %v4282_v52 = vpack.c.bf16 %v9418_v50, %v9418_v50 }
 0x989   : > { %v9420_v29 = vpop.f32.mrb[186].mxu1 }
 0x98a   : > { %v7046_v22 = vpop.f32.mrb[187].mxu1 }
 0x98d   : > { %v9422_v61 = vpop.f32.mrb[188].mxu1 }
 0x98e   : > { %v7049_v47 = vpop.f32.mrb[189].mxu1 }
 0x99a   : > { %v9427_v34 = vpop.f32.mrb[190].mxu1 }
 0x99b   : > { %v7052_v39 = vpop.f32.mrb[191].mxu1 }
 0x99e   : > { %v9430_v55 = vpop.f32.mrb[192].mxu1 }
 0x99f   : > { %v7055_v12 = vpop.f32.mrb[193].mxu1 }
 0x9a2   : > { %v9435_v30 = vpop.f32.mrb[194].mxu1 }
 0x9a3   : > { %v7058_v38 = vpop.f32.mrb[195].mxu1 }
 0x9da   : > { %v6746_v17 = vpop.f32.mrb[76].mxu0 }
 0x9db   : > { %v3171_v37 = vadd.f32 %v6746_v17, %v9301_v49  ;;  %v3151_v14 = vpop.f32.mrb[77].mxu0  ;;  %v9437_v49 = vpop.f32.mrb[196].mxu1 }
 0x9dc   : > { %v3169_v42 = vadd.f32 %v3151_v14, %v9303_v59  ;;  %v6747_v60 = vpop.f32.mrb[78].mxu0  ;;  %v7061_v59 = vpop.f32.mrb[197].mxu1 }
 0x9dd   : > { %v3154_v16 = vpop.f32.mrb[79].mxu0  ;;  %v9441_v8 = vpop.f32.mrb[198].mxu1 }
 0x9de   : > { %v3170_v32 = vadd.f32 %v3154_v16, %v9305_v28  ;;  %v7064_v20 = vpop.f32.mrb[199].mxu1 }
 0x9ea   : > { %v6828_v62 = vpop.f32.mrb[80].mxu0 }
 0x9eb   : > { %v3508_v9 = vadd.f32 %v6828_v62, %v3171_v37  ;;  %v3488_v41 = vpop.f32.mrb[81].mxu0 }
 0x9ec   : > { %v3506_v28 = vadd.f32 %v3488_v41, %v3169_v42  ;;  %v6829_v3 = vpop.f32.mrb[82].mxu0 }
 0x9ed   : > { %v3491_v6 = vpop.f32.mrb[83].mxu0  ;;  %v7519_v3 = vld [vmem:[#allocation7 + $0x70] sm:$0xff]  }
 0x9ee   : > { %v3507_v22 = vadd.f32 %v3491_v6, %v3170_v32  ;;  %v7518_v32 = vld [vmem:[#allocation4 + $0x78] sm:$0xff]  }
 0x9fa   : > { %v6840_v17 = vpop.f32.mrb[84].mxu0 }
 0x9fb   : > { %v3608_v47 = vadd.f32 %v6840_v17, %v3508_v9  ;;  %v3588_v14 = vpop.f32.mrb[85].mxu0 }
 0x9fc   : > { %v3606_v60 = vadd.f32 %v3588_v14, %v3506_v28  ;;  %v6841_v39 = vpop.f32.mrb[86].mxu0 }
 0x9fd   : > { %v3591_v16 = vpop.f32.mrb[87].mxu0 }
 0x9fe   : > { %v3607_v12 = vadd.f32 %v3591_v16, %v3507_v22 }
 0xa02   : > { %v3808_v38 = vpop.f32.mrb[88].mxu0 }
 0xa03   : > { %v6893_v58 = vpop.f32.mrb[89].mxu0 }
 0xa06   : > { %v3813_v59 = vpop.f32.mrb[90].mxu0 }
 0xa07   : > { %v3842_v31 = vpack.c.bf16 %v3813_v59, %v3808_v38  ;;  %v6896_v25 = vpop.f32.mrb[91].mxu0 }
 0xa09   : > { %6928 = vmatprep.mubr.msk.bf16.mxu0 %vm685_vm5, %v3842_v31 }
 0xa0a   : > { %v3818_v37 = vpop.f32.mrb[92].mxu0 }
 0xa0b   : > { %v6899_v20 = vpop.f32.mrb[93].mxu0 }
 0xa0e   : > { %v3823_v42 = vpop.f32.mrb[94].mxu0 }
 0xa0f   : > { %v3843_v62 = vpack.c.bf16 %v3823_v42, %v3818_v37  ;;  %v6902_v41 = vpop.f32.mrb[95].mxu0 }
 0xa11   : > { %6929 = vmatmul.mubr.msk.bf16.vlgmr.msra.gmra.mrb[8].mxu0 %vm685_vm5, %v3843_v62 }
 0xa12   : > { %v3828_v9 = vpop.f32.mrb[96].mxu0  ;;  %7007 = vmatpush3.bf16.msra.mxu0 %v9391_v53  ;;  %v7520_v53 = vld [vmem:[#allocation7 + $0x78] sm:$0xff]  }
 0xa13   : > { %v6905_v28 = vpop.f32.mrb[97].mxu0  ;;  %7008 = vmatprep.subr.bf16.mxu0 %v7518_v32 }
 0xa16   : > { %v3833_v58 = vpop.f32.mrb[98].mxu0  ;;  %7009 = vmatpush3.bf16.msra.mxu0 %v7518_v32 }
 0xa17   : > { %v3844_v6 = vpack.c.bf16 %v3833_v58, %v3828_v9  ;;  %v6908_v25 = vpop.f32.mrb[99].mxu0  ;;  %7018 = vmatprep.subr.bf16.mxu0 %v7519_v3 }
 0xa19   : > { %6932 = vmatprep.mubr.msk.bf16.mxu0 %vm685_vm5, %v3844_v6 }
 0xa1a   : > { %v3838_v31 = vpop.f32.mrb[100].mxu0 }
 0xa1b   : > { %v3845_v22 = vpack.c.bf16 %v3838_v31, %v3838_v31  ;;  %v6911_v17 = vpop.f32.mrb[101].mxu0 }
 0xa1d   : > { %6933 = vmatmul.mubr.msk.bf16.gmra.mrb[108].mxu0 %vm685_vm5, %v3845_v22 }
 0xa1e   : > { %7010 = vmatprep.mubr.msk.bf16.mxu0 %vm685_vm5, %v4175_v54 }
 0xa25   : > { %7011 = vmatmul.mubr.msk.bf16.vlgmr.msra.gmra.mrb[8].mxu0 %vm685_vm5, %v4176_v18  ;;  %v7521_v18 = vld [vmem:[#allocation4 + $0x80] sm:$0xff]  }
 0xa26   : > { %v6922_v14 = vpop.f32.mrb[104].mxu0  ;;  %7014 = vmatprep.mubr.msk.bf16.mxu0 %vm685_vm5, %v4177_v57  ;;  %7019 = vmatpush3.bf16.msra.mxu0 %v7519_v3 }
 0xa27   : > { %v3945_v39 = vadd.f32 %v6922_v14, %v3608_v47  ;;  %v3925_v16 = vpop.f32.mrb[105].mxu0  ;;  %7020 = vmatprep.subr.bf16.mxu0 %v7520_v53  ;;  %v5857_v14 = vld [vmem:[%s9770_s9] ss:$0 sm:$0xff] }
 0xa28   : > { %v3943_v38 = vadd.f32 %v3925_v16, %v3606_v60  ;;  %v6923_v1 = vpop.f32.mrb[106].mxu0 }
 0xa29   : > { %v3928_v4 = vpop.f32.mrb[107].mxu0 }
 0xa2a   : > { %v3944_v54 = vadd.f32 %v3928_v4, %v3607_v12  ;;  %7021 = vmatpush3.bf16.msra.mxu0 %v7520_v53 }
 0xa2b   : > { %7297 = vmatprep.subr.bf16.mxu0 %v9842_v10 }
 0xa2d   : > { %7015 = vmatmul.mubr.msk.bf16.gmra.mrb[112].mxu0 %vm685_vm5, %v4178_v26 }
 0xa2e   : > { %7022 = vmatprep.mubr.msk.bf16.mxu0 %vm685_vm5, %v4279_v36 }
 0xa35   : > { %7023 = vmatmul.mubr.msk.bf16.vlgmr.msra.gmra.mrb[8].mxu0 %vm685_vm5, %v4280_v44 }
 0xa36   : > { %7026 = vmatprep.mubr.msk.bf16.mxu0 %vm685_vm5, %v4281_v43  ;;  %7299 = vmatpush3.bf16.msra.mxu0 %v8193_v48  ;;  %v7522_v48 = vld [vmem:[#allocation4 + $0x88] sm:$0xff]  }
 0xa37   : > { %7300 = vmatprep.subr.bf16.mxu0 %v9842_v10 }
 0xa3a   : > { %7302 = vmatpush3.bf16.msra.mxu0 %v8205_v7  ;;  %v9857_v7 = vpack.c.bf16 %v9422_v61, %v9420_v29 }
 0xa3b   : > { %7303 = vmatprep.subr.bf16.mxu0 %v9842_v10 }
 0xa3d   : > { %7027 = vmatmul.mubr.msk.bf16.gmra.mrb[116].mxu0 %vm685_vm5, %v4282_v52 }
 0xa3e   : > { %7305 = vmatpush3.bf16.msra.mxu0 %v8215_v11  ;;  %7079 = vmatprep.mubr.msk.f32.mxu0 %vm7796_vm4, %v9846_v40  ;;  %v9858_v11 = vpack.c.bf16 %v9430_v55, %v9427_v34 }
 0xa3f   : > { %7077 = vmatprep.subr.mxu0 %v9846_v40 }
 0xa42   : > { %7078 = vmatpush3.msk.msra.mxu0 %vm929_vm12, %v9110_v46  ;;  %v9859_v46 = vpack.c.bf16 %v9437_v49, %v9435_v30 }
 0xa43   : > { %7100 = vmatprep.subr.bf16.mxu0 %v7521_v18 }
 0xa45   : > { %7080 = vmatmul.mubr.msk.f32.vlgmr.msra.gmra.mrb[102].mxu0 %vm1004_vm13, %v9224_v0  ;;  %v7523_v0 = vld [vmem:[#allocation7 + $0x80] sm:$0xff]  }
 0xa46   : > { %7082 = vmatprep.mubr.msk.f32.mxu0 %vm7796_vm4, %v9846_v40  ;;  %7101 = vmatpush3.bf16.msra.mxu0 %v7521_v18 }
 0xa47   : > { %7102 = vmatprep.subr.bf16.mxu0 %v7522_v48 }
 0xa49   : > { %7083 = vmatmul.mubr.msk.f32.gmra.mrb[120].mxu0 %vm1004_vm13, %v9233_v63  ;;  %v7524_v63 = vld [vmem:[#allocation7 + $0x88] sm:$0xff]  }
 0xa4a   : > { %7085 = vmatprep.mubr.msk.f32.mxu0 %vm7796_vm4, %v9846_v40  ;;  %7103 = vmatpush3.bf16.msra.mxu0 %v7522_v48 }
 0xa4b   : > { %7112 = vmatprep.subr.bf16.mxu0 %v7523_v0 }
 0xa4d   : > { %7086 = vmatmul.mubr.msk.f32.gmra.mrb[122].mxu0 %vm1004_vm13, %v9242_v21 }
 0xa4e   : > { %7088 = vmatprep.mubr.msk.f32.mxu0 %vm7796_vm4, %v9846_v40 }
 0xa51   : > { %7089 = vmatmul.mubr.msk.f32.gmra.mrb[124].mxu0 %vm1004_vm13, %v9251_v23 }
 0xa52   : > { %7091 = vmatprep.mubr.msk.f32.mxu0 %vm7796_vm4, %v9846_v40 }
 0xa55   : > { %7092 = vmatmul.mubr.msk.f32.gmra.mrb[126].mxu0 %vm1004_vm13, %v9260_v13 }
 0xa56   : > { %7094 = vmatprep.mubr.msk.f32.mxu0 %vm7796_vm4, %v9846_v40 }
 0xa59   : > { %7095 = vmatmul.mubr.msk.f32.gmra.mrb[128].mxu0 %vm1004_vm13, %v9269_v56 }
 0xa5a   : > { %7097 = vmatprep.mubr.msk.f32.mxu0 %vm7796_vm4, %v9846_v40  ;;  %v4615_v40 = vpack.c.bf16 %v9441_v8, %v9441_v8 }
 0xa5d   : > { %7098 = vmatmul.mubr.msk.f32.gmra.mrb[130].mxu0 %vm1004_vm13, %v9278_v35 }
 0xa5e   : > { %7104 = vmatprep.mubr.msk.bf16.mxu0 %vm685_vm5, %v9857_v7 }
 0xa61   : > { %7105 = vmatmul.mubr.msk.bf16.vlgmr.msra.gmra.mrb[8].mxu0 %vm685_vm5, %v9858_v11 }
 0xa62   : > { %7108 = vmatprep.mubr.msk.bf16.mxu0 %vm685_vm5, %v9859_v46  ;;  %7113 = vmatpush3.bf16.msra.mxu0 %v7523_v0 }
 0xa63   : > { %7114 = vmatprep.subr.bf16.mxu0 %v7524_v63 }
 0xa66   : > { %7115 = vmatpush3.bf16.msra.mxu0 %v7524_v63 }
 0xa69   : > { %7109 = vmatmul.mubr.msk.bf16.gmra.mrb[132].mxu0 %vm685_vm5, %v4615_v40 }
 0xaf0   : > { %v6934_v21 = vpop.f32.mrb[108].mxu0 }
 0xaf1   : > { %v4045_v23 = vadd.f32 %v6934_v21, %v3945_v39  ;;  %v4025_v13 = vpop.f32.mrb[109].mxu0 }
 0xaf2   : > { %v4043_v56 = vadd.f32 %v4025_v13, %v3943_v38  ;;  %v6935_v35 = vpop.f32.mrb[110].mxu0 }
 0xaf3   : > { %v4028_v19 = vpop.f32.mrb[111].mxu0 }
 0xaf4   : > { %v4044_v33 = vadd.f32 %v4028_v19, %v3944_v54 }
 0xb00   : > { %v7016_v57 = vpop.f32.mrb[112].mxu0 }
 0xb01   : > { %v4382_v5 = vadd.f32 %v7016_v57, %v4045_v23  ;;  %v4362_v24 = vpop.f32.mrb[113].mxu0 }
 0xb02   : > { %v4380_v15 = vadd.f32 %v4362_v24, %v4043_v56  ;;  %v7017_v36 = vpop.f32.mrb[114].mxu0  ;;  %v4934_v24 = vld [vmem:[#allocation3] sm:$0xff] }
 0xb03   : > { %v4365_v45 = vpop.f32.mrb[115].mxu0  ;;  %v4936_v36 = vld [vmem:[#allocation3 + $0x10] sm:$0xff] }
 0xb04   : > { %v4381_v2 = vadd.f32 %v4365_v45, %v4044_v33  ;;  %v4937_v45 = vld [vmem:[#allocation3 + $0x18] sm:$0xff] }
 0xb10   : > { %v7028_v44 = vpop.f32.mrb[116].mxu0 }
 0xb11   : > { %v4482_v27 = vadd.f32 %v7028_v44, %v4382_v5  ;;  %v4462_v51 = vpop.f32.mrb[117].mxu0 }
 0xb12   : > { %v4480_v43 = vadd.f32 %v4462_v51, %v4380_v15  ;;  %v7029_v50 = vpop.f32.mrb[118].mxu0  ;;  %v4935_v15 = vld [vmem:[#allocation3 + $0x8] sm:$0xff] }
 0xb13   : > { %v4465_v29 = vpop.f32.mrb[119].mxu0 }
 0xb14   : > { %v4481_v61 = vadd.f32 %v4465_v29, %v4381_v2  ;;  %v4938_v2 = vld [vmem:[#allocation3 + $0x20] sm:$0xff] }
 0xb18   : > { %v4682_v34 = vpop.f32.mrb[102].mxu0 }
 0xb19   : > { %v7081_v55 = vpop.f32.mrb[103].mxu0 }
 0xb1c   : > { %v4687_v30 = vpop.f32.mrb[120].mxu0 }
 0xb1d   : > { %v4716_v49 = vpack.c.bf16 %v4687_v30, %v4682_v34  ;;  %v7084_v8 = vpop.f32.mrb[121].mxu0 }
 0xb1f   : > { %7116 = vmatprep.mubr.msk.bf16.mxu0 %vm685_vm5, %v4716_v49 }
 0xb20   : > { %v4692_v47 = vpop.f32.mrb[122].mxu0 }
 0xb21   : > { %v7087_v60 = vpop.f32.mrb[123].mxu0 }
 0xb24   : > { %v4697_v12 = vpop.f32.mrb[124].mxu0 }
 0xb25   : > { %v4717_v59 = vpack.c.bf16 %v4697_v12, %v4692_v47  ;;  %v7090_v37 = vpop.f32.mrb[125].mxu0 }
 0xb27   : > { %7117 = vmatmul.mubr.msk.bf16.vlgmr.msra.gmra.mrb[8].mxu0 %vm685_vm5, %v4717_v59 }
 0xb28   : > { %v4702_v20 = vpop.f32.mrb[126].mxu0 }
 0xb29   : > { %v7093_v42 = vpop.f32.mrb[127].mxu0 }
 0xb2c   : > { %v4707_v62 = vpop.f32.mrb[128].mxu0 }
 0xb2d   : > { %v4718_v41 = vpack.c.bf16 %v4707_v62, %v4702_v20  ;;  %v7096_v32 = vpop.f32.mrb[129].mxu0 }
 0xb2f   : > { %7120 = vmatprep.mubr.msk.bf16.mxu0 %vm685_vm5, %v4718_v41 }
 0xb30   : > { %v4712_v9 = vpop.f32.mrb[130].mxu0 }
 0xb31   : > { %v4719_v28 = vpack.c.bf16 %v4712_v9, %v4712_v9  ;;  %v7099_v3 = vpop.f32.mrb[131].mxu0  ;;  %v4939_v9 = vld [vmem:[#allocation3 + $0x28] sm:$0xff] }
 0xb33   : > { %7121 = vmatmul.mubr.msk.bf16.gmra.mrb[136].mxu0 %vm685_vm5, %v4719_v28 }
 0xb3c   : > { %v7110_v58 = vpop.f32.mrb[132].mxu0 }
 0xb3d   : > { %v4819_v6 = vadd.f32 %v7110_v58, %v4482_v27  ;;  %v4799_v25 = vpop.f32.mrb[133].mxu0 }
 0xb3e   : > { %v4817_v31 = vadd.f32 %v4799_v25, %v4480_v43  ;;  %v7111_v22 = vpop.f32.mrb[134].mxu0  ;;  %v4940_v25 = vld [vmem:[#allocation3 + $0x30] sm:$0x1] }
 0xb3f   : > { %v4802_v17 = vpop.f32.mrb[135].mxu0 }
 0xb40   : > { %v4818_v53 = vadd.f32 %v4802_v17, %v4481_v61 }
 0xbfa   : > { %v7118_v39 = vpop.f32.mrb[8].mxu0 }
 0xbfb   : > { %v4929_v16 = vadd.f32 %v7118_v39, %v5857_v14  ;;  %v4883_v38 = vpop.f32.mrb[9].mxu0 }
 0xbfc   : > { %v4927_v1 = vadd.f32 %v5857_v14, %v4883_v38  ;;  %v7119_v4 = vpop.f32.mrb[10].mxu0 }
 0xbfd   : > { %7541 = vtanh.f32 %v4929_v16  ;;  %v4886_v54 = vpop.f32.mrb[11].mxu0  ;;  %v4930_v52 = vadd.f32 %v7119_v4, %v5857_v14  ;;  %v5860_v44 = vmul.f32 -1.442695, %v4929_v16 }
 0xbfe   : > { %7543 = vtanh.f32 %v4927_v1  ;;  %v4928_v26 = vadd.f32 %v5857_v14, %v4886_v54  ;;  %v5858_v27 = vmul.f32 -1.442695, %v4927_v1 }
 0xbff   : > { %v5861_v51 = vmul.f32 -1.442695, %v4930_v52 }
 0xc00   : > { %7545 = vtanh.f32 %v4928_v26  ;;  %v5859_v29 = vmul.f32 -1.442695, %v4928_v26 }
 0xc01   : > { %7547 = vtanh.f32 %v4930_v52 }
 0xc06   : > { %v7122_v18 = vpop.f32.mrb[136].mxu0 }
 0xc07   : > { %v7542_v48 = vpop.eup %7541  ;;  %v4919_v7 = vadd.f32 %v7122_v18, %v4819_v6  ;;  %v4899_v11 = vpop.f32.mrb[137].mxu0 }
 0xc08   : > { %v7544_v46 = vpop.eup %7543  ;;  %v4917_v40 = vadd.f32 %v4899_v11, %v4817_v31  ;;  %5036 = vrot.lane.b32.xlu1 %v7542_v48, %s7798_s19  ;;  %v7123_v0 = vpop.f32.mrb[138].mxu0 }
 0xc09   : > { %5032 = vrot.lane.b32.xlu0 %v7544_v46, %s7798_s19  ;;  %v4902_v63 = vpop.f32.mrb[139].mxu0  ;;  %v4933_v19 = vadd.f32 %v5857_v14, %v4919_v7 }
 0xc0a   : > { %v4918_v21 = vadd.f32 %v4902_v63, %v4818_v53  ;;  %v7546_v23 = vpop.eup %7545  ;;  %v4931_v13 = vadd.f32 %v5857_v14, %v4917_v40 }
 0xc0b   : > { %v7548_v35 = vpop.eup %7547  ;;  %v5864_v30 = vmul.f32 -1.442695, %v4933_v19 }
 0xc0c   : > { %5034 = vrot.lane.b32.xlu1 %v7546_v23, %s7798_s19  ;;  %v4932_v56 = vadd.f32 %v5857_v14, %v4918_v21  ;;  %7549 = vtanh.f32 %v4931_v13  ;;  %v5862_v55 = vmul.f32 -1.442695, %v4931_v13 }
 0xc0e   : > { %7551 = vtanh.f32 %v4932_v56  ;;  %v5863_v8 = vmul.f32 -1.442695, %v4932_v56 }
 0xc0f   : > { %7553 = vtanh.f32 %v4933_v19  ;;  %v5229_v19 = vld [vmem:[%s9860_s21] sm:$0xff] }
 0xc10   : > { %5038 = vrot.lane.b32.xlu1 %v7548_v35, %s7798_s19  ;;  %7555 = vpow2.f32 %v5860_v44 }
 0xc11   : > { %7557 = vpow2.f32 %v5858_v27 }
 0xc12   : > { %7559 = vpow2.f32 %v5861_v51 }
 0xc13   : > { %7561 = vpow2.f32 %v5859_v29 }
 0xc16   : > { %v7550_v33 = vpop.eup %7549 }
 0xc17   : > { %5040 = vrot.lane.b32.xlu0 %v7550_v33, %s7798_s19  ;;  %v5230_v33 = vld [vmem:[%s9860_s21 + $0x8] sm:$0xff] }
 0xc18   : > { %v7552_v57 = vpop.eup %7551 }
 0xc19   : > { %5042 = vrot.lane.b32.xlu1 %v7552_v57, %s7798_s19  ;;  %v7554_v5 = vpop.eup %7553  ;;  %v7307_v57 = vpack.c.bf16 %v5230_v33, %v5229_v19 }
 0xc1a   : > { %v7556_v43 = vpop.eup %7555 }
 0xc1b   : > { %5044 = vrot.lane.b32.xlu0 %v7554_v5, %s7798_s19  ;;  %v7558_v50 = vpop.eup %7557  ;;  %v4964_v61 = vadd.f32 1.0, %v7556_v43  ;;  %7308 = vmatpush3.bf16.msra.mxu1 %v7307_v57 }
 0xc1c   : > { %v4962_v34 = vadd.f32 1.0, %v7558_v50  ;;  %v7560_v49 = vpop.eup %7559  ;;  %7309 = vmatprep.subr.bf16.mxu1 %v9842_v10 }
 0xc1d   : > { %4997 = vrot.lane.b32.xlu1 %v4934_v24, %s7799_s24  ;;  %7563 = vrcp.f32 %v4964_v61  ;;  %v4965_v47 = vadd.f32 1.0, %v7560_v49  ;;  %v7562_v60 = vpop.eup %7561 }
 0xc1e   : > { %7565 = vrcp.f32 %v4962_v34  ;;  %v4963_v20 = vadd.f32 1.0, %v7562_v60 }
 0xc1f   : > { %4999 = vrot.lane.b32.xlu0 %v4935_v15, %s7799_s24  ;;  %7567 = vpow2.f32 %v5862_v55  ;;  %v5231_v15 = vld [vmem:[%s9860_s21 + $0x10] sm:$0xff] }
 0xc20   : > { %7569 = vpow2.f32 %v5864_v30 }
 0xc21   : > { %5001 = vrot.lane.b32.xlu1 %v4936_v36, %s7799_s24  ;;  %7571 = vpow2.f32 %v5863_v8  ;;  %v5232_v36 = vld [vmem:[%s9860_s21 + $0x18] sm:$0xff] }
 0xc22   : > { %7573 = vrcp.f32 %v4965_v47 }
 0xc23   : > { %5003 = vrot.lane.b32.xlu0 %v4937_v45, %s7799_s24  ;;  %7575 = vrcp.f32 %v4963_v20  ;;  %v7310_v45 = vpack.c.bf16 %v5232_v36, %v5231_v15 }
 0xc25   : > { %7311 = vmatpush3.bf16.msra.mxu1 %v7310_v45 }
 0xc27   : > { %5005 = vrot.lane.b32.xlu0 %v4938_v2, %s7799_s24  ;;  %v9549_v12 = vpop.eup %7563 }
 0xc28   : > { %v9551_v37 = vpop.eup %7565 }
 0xc29   : > { %v7568_v32 = vpop.eup %7567 }
 0xc2a   : > { %v7570_v28 = vpop.eup %7569  ;;  %v4966_v3 = vadd.f32 1.0, %v7568_v32 }
 0xc2b   : > { %v7572_v6 = vpop.eup %7571  ;;  %v4968_v31 = vadd.f32 1.0, %v7570_v28 }
 0xc2c   : > { %v9558_v22 = vpop.eup %7573  ;;  %7577 = vrcp.f32 %v4966_v3  ;;  %v4967_v17 = vadd.f32 1.0, %v7572_v6 }
 0xc2d   : > { %7579 = vrcp.f32 %v4968_v31  ;;  %v9563_v39 = vpop.eup %7575 }
 0xc2e   : > { %7581 = vrcp.f32 %v4967_v17 }
 0xc36   : > { %v9567_v38 = vpop.eup %7577 }
 0xc37   : > { %v9570_v26 = vpop.eup %7579 }
 0xc38   : > { %v9573_v52 = vpop.eup %7581 }
 0xc7a   : > { %v5037_v59 = vpop.permute.xlu1 %5036 }
 0xc7b   : > { %v5055_v42 = vmul.f32 %v9549_v12, %v5037_v59  ;;  %v5033_v62 = vpop.permute.xlu0 %5032 }
 0xc7c   : > { %v5053_v41 = vmul.f32 %v9551_v37, %v5033_v62 }
 0xc7d   : > { %5071 = vrot.lane.b32.xlu1 %v5055_v42, %s7799_s24 }
 0xc7e   : > { %5067 = vrot.lane.b32.xlu0 %v5053_v41, %s7799_s24  ;;  %v5035_v58 = vpop.permute.xlu1 %5034 }
 0xc7f   : > { %v5054_v16 = vmul.f32 %v9563_v39, %v5035_v58 }
 0xc82   : > { %5007 = vrot.lane.b32.xlu0 %v4939_v9, %s7799_s24  ;;  %v5039_v53 = vpop.permute.xlu1 %5038 }
 0xc83   : > { %v5056_v14 = vmul.f32 %v9558_v22, %v5039_v53 }
 0xc85   : > { %5073 = vrot.lane.b32.xlu1 %v5056_v14, %s7799_s24 }
 0xc86   : > { %5009 = vrot.lane.b32.xlu0 %v4940_v25, %s7799_s24 }
 0xc89   : > { %5069 = vrot.lane.b32.xlu1 %v5054_v16, %s7799_s24  ;;  %v5041_v1 = vpop.permute.xlu0 %5040 }
 0xc8a   : > { %v5057_v4 = vmul.f32 %v9567_v38, %v5041_v1 }
 0xc8b   : > { %v5043_v54 = vpop.permute.xlu1 %5042 }
 0xc8c   : > { %v5058_v48 = vmul.f32 %v9573_v52, %v5043_v54 }
 0xc8d   : > { %5075 = vrot.lane.b32.xlu1 %v5057_v4, %s7799_s24  ;;  %v5045_v18 = vpop.permute.xlu0 %5044 }
 0xc8e   : > { %v5059_v7 = vmul.f32 %v9570_v26, %v5045_v18 }
 0xc8f   : > { %v4998_v46 = vpop.permute.xlu1 %4997 }
 0xc90   : > { %5079 = vrot.lane.b32.xlu0 %v5059_v7, %s7799_s24  ;;  %v5018_v21 = vmul.f32 %v9551_v37, %v4998_v46 }
 0xc91   : > { %5077 = vrot.lane.b32.xlu1 %v5058_v48, %s7799_s24  ;;  %v5000_v11 = vpop.permute.xlu0 %4999 }
 0xc92   : > { %v5019_v44 = vmul.f32 %v9563_v39, %v5000_v11 }
 0xc93   : > { %v5002_v0 = vpop.permute.xlu1 %5001 }
 0xc94   : > { %v5020_v56 = vmul.f32 %v9549_v12, %v5002_v0 }
 0xc95   : > { %v5004_v40 = vpop.permute.xlu0 %5003 }
 0xc96   : > { %v5021_v10 = vmul.f32 %v9558_v22, %v5004_v40 }
 0xc99   : > { %v5006_v63 = vpop.permute.xlu0 %5005 }
 0xc9a   : > { %v5022_v30 = vmul.f32 %v9567_v38, %v5006_v63 }
 0xcef   : > { %v5072_v23 = vpop.permute.xlu1 %5071 }
 0xcf0   : > { %v5068_v13 = vpop.permute.xlu0 %5067  ;;  %v5090_v5 = vadd.f32 %v5072_v23, %v5020_v56 }
 0xcf1   : > { %v5088_v35 = vadd.f32 %v5068_v13, %v5018_v21 }
 0xcf2   : > { %v5211_v49 = vsel %vm5207_vm14, %v5090_v5, 0.0 }
 0xcf3   : > { %7583 = vtanh.f32 %v5088_v35  ;;  %v5208_v29 = vsel %vm5207_vm14, %v5088_v35, 0.0 }
 0xcf4   : > { %7585 = vtanh.f32 %v5090_v5  ;;  %v5008_v27 = vpop.permute.xlu0 %5007 }
 0xcf5   : > { %v5023_v62 = vmul.f32 %v9573_v52, %v5008_v27 }
 0xcf7   : > { %v5074_v24 = vpop.permute.xlu1 %5073 }
 0xcf8   : > { %v5091_v61 = vadd.f32 %v5074_v24, %v5021_v10  ;;  %v5010_v8 = vpop.permute.xlu0 %5009 }
 0xcf9   : > { %v5024_v41 = vmul.f32 %v9570_v26, %v5010_v8 }
 0xcfa   : > { %v5213_v59 = vsel %vm5207_vm14, %v5091_v61, 0.0 }
 0xcfb   : > { %v5070_v51 = vpop.permute.xlu1 %5069 }
 0xcfc   : > { %v5089_v43 = vadd.f32 %v5070_v51, %v5019_v44 }
 0xcfd   : > { %v7584_v2 = vpop.eup %7583 }
 0xcfe   : > { %5109 = vrot.lane.b32.xlu0 %v7584_v2, %s7798_s19  ;;  %v7586_v50 = vpop.eup %7585  ;;  %v5209_v34 = vsel %vm5207_vm14, %v5089_v43, 0.0 }
 0xcff   : > { %v5210_v55 = vadd.f32 %v5209_v34, %v5208_v29  ;;  %v5076_v60 = vpop.permute.xlu1 %5075 }
 0xd00   : > { %v5092_v20 = vadd.f32 %v5076_v60, %v5022_v30 }
 0xd01   : > { %v5212_v47 = vadd.f32 %v5211_v49, %v5210_v55 }
 0xd02   : > { %5113 = vrot.lane.b32.xlu0 %v7586_v50, %s7798_s19  ;;  %7587 = vtanh.f32 %v5092_v20  ;;  %v5215_v32 = vsel %vm5207_vm14, %v5092_v20, 0.0  ;;  %v5080_v28 = vpop.permute.xlu0 %5079 }
 0xd03   : > { %v5214_v42 = vadd.f32 %v5213_v59, %v5212_v47  ;;  %v5078_v3 = vpop.permute.xlu1 %5077  ;;  %v9606_v58 = vadd.f32 %v5080_v28, %v5024_v41 }
 0xd04   : > { %v5093_v6 = vadd.f32 %v5078_v3, %v5023_v62 }
 0xd05   : > { %v5216_v9 = vadd.f32 %v5215_v32, %v5214_v42  ;;  %7589 = vtanh.f32 %v9606_v58  ;;  %v5220_v17 = vsel %vm5219_vm15, %v9606_v58, 0.0 }
 0xd06   : > { %v5217_v25 = vsel %vm5207_vm14, %v5093_v6, 0.0  ;;  %7591 = vtanh.f32 %v5089_v43 }
 0xd07   : > { %v5218_v31 = vadd.f32 %v5217_v25, %v5216_v9  ;;  %7593 = vtanh.f32 %v5091_v61 }
 0xd08   : > { %7595 = vtanh.f32 %v5093_v6 }
 0xd09   : > { %v5221_v53 = vadd.f32 %v5220_v17, %v5218_v31 }
 0xd0b   : > { %v5222_v14 = vrot.slane %v5221_v53, 4 }
 0xd0c   : > { %v7588_v16 = vpop.eup %7587 }
 0xd0d   : > { %5117 = vrot.lane.b32.xlu0 %v7588_v16, %s7798_s19  ;;  %v5223_v1 = vadd.f32 %v5222_v14, %v5221_v53 }
 0xd0f   : > { %v5224_v4 = vrot.slane %v5223_v1, 2  ;;  %v7590_v54 = vpop.eup %7589 }
 0xd10   : > { %v7592_v46 = vpop.eup %7591 }
 0xd11   : > { %5121 = vrot.lane.b32.xlu0 %v7590_v54, %s7798_s19  ;;  %v5225_v18 = vadd.f32 %v5224_v4, %v5223_v1  ;;  %v7594_v40 = vpop.eup %7593 }
 0xd12   : > { %v7596_v0 = vpop.eup %7595 }
 0xd13   : > { %v5226_v48 = vrot.slane %v5225_v18, 1 }
 0xd15   : > { %5179 = vrot.lane.b32.xlu0 %v5088_v35, %s7800_s23  ;;  %v5227_v7 = vadd.f32 %v5226_v48, %v5225_v18 }
 0xd17   : > { %v5228_v11 = vmul.f32 0.020408163, %v5227_v7 }
 0xd19   : > { %5183 = vrot.lane.b32.xlu0 %v5090_v5, %s7800_s23  ;;  %5235 = vrot.lane.b32.xlu1 %v5228_v11, %s7800_s23 }
 0xd1d   : > { %5187 = vrot.lane.b32.xlu0 %v5092_v20, %s7800_s23  ;;  %5111 = vrot.lane.b32.xlu1 %v7592_v46, %s7798_s19 }
 0xd21   : > { %5115 = vrot.lane.b32.xlu1 %v7594_v40, %s7798_s19 }
 0xd25   : > { %5119 = vrot.lane.b32.xlu1 %v7596_v0, %s7798_s19  ;;  %s9650_s19 = sadd.s32 %s7776_s17, %s5866_s14 }
 0xd26   : > { %s5867_s11 = sshll.u32 %s9650_s19, 4 }
 0xd27   : > { %s9658_s13 = scalar_lea.hbm %s9862_s29, %s5867_s11 }
 0xd29   : > { %5181 = vrot.lane.b32.xlu1 %v5089_v43, %s7800_s23 }
 0xd2d   : > { %5185 = vrot.lane.b32.xlu1 %v5091_v61, %s7800_s23 }
 0xd70   : > { %v5110_v63 = vpop.permute.xlu0 %5109 }
 0xd71   : > { %v5130_v13 = vmul.f32 %v9551_v37, %v5110_v63 }
 0xd74   : > { %v5114_v21 = vpop.permute.xlu0 %5113 }
 0xd75   : > { %v5132_v23 = vmul.f32 %v9549_v12, %v5114_v21 }
 0xd77   : > { %5148 = vrot.lane.b32.xlu1 %v5132_v23, %s7799_s24 }
 0xd7b   : > { %5144 = vrot.lane.b32.xlu1 %v5130_v13, %s7799_s24 }
 0xd7f   : > { %v5118_v56 = vpop.permute.xlu0 %5117 }
 0xd80   : > { %v5134_v57 = vmul.f32 %v9567_v38, %v5118_v56 }
 0xd83   : > { %v5122_v35 = vpop.permute.xlu0 %5121 }
 0xd84   : > { %v5136_v19 = vmul.f32 %v9570_v26, %v5122_v35 }
 0xd86   : > { %5156 = vrot.lane.b32.xlu1 %v5136_v19, %s7799_s24 }
 0xd87   : > { %v5180_v33 = vpop.permute.xlu0 %5179 }
 0xd88   : > { %5200 = vst.msk [vmem:[#allocation3] sm:$0xff] %vm685_vm5, %v5180_v33 }
 0xd8a   : > { %5152 = vrot.lane.b32.xlu1 %v5134_v57, %s7799_s24 }
 0xd8b   : > { %v5184_v12 = vpop.permute.xlu0 %5183  ;;  %v5236_v5 = vpop.permute.xlu1 %5235 }
 0xd8c   : > { %5202 = vst.msk [vmem:[#allocation3 + $0x10] sm:$0xff] %vm685_vm5, %v5184_v12  ;;  %7133 = vmatmul.mubr.msk.f32.vlgmr.msra.gmra.mrb[200].mxu1 %vm685_vm5, %v5236_v5 }
 0xd8d   : > { %5310 = vst.msk [vmem:[%s532_s22] sm:$0x1] %vm697_vm6, %v5236_v5 }
 0xd8e   : > { %5189 = vrot.lane.b32.xlu1 %v5093_v6, %s7800_s23 }
 0xd8f   : > { %v5188_v37 = vpop.permute.xlu0 %5187  ;;  %v5112_v26 = vpop.permute.xlu1 %5111 }
 0xd90   : > { %5204 = vst.msk [vmem:[#allocation3 + $0x20] sm:$0xff] %vm685_vm5, %v5188_v37  ;;  %v5131_v36 = vmul.f32 %v9563_v39, %v5112_v26 }
 0xd93   : > { %v5116_v38 = vpop.permute.xlu1 %5115 }
 0xd94   : > { %v5133_v24 = vmul.f32 %v9558_v22, %v5116_v38 }
 0xd96   : > { %5150 = vrot.lane.b32.xlu0 %v5133_v24, %s7799_s24 }
 0xd97   : > { %v5120_v15 = vpop.permute.xlu1 %5119 }
 0xd98   : > { %v5135_v2 = vmul.f32 %v9573_v52, %v5120_v15 }
 0xd9a   : > { %5146 = vrot.lane.b32.xlu0 %v5131_v36, %s7799_s24 }
 0xd9b   : > { %v5182_v45 = vpop.permute.xlu1 %5181 }
 0xd9c   : > { %5201 = vst.msk [vmem:[#allocation3 + $0x8] sm:$0xff] %vm685_vm5, %v5182_v45 }
 0xd9e   : > { %5154 = vrot.lane.b32.xlu0 %v5135_v2, %s7799_s24  ;;  %s5344_s24 = sshll.u32 %s532_s22, 4  ;;  %s9662_s24 = int_to_ptr.vmem [resolvable:$true] %s5344_s24 }
 0xd9f   : > { %v5186_v44 = vpop.permute.xlu1 %5185  ;;  %s7654_s17 = scalar_lea.vmem %s9662_s24, 16  ;;  %p7661_p6 = scmp.lt.s32.totalorder %s9662_s24, %s7659_s20 }
 0xda0   : > { %5203 = vst.msk [vmem:[#allocation3 + $0x18] sm:$0xff] %vm685_vm5, %v5186_v44  ;;  %p7655_p12 = scmp.ne.s32.totalorder %s9662_s24, %s7654_s17 }
 0xda2   : > { %5191 = vrot.lane.b32.xlu0 %v9606_v58, %s7800_s23  ;;  %p7656_p4 = pnand %p7655_p12, %p9864_p1  ;;  %s7660_s23 = scalar_lea.vmem %s7659_s20, 32 }
 0xda3   : > { %p7662_p7 = scmp.lt.s32.totalorder %s7660_s23, %s7654_s17 }
 0xda4   : > { %p7657_p5 = pneg %p7656_p4 }
 0xda5   : > { %p7663_p9 = por %p7662_p7, %p7661_p6 }
 0xda7   : > { %p7664_p11 = pnand %p7663_p9, %p7657_p5 }
 0xde9   : > { %v5149_v22 = vpop.permute.xlu1 %5148 }
 0xdea   : > { %5167 = vst.msk [vmem:[#allocation2 + $0x10] sm:$0xff] %vm685_vm5, %v5149_v22 }
 0xdeb   : > { %7667 = shalt.err (!%p7664_p11)
}
 0xdec   : > { %s7668_s22 = scalar_lea.hbm %s9658_s13, 16  ;;  %s7672_s26 = scalar_lea.hbm %s9863_s25, 128 }
 0xded   : > { %p7669_p13 = scmp.ne.s32.totalorder %s9658_s13, %s7668_s22  ;;  %p7673_p0 = scmp.lt.u32.totalorder %s9658_s13, %s9863_s25 }
 0xdee   : > { %p7674_p2 = scmp.lt.u32.totalorder %s7672_s26, %s7668_s22  ;;  %p7676_p12 = scmp.lt.u32.totalorder %s7668_s22, %s9658_s13 }
 0xdef   : > { %p7670_p3 = pnand %p7669_p13, %p9864_p1 }
 0xdf0   : > { %p7675_p10 = por %p7674_p2, %p7673_p0 }
 0xdf1   : > { %p7671_p8 = pneg %p7670_p3 }
 0xdf2   : > { %p7677_p4 = por %p7676_p12, %p7675_p10 }
 0xdf4   : > { %p7678_p5 = pnand %p7677_p4, %p7671_p8 }
 0xdf6   : > { %7681 = shalt.err (!%p7678_p5)
}
 0xdf7   : > { %7391 = dma.vmem_to_hbm [thread:$0]  (%p9864_p1), %s9662_s24, 16, %s9658_s13, %s5323_s16   ;;  %v5145_v39 = vpop.permute.xlu1 %5144  ;;  %vm5311_vm0 = vcmask 73728  }
 0xdf8   : > { %5165 = vst.msk [vmem:[#allocation2] sm:$0xff] %vm685_vm5, %v5145_v39  ;;  %s9865_s16 = sld [smem:[#allocation34_spill]]  ;;  %s5359_s17 = sshll.u32 %s538_s28, 4  ;;  %s9707_s17 = int_to_ptr.vmem [resolvable:$true] %s5359_s17 }
 0xdf9   : > { %s9866_s22 = sld [smem:[#allocation36_spill]]  ;;  %s5327_s18 = scalar_lea.sflag [#allocation11], %s8018_s10 }
 0xdfa   : > { %s7682_s26 = scalar_lea.vmem %s9707_s17, 16  ;;  %s7802_s29 = smov [#allocation10]  }
 0xdfb   : > { %v5157_v52 = vpop.permute.xlu1 %5156  ;;  %p7683_p6 = scmp.ne.s32.totalorder %s9707_s17, %s7682_s26  ;;  %s7686_s19 = sshll.u32 %s7802_s29, 4  ;;  %s7687_s19 = int_to_ptr.vmem [resolvable:$false] %s7686_s19 }
 0xdfc   : > { %5171 = vst.msk [vmem:[#allocation2 + $0x30] sm:$0x1] %vm697_vm6, %v5157_v52  ;;  %s7688_s15 = scalar_lea.vmem %s7687_s19, 32  ;;  %p7689_p11 = scmp.lt.s32.totalorder %s9707_s17, %s7687_s19 }
 0xdfd   : > { %p7684_p7 = pnand %p7683_p6, %p9864_p1  ;;  %p7690_p13 = scmp.lt.s32.totalorder %s7688_s15, %s7682_s26 }
 0xdfe   : > { %v5233_v61 = vld [vmem:[%s9865_s16] sm:$0x1] }
 0xdff   : > { %v5153_v27 = vpop.permute.xlu1 %5152  ;;  %s9705_s14 = scalar_lea.hbm %s9866_s22, %s5867_s11  ;;  %p7685_p9 = pneg %p7684_p7 }
 0xe00   : > { %5169 = vst.msk [vmem:[#allocation2 + $0x20] sm:$0xff] %vm685_vm5, %v5153_v27  ;;  %p7691_p3 = por %p7690_p13, %p7689_p11 }
 0xe02   : > { %p7692_p8 = pnand %p7691_p3, %p7685_p9 }
 0xe03   : > { %v5190_v51 = vpop.permute.xlu1 %5189 }
 0xe04   : > { %5205 = vst.msk [vmem:[#allocation3 + $0x28] sm:$0xff] %vm685_vm5, %v5190_v51 }
 0xe08   : > { %v5151_v10 = vpop.permute.xlu0 %5150 }
 0xe09   : > { %5168 = vst.msk [vmem:[#allocation2 + $0x18] sm:$0xff] %vm685_vm5, %v5151_v10 }
 0xe0c   : > { %v5147_v43 = vpop.permute.xlu0 %5146 }
 0xe0d   : > { %5166 = vst.msk [vmem:[#allocation2 + $0x8] sm:$0xff] %vm685_vm5, %v5147_v43 }
 0xe10   : > { %v5155_v50 = vpop.permute.xlu0 %5154 }
 0xe11   : > { %5170 = vst.msk [vmem:[#allocation2 + $0x28] sm:$0xff] %vm685_vm5, %v5155_v50 }
 0xe14   : > { %v5192_v29 = vpop.permute.xlu0 %5191 }
 0xe15   : > { %5206 = vst.msk [vmem:[#allocation3 + $0x30] sm:$0x1] %vm697_vm6, %v5192_v29 }
 0xe5f   : > { %v5305_v34 = vpop.f32.mrb[200].mxu1 }
 0xe60   : > { %v5306_v55 = vadd.f32 %v5305_v34, %v5233_v61  ;;  %v7134_v30 = vpop.f32.mrb[201].mxu1 }
 0xe62   : > { %5312 = vst.msk [vmem:[%s538_s28] sm:$0x1] %vm5311_vm0, %v5306_v55 }
 0xe63   : > { %7695 = shalt.err (!%p7692_p8)
}
 0xe64   : > { %s7696_s10 = scalar_lea.hbm %s9705_s14, 16  ;;  %s7700_s13 = scalar_lea.hbm %s9866_s22, 128 }
 0xe65   : > { %p7697_p0 = scmp.ne.s32.totalorder %s9705_s14, %s7696_s10  ;;  %p7701_p12 = scmp.lt.u32.totalorder %s9705_s14, %s9866_s22 }
 0xe66   : > { %p7702_p4 = scmp.lt.u32.totalorder %s7700_s13, %s7696_s10  ;;  %p7704_p6 = scmp.lt.u32.totalorder %s7696_s10, %s9705_s14 }
 0xe67   : > { %p7698_p2 = pnand %p7697_p0, %p9864_p1 }
 0xe68   : > { %p7703_p5 = por %p7702_p4, %p7701_p12 }
 0xe69   : > { %p7699_p10 = pneg %p7698_p2 }
 0xe6a   : > { %p7705_p7 = por %p7704_p6, %p7703_p5 }
 0xe6c   : > { %p7706_p9 = pnand %p7705_p7, %p7699_p10 }
 0xe6e   : > { %7709 = shalt.err (!%p7706_p9)
}
 0xe6f   : > { %7392 = dma.vmem_to_hbm [thread:$0]  (%p9864_p1), %s9707_s17, 16, %s9705_s14, %s5327_s18  }
 0xe70 PF: > { %s9867_s20 = sld [smem:[#allocation20_spill]]  ;;  %s9868_s23 = sld [smem:[#allocation16_spill]] }
 0xe71   : > { %s9869_s26 = sld [smem:[#allocation24_spill]] }
 0xe76   : > { %p7413_p11 = scmp.ge.s32.totalorder %s9867_s20, 2  ;;  %s5383_s29 = sand.u32 1, %s9868_s23  }
 0xe77   : > { %p9870_p13 = scmp.ne.s32.totalorder %s9869_s26, 0  ;;  %s5384_s19 = scalar_lea.sflag [#allocation6], %s5383_s29 }
 0xe79   : > { %p7403_p3 = pnand %p7413_p11, %p9870_p13 }
 0xe7b   : > { %7751 = dma.done.wait (!%p7403_p3), %s5384_s19, 16  }
 0xe7c   : > { %7753 = vsyncadd (!%p7403_p3), %s5384_s19, 4294967280  ;;  %s5392_s15 = scalar_lea.sflag [#allocation11], %s5383_s29 }
 0xe7d   : > { %7755 = dma.done.wait (!%p7403_p3), %s5392_s15, 16  }
 0xe7e   : > { %7757 = vsyncadd (!%p7403_p3), %s5392_s15, 4294967280  ;;  %s33_s20 = sadd.s32 1, %s9867_s20   ;;  %s9871_s27 = sld [smem:[#allocation17_spill]] }
 0xe7f   : > { %p30_p8 = scmp.ge.s32.totalorder %s33_s20, 10   ;;  %s9872_s15 = sld [smem:[#allocation25_spill]] }
 0xe80   : > { %s9873_s16 = sld [smem:[#allocation18_spill]]  ;;  %s9874_s17 = sld [smem:[#allocation19_spill]] }
 0xe81   : > { %s9875_s18 = sld [smem:[#allocation21_spill]]  ;;  %s9876_s19 = sld [smem:[#allocation23_spill]] }
 0xe82   : > { %s9877_s29 = smov %s7764_s30  ;;  %32 = sbr.rel (!%p30_p8) target bundleno = 14 (0xe), region = 169 }
 0xe84   : > { %s9878_s30 = smov %s9871_s27 }
 0xe89   :  { %5396 = vsyncpa [#allocation5], 1 }
 0xe8a   :  { %5398 = vsyncpa [#allocation5 + $0x1], 1 }
 0xe8b   :  { %5399 = vsyncpa [#allocation8], 1 }
 0xe8c   :  { %5400 = vsyncpa [#allocation6], 1 }
 0xe8d   :  { %5402 = vsyncpa [#allocation6 + $0x1], 1 }
 0xe8e   :  { %5403 = vsyncpa [#allocation11], 1 }
 0xe8f   :  { %5405 = vsyncpa [#allocation11 + $0x1], 1 }

</bundles_post_ra>
